<compile_context>
chip_gen: v7x
topology: tpu7x:2x2x1
jax: 0.10.0
libtpu: 0.0.40
codegen_flags: <defaults>
</compile_context>

<pallas_src>
import math
from functools import partial

import numpy as np
import jax
import jax.numpy as jnp
from jax import lax
from jax.experimental import pallas as pl
from jax.experimental.pallas import tpu as pltpu


# ---------------------------------------------------------------------------
# Host-side constant tables (numpy, built once at trace time, DMA'd once and
# resident in VMEM).  Lane layout: packed images are contiguous blocks of
# h*w lanes; all tables are tiled / block-diagonal over the B_TILE images.
# ---------------------------------------------------------------------------
def _shift_masks_np(h, w, b_tile):
    """(9, b_tile*h*w) f32: mask[t]==1 where tap (dy,dx)=(t//3-1, t%3-1) reads an
    in-image pixel.  Zeroes lanes where a roll bled across image boundaries."""
    hw = h * w
    m = np.arange(hw)
    row, col = m // w, m % w
    masks = np.zeros((9, hw), np.float32)
    for kh in range(3):
        for kw in range(3):
            dy, dx = kh - 1, kw - 1
            ok = ((col + dx >= 0) & (col + dx < w) &
                  (row + dy >= 0) & (row + dy < h))
            masks[3 * kh + kw] = ok.astype(np.float32)
    return np.tile(masks, (1, b_tile))


def _decimate_np(h, w, b_tile):
    """(b_tile*h*w, b_tile*h*w//4) one-hot, block-diagonal over packed images:
    keeps lanes whose (row, col) are both even (MaxPool2d(2,2) decimation)."""
    hw, wo = h * w, w // 2
    hwo = (h // 2) * wo
    d = np.zeros((hw, hwo), np.float32)
    j = np.arange(hwo)
    d[(j // wo) * 2 * w + (j % wo) * 2, j] = 1.0
    return np.kron(np.eye(b_tile, dtype=np.float32), d)


def _upsample_np(h, w, b_tile):
    """(b_tile*h*w, b_tile*4*h*w) one-hot, block-diagonal: scatters input lane
    (r, c) to output lane (2r, 2c) of the 2x-upsampled grid."""
    hw = h * w
    u = np.zeros((hw, 4 * hw), np.float32)
    m = np.arange(hw)
    u[m, (m // w) * (4 * w) + (m % w) * 2] = 1.0
    return np.kron(np.eye(b_tile, dtype=np.float32), u)


# ---------------------------------------------------------------------------
# In-kernel helpers.  Values are channel-major (C, lanes) with the packed
# flattened spatial index on the lane axis.  pltpu.roll follows jnp.roll
# semantics (out[i] = x[(i - shift) mod L]); all shifts are non-negative.
# ---------------------------------------------------------------------------
def _conv3x3(x, w_ref, b_ref, masks, w_img, lanes):
    """'same' 3x3 conv: 9 rolled taps stacked into a (9*cin, lanes) slab, then
    one bf16 MXU matmul with f32 accumulation."""
    cin = x.shape[0]
    del cin
    taps = []
    for kh in range(3):
        for kw in range(3):
            s = (kh - 1) * w_img + (kw - 1)            # want tap[i] = x[i + s]
            if s == 0:
                taps.append(x)                          # center tap: no mask
            else:
                t = pltpu.roll(x, shift=(-s) % lanes, axis=1)
                taps.append(t * masks[3 * kh + kw:3 * kh + kw + 1, :])
    slab = jnp.concatenate(taps, axis=0).astype(jnp.bfloat16)
    out = jnp.dot(w_ref[...], slab, preferred_element_type=jnp.float32)
    return out + b_ref[...]


def _maxpool2x2(x, dec_ref, w_img, lanes):
    """MaxPool2d(2,2): 2x2 window max via two XLU rolls + one-hot decimation.
    Requires even (power-of-two) h, w: wrapped lanes are never selected."""
    mw = jnp.maximum(x, pltpu.roll(x, shift=lanes - 1, axis=1))        # x[i+1]
    mh = jnp.maximum(mw, pltpu.roll(mw, shift=lanes - w_img, axis=1))  # mw[i+w]
    return jnp.dot(mh.astype(jnp.bfloat16), dec_ref[...],
                   preferred_element_type=jnp.float32)


def _tconv2x2s2(x, w_ref, b_ref, up_ref, w_in, lanes_in):
    """ConvTranspose2d(kernel=2, stride=2): one scatter matmul to the 2x grid,
    3 XLU rolls for the sub-pixel offsets, one stacked bf16 weight matmul.
    No masks needed: rolled-in lanes of the sparse upsampled slab are zeros."""
    xu = jnp.dot(x.astype(jnp.bfloat16), up_ref[...],
                 preferred_element_type=jnp.float32)      # (cin, 4*lanes_in)
    w_out = 2 * w_in
    taps = []
    for kh in range(2):
        for kw in range(2):
            off = kh * w_out + kw                         # want tap[j] = xu[j - off]
            taps.append(xu if off == 0 else pltpu.roll(xu, shift=off, axis=1))
    slab = jnp.concatenate(taps, axis=0).astype(jnp.bfloat16)
    out = jnp.dot(w_ref[...], slab, preferred_element_type=jnp.float32)
    return out + b_ref[...]


# ---------------------------------------------------------------------------
# Fused forward kernel: one grid step = B_TILE lane-packed images, all layers.
# ---------------------------------------------------------------------------
def _autoencoder_kernel(x_ref, w1_ref, b1_ref, w2_ref, b2_ref,
                        tw1_ref, tb1_ref, tw2_ref, tb2_ref,
                        m1_ref, m2_ref, d1_ref, d2_ref, u1_ref, u2_ref,
                        o_ref, *, h, w, b_tile):
    l0 = b_tile * h * w
    l1 = l0 // 4
    l2 = l0 // 16
    x = x_ref[0]                                                        # (8, l0)
    a1 = jnp.maximum(_conv3x3(x, w1_ref, b1_ref, m1_ref[...], w, l0), 0.0)        # (16, l0)
    p1 = _maxpool2x2(a1, d1_ref, w, l0)                                            # (16, l1)
    a2 = jnp.maximum(_conv3x3(p1, w2_ref, b2_ref, m2_ref[...], w // 2, l1), 0.0)  # (8, l1)
    p2 = _maxpool2x2(a2, d2_ref, w // 2, l1)                                       # (8, l2)
    a3 = jnp.maximum(_tconv2x2s2(p2, tw1_ref, tb1_ref, u1_ref, w // 4, l2), 0.0)   # (16, l1)
    z = _tconv2x2s2(a3, tw2_ref, tb2_ref, u2_ref, w // 2, l1)                      # (3, l0)
    y = pl.reciprocal(1.0 + jnp.exp(-z), approx=True)     # sigmoid: exp + rcp on EUP
    o_ref[0] = jnp.clip(y, 0.0, 1.0)


# ---------------------------------------------------------------------------
# Model wrapper
# ---------------------------------------------------------------------------
def init_params(key):
    """Same shapes as the PyTorch module; uniform(+-1/sqrt(fan_in)) init."""
    ks = jax.random.split(key, 8)

    def u(k, shape, fan_in):
        bound = 1.0 / math.sqrt(fan_in)
        return jax.random.uniform(k, shape, jnp.float32, -bound, bound)

    return {
        "conv1_w": u(ks[0], (16, 3, 3, 3), 3 * 9),     # Conv2d(3, 16, 3, pad=1)
        "conv1_b": u(ks[1], (16,), 3 * 9),
        "conv2_w": u(ks[2], (4, 16, 3, 3), 16 * 9),    # Conv2d(16, 4, 3, pad=1)
        "conv2_b": u(ks[3], (4,), 16 * 9),
        "t_conv1_w": u(ks[4], (4, 16, 2, 2), 16 * 4),  # ConvTranspose2d(4, 16, 2, s=2)
        "t_conv1_b": u(ks[5], (16,), 16 * 4),
        "t_conv2_w": u(ks[6], (16, 3, 2, 2), 3 * 4),   # ConvTranspose2d(16, 3, 2, s=2)
        "t_conv2_b": u(ks[7], (3,), 3 * 4),
    }


def _pick_b_tile(n):
    """Pack several images along the lane axis per grid step (amortizes the
    ~0.35us/step overhead and tiny per-image DMAs) while keeping >= 2 grid
    steps so both v7x TensorCores get work via the 'parallel' batch axis."""
    for bt in (8, 4, 2):
        if n % bt == 0 and n // bt >= 2:
            return bt
    return 1


@jax.jit
def forward(params, x_nchw):
    n, cin, h, w = x_nchw.shape
    assert cin == 3 and h % 4 == 0 and w % 4 == 0
    assert (h & (h - 1)) == 0 and (w & (w - 1)) == 0  # power-of-two spatial dims
    hw = h * w
    bt = _pick_b_tile(n)
    g = n // bt
    l0 = bt * hw

    f32, bf16 = jnp.float32, jnp.bfloat16

    # ---- weights repacked for stacked-tap / stacked-sub-pixel matmuls (bf16) ----
    # conv:  W[o, t*cin_pad + i] = w[o, i, kh, kw],  t = 3*kh + kw
    w1 = jnp.pad(jnp.transpose(params["conv1_w"], (0, 2, 3, 1)),
                 ((0, 0), (0, 0), (0, 0), (0, 5))).reshape(16, 9 * 8).astype(bf16)
    b1 = params["conv1_b"].reshape(16, 1).astype(f32)
    # conv2 output channels padded 4 -> 8 so downstream slabs stay 8-row aligned
    w2 = jnp.pad(jnp.transpose(params["conv2_w"], (0, 2, 3, 1)).reshape(4, 9 * 16),
                 ((0, 4), (0, 0))).astype(bf16)
    b2 = jnp.pad(params["conv2_b"], (0, 4)).reshape(8, 1).astype(f32)
    # tconv: W[o, t*cin_pad + i] = w[i, o, kh, kw],  t = 2*kh + kw
    tw1 = jnp.pad(jnp.transpose(params["t_conv1_w"], (1, 2, 3, 0)),
                  ((0, 0), (0, 0), (0, 0), (0, 4))).reshape(16, 4 * 8).astype(bf16)
    tb1 = params["t_conv1_b"].reshape(16, 1).astype(f32)
    tw2 = jnp.transpose(params["t_conv2_w"], (1, 2, 3, 0)).reshape(3, 4 * 16).astype(bf16)
    tb2 = params["t_conv2_b"].reshape(3, 1).astype(f32)

    # ---- precomputed mask / one-hot tables (resident VMEM, DMA'd once) ----
    m1 = jnp.asarray(_shift_masks_np(h, w, bt), f32)
    m2 = jnp.asarray(_shift_masks_np(h // 2, w // 2, bt), f32)
    d1 = jnp.asarray(_decimate_np(h, w, bt), bf16)
    d2 = jnp.asarray(_decimate_np(h // 2, w // 2, bt), bf16)
    u1 = jnp.asarray(_upsample_np(h // 4, w // 4, bt), bf16)
    u2 = jnp.asarray(_upsample_np(h // 2, w // 2, bt), bf16)

    # ---- lane-pack the batch: (g, 8, bt*hw); channels zero-padded 3 -> 8 ----
    xp = x_nchw.astype(f32).reshape(g, bt, 3, hw).transpose(0, 2, 1, 3)
    xp = jnp.pad(xp, ((0, 0), (0, 5), (0, 0), (0, 0))).reshape(g, 8, l0)

    def cspec(a):
        return pl.BlockSpec(a.shape, lambda i: (0, 0))

    out = pl.pallas_call(
        partial(_autoencoder_kernel, h=h, w=w, b_tile=bt),
        out_shape=jax.ShapeDtypeStruct((g, 3, l0), f32),
        grid=(g,),
        in_specs=[
            pl.BlockSpec((1, 8, l0), lambda i: (i, 0, 0)),
            cspec(w1), cspec(b1), cspec(w2), cspec(b2),
            cspec(tw1), cspec(tb1), cspec(tw2), cspec(tb2),
            cspec(m1), cspec(m2), cspec(d1), cspec(d2), cspec(u1), cspec(u2),
        ],
        out_specs=pl.BlockSpec((1, 3, l0), lambda i: (i, 0, 0)),
        compiler_params=pltpu.CompilerParams(dimension_semantics=("parallel",)),
    )(xp, w1, b1, w2, b2, tw1, tb1, tw2, tb2, m1, m2, d1, d2, u1, u2)

    return out.reshape(g, 3, bt, hw).transpose(0, 2, 1, 3).reshape(n, 3, h, w)


# ---------------------------------------------------------------------------
# Pure-JAX reference (no Pallas) for a correctness cross-check.
# ---------------------------------------------------------------------------
def reference_forward(params, x):
    def conv(y, wt, b):
        out = lax.conv_general_dilated(
            y, wt, window_strides=(1, 1), padding=((1, 1), (1, 1)),
            dimension_numbers=("NCHW", "OIHW", "NCHW"))
        return out + b[None, :, None, None]

    def pool(y):
        return lax.reduce_window(y, -jnp.inf, lax.max,
                                 (1, 1, 2, 2), (1, 1, 2, 2), "VALID")

    def tconv(y, wt, b):  # wt: (Cin, Cout, 2, 2); stride == kernel: no overlap
        n, _, hh, ww = y.shape
        co = wt.shape[1]
        t = jnp.einsum("nchw,cdkl->ndhkwl", y, wt)
        return t.reshape(n, co, 2 * hh, 2 * ww) + b[None, :, None, None]

    y = jax.nn.relu(conv(x, params["conv1_w"], params["conv1_b"]))
    y = pool(y)
    y = jax.nn.relu(conv(y, params["conv2_w"], params["conv2_b"]))
    y = pool(y)
    y = jax.nn.relu(tconv(y, params["t_conv1_w"], params["t_conv1_b"]))
    y = jax.nn.sigmoid(tconv(y, params["t_conv2_w"], params["t_conv2_b"]))
    return y


if __name__ == "__main__":
    key = jax.random.PRNGKey(0)
    pkey, xkey = jax.random.split(key)
    params = init_params(pkey)
    # Small input consistent with the module: 3 input channels, 16x16 spatial.
    # batch=8 so the lane-packed path (B_TILE=4, grid=2) is exercised.
    x = jax.random.normal(xkey, (8, 3, 16, 16), jnp.float32)

    y = forward(params, x)
    jax.block_until_ready(y)

    y_ref = reference_forward(params, x)
    jax.block_until_ready(y_ref)

    assert y.shape == (8, 3, 16, 16), y.shape
    assert y.dtype == jnp.float32
    assert bool(jnp.all(jnp.isfinite(y)))
    assert bool(jnp.all((y >= 0.0) & (y <= 1.0)))
    err = float(jnp.max(jnp.abs(y - y_ref)))
    assert err < 2e-2, err
    print("KERNEL_OK")
</pallas_src>

<mosaic_0001>
module attributes {stable_mosaic.version = 11 : i64} {
  func.func @_autoencoder_kernel(%arg0: i32, %arg1: memref<1x8x1024xf32, #tpu.memory_space<vmem>>, %arg2: memref<16x72xbf16, #tpu.memory_space<vmem>>, %arg3: memref<16x1xf32, #tpu.memory_space<vmem>>, %arg4: memref<8x144xbf16, #tpu.memory_space<vmem>>, %arg5: memref<8x1xf32, #tpu.memory_space<vmem>>, %arg6: memref<16x32xbf16, #tpu.memory_space<vmem>>, %arg7: memref<16x1xf32, #tpu.memory_space<vmem>>, %arg8: memref<3x64xbf16, #tpu.memory_space<vmem>>, %arg9: memref<3x1xf32, #tpu.memory_space<vmem>>, %arg10: memref<9x1024xf32, #tpu.memory_space<vmem>>, %arg11: memref<9x256xf32, #tpu.memory_space<vmem>>, %arg12: memref<1024x256xbf16, #tpu.memory_space<vmem>>, %arg13: memref<256x64xbf16, #tpu.memory_space<vmem>>, %arg14: memref<64x256xbf16, #tpu.memory_space<vmem>>, %arg15: memref<256x1024xbf16, #tpu.memory_space<vmem>>, %arg16: memref<1x3x1024xf32, #tpu.memory_space<vmem>>) attributes {dimension_semantics = [#tpu.dimension_semantics<parallel>], iteration_bounds = array<i64: 2>, scalar_prefetch = 0 : i64, scratch_operands = 0 : i64, tpu.core_type = #tpu.core_type<tc>, window_params = [{transform_indices = @transform_0, window_bounds = array<i64: 1, 8, 1024>}, {pipeline_mode = #tpu.pipeline_mode<synchronous>, transform_indices = @transform_1, window_bounds = array<i64: 16, 72>}, {pipeline_mode = #tpu.pipeline_mode<synchronous>, transform_indices = @transform_2, window_bounds = array<i64: 16, 1>}, {pipeline_mode = #tpu.pipeline_mode<synchronous>, transform_indices = @transform_3, window_bounds = array<i64: 8, 144>}, {pipeline_mode = #tpu.pipeline_mode<synchronous>, transform_indices = @transform_4, window_bounds = array<i64: 8, 1>}, {pipeline_mode = #tpu.pipeline_mode<synchronous>, transform_indices = @transform_5, window_bounds = array<i64: 16, 32>}, {pipeline_mode = #tpu.pipeline_mode<synchronous>, transform_indices = @transform_6, window_bounds = array<i64: 16, 1>}, {pipeline_mode = #tpu.pipeline_mode<synchronous>, transform_indices = @transform_7, window_bounds = array<i64: 3, 64>}, {pipeline_mode = #tpu.pipeline_mode<synchronous>, transform_indices = @transform_8, window_bounds = array<i64: 3, 1>}, {pipeline_mode = #tpu.pipeline_mode<synchronous>, transform_indices = @transform_9, window_bounds = array<i64: 9, 1024>}, {pipeline_mode = #tpu.pipeline_mode<synchronous>, transform_indices = @transform_10, window_bounds = array<i64: 9, 256>}, {pipeline_mode = #tpu.pipeline_mode<synchronous>, transform_indices = @transform_11, window_bounds = array<i64: 1024, 256>}, {pipeline_mode = #tpu.pipeline_mode<synchronous>, transform_indices = @transform_12, window_bounds = array<i64: 256, 64>}, {pipeline_mode = #tpu.pipeline_mode<synchronous>, transform_indices = @transform_13, window_bounds = array<i64: 64, 256>}, {pipeline_mode = #tpu.pipeline_mode<synchronous>, transform_indices = @transform_14, window_bounds = array<i64: 256, 1024>}, {transform_indices = @transform_15, window_bounds = array<i64: 1, 3, 1024>}]} {
    %c0 = arith.constant 0 : index
    %c0_0 = arith.constant 0 : index
    %c0_1 = arith.constant 0 : index
    %0 = vector.load %arg1[%c0, %c0_0, %c0_1] : memref<1x8x1024xf32, #tpu.memory_space<vmem>>, vector<1x8x1024xf32>
    %1 = vector.shape_cast %0 : vector<1x8x1024xf32> to vector<8x1024xf32>
    %c0_2 = arith.constant 0 : index
    %c0_3 = arith.constant 0 : index
    %2 = vector.load %arg10[%c0_2, %c0_3] : memref<9x1024xf32, #tpu.memory_space<vmem>>, vector<9x1024xf32>
    %c17_i32 = arith.constant 17 : i32
    %3 = tpu.dynamic_rotate %1 by %c17_i32 dim 1 : vector<8x1024xf32>, i32 -> vector<8x1024xf32>
    %4 = vector.extract_strided_slice %2 {offsets = [0, 0], sizes = [1, 1024], strides = [1, 1]} : vector<9x1024xf32> to vector<1x1024xf32>
    %5 = vector.broadcast %4 : vector<1x1024xf32> to vector<8x1024xf32>
    %6 = arith.mulf %3, %5 : vector<8x1024xf32>
    %c16_i32 = arith.constant 16 : i32
    %7 = tpu.dynamic_rotate %1 by %c16_i32 dim 1 : vector<8x1024xf32>, i32 -> vector<8x1024xf32>
    %8 = vector.extract_strided_slice %2 {offsets = [1, 0], sizes = [1, 1024], strides = [1, 1]} : vector<9x1024xf32> to vector<1x1024xf32>
    %9 = vector.broadcast %8 : vector<1x1024xf32> to vector<8x1024xf32>
    %10 = arith.mulf %7, %9 : vector<8x1024xf32>
    %c15_i32 = arith.constant 15 : i32
    %11 = tpu.dynamic_rotate %1 by %c15_i32 dim 1 : vector<8x1024xf32>, i32 -> vector<8x1024xf32>
    %12 = vector.extract_strided_slice %2 {offsets = [2, 0], sizes = [1, 1024], strides = [1, 1]} : vector<9x1024xf32> to vector<1x1024xf32>
    %13 = vector.broadcast %12 : vector<1x1024xf32> to vector<8x1024xf32>
    %14 = arith.mulf %11, %13 : vector<8x1024xf32>
    %c1_i32 = arith.constant 1 : i32
    %15 = tpu.dynamic_rotate %1 by %c1_i32 dim 1 : vector<8x1024xf32>, i32 -> vector<8x1024xf32>
    %16 = vector.extract_strided_slice %2 {offsets = [3, 0], sizes = [1, 1024], strides = [1, 1]} : vector<9x1024xf32> to vector<1x1024xf32>
    %17 = vector.broadcast %16 : vector<1x1024xf32> to vector<8x1024xf32>
    %18 = arith.mulf %15, %17 : vector<8x1024xf32>
    %c1023_i32 = arith.constant 1023 : i32
    %19 = tpu.dynamic_rotate %1 by %c1023_i32 dim 1 : vector<8x1024xf32>, i32 -> vector<8x1024xf32>
    %20 = vector.extract_strided_slice %2 {offsets = [5, 0], sizes = [1, 1024], strides = [1, 1]} : vector<9x1024xf32> to vector<1x1024xf32>
    %21 = vector.broadcast %20 : vector<1x1024xf32> to vector<8x1024xf32>
    %22 = arith.mulf %19, %21 : vector<8x1024xf32>
    %c1009_i32 = arith.constant 1009 : i32
    %23 = tpu.dynamic_rotate %1 by %c1009_i32 dim 1 : vector<8x1024xf32>, i32 -> vector<8x1024xf32>
    %24 = vector.extract_strided_slice %2 {offsets = [6, 0], sizes = [1, 1024], strides = [1, 1]} : vector<9x1024xf32> to vector<1x1024xf32>
    %25 = vector.broadcast %24 : vector<1x1024xf32> to vector<8x1024xf32>
    %26 = arith.mulf %23, %25 : vector<8x1024xf32>
    %c1008_i32 = arith.constant 1008 : i32
    %27 = tpu.dynamic_rotate %1 by %c1008_i32 dim 1 : vector<8x1024xf32>, i32 -> vector<8x1024xf32>
    %28 = vector.extract_strided_slice %2 {offsets = [7, 0], sizes = [1, 1024], strides = [1, 1]} : vector<9x1024xf32> to vector<1x1024xf32>
    %29 = vector.broadcast %28 : vector<1x1024xf32> to vector<8x1024xf32>
    %30 = arith.mulf %27, %29 : vector<8x1024xf32>
    %c1007_i32 = arith.constant 1007 : i32
    %31 = tpu.dynamic_rotate %1 by %c1007_i32 dim 1 : vector<8x1024xf32>, i32 -> vector<8x1024xf32>
    %32 = vector.extract_strided_slice %2 {offsets = [8, 0], sizes = [1, 1024], strides = [1, 1]} : vector<9x1024xf32> to vector<1x1024xf32>
    %33 = vector.broadcast %32 : vector<1x1024xf32> to vector<8x1024xf32>
    %34 = arith.mulf %31, %33 : vector<8x1024xf32>
    %35 = tpu.concatenate %6, %10, %14, %18, %1, %22, %26, %30, %34 in 0 : vector<8x1024xf32>, vector<8x1024xf32>, vector<8x1024xf32>, vector<8x1024xf32>, vector<8x1024xf32>, vector<8x1024xf32>, vector<8x1024xf32>, vector<8x1024xf32>, vector<8x1024xf32> -> vector<72x1024xf32>
    %36 = arith.truncf %35 : vector<72x1024xf32> to vector<72x1024xbf16>
    %c0_4 = arith.constant 0 : index
    %c0_5 = arith.constant 0 : index
    %37 = vector.load %arg2[%c0_4, %c0_5] : memref<16x72xbf16, #tpu.memory_space<vmem>>, vector<16x72xbf16>
    %cst = arith.constant dense<0.000000e+00> : vector<16x1024xf32>
    %38 = tpu.matmul %37, %36, %cst {dimension_numbers = #tpu.dot_dimension_numbers<[1], [0], [0], [1], [0, 0, 1, 1], [], []>} : vector<16x72xbf16>, vector<72x1024xbf16>, vector<16x1024xf32> -> vector<16x1024xf32>
    %c0_6 = arith.constant 0 : index
    %c0_7 = arith.constant 0 : index
    %39 = vector.load %arg3[%c0_6, %c0_7] : memref<16x1xf32, #tpu.memory_space<vmem>>, vector<16x1xf32>
    %40 = vector.broadcast %39 : vector<16x1xf32> to vector<16x1024xf32>
    %41 = arith.addf %38, %40 : vector<16x1024xf32>
    %cst_8 = arith.constant 0.000000e+00 : f32
    %42 = vector.broadcast %cst_8 : f32 to vector<16x1024xf32>
    %43 = arith.maximumf %41, %42 : vector<16x1024xf32>
    %c1023_i32_9 = arith.constant 1023 : i32
    %44 = tpu.dynamic_rotate %43 by %c1023_i32_9 dim 1 : vector<16x1024xf32>, i32 -> vector<16x1024xf32>
    %45 = arith.maximumf %43, %44 : vector<16x1024xf32>
    %c1008_i32_10 = arith.constant 1008 : i32
    %46 = tpu.dynamic_rotate %45 by %c1008_i32_10 dim 1 : vector<16x1024xf32>, i32 -> vector<16x1024xf32>
    %47 = arith.maximumf %45, %46 : vector<16x1024xf32>
    %48 = arith.truncf %47 : vector<16x1024xf32> to vector<16x1024xbf16>
    %c0_11 = arith.constant 0 : index
    %c0_12 = arith.constant 0 : index
    %49 = vector.load %arg12[%c0_11, %c0_12] : memref<1024x256xbf16, #tpu.memory_space<vmem>>, vector<1024x256xbf16>
    %cst_13 = arith.constant dense<0.000000e+00> : vector<16x256xf32>
    %50 = tpu.matmul %48, %49, %cst_13 {dimension_numbers = #tpu.dot_dimension_numbers<[1], [0], [0], [1], [0, 0, 1, 1], [], []>} : vector<16x1024xbf16>, vector<1024x256xbf16>, vector<16x256xf32> -> vector<16x256xf32>
    %c0_14 = arith.constant 0 : index
    %c0_15 = arith.constant 0 : index
    %51 = vector.load %arg11[%c0_14, %c0_15] : memref<9x256xf32, #tpu.memory_space<vmem>>, vector<9x256xf32>
    %c9_i32 = arith.constant 9 : i32
    %52 = tpu.dynamic_rotate %50 by %c9_i32 dim 1 : vector<16x256xf32>, i32 -> vector<16x256xf32>
    %53 = vector.extract_strided_slice %51 {offsets = [0, 0], sizes = [1, 256], strides = [1, 1]} : vector<9x256xf32> to vector<1x256xf32>
    %54 = vector.broadcast %53 : vector<1x256xf32> to vector<16x256xf32>
    %55 = arith.mulf %52, %54 : vector<16x256xf32>
    %c8_i32 = arith.constant 8 : i32
    %56 = tpu.dynamic_rotate %50 by %c8_i32 dim 1 : vector<16x256xf32>, i32 -> vector<16x256xf32>
    %57 = vector.extract_strided_slice %51 {offsets = [1, 0], sizes = [1, 256], strides = [1, 1]} : vector<9x256xf32> to vector<1x256xf32>
    %58 = vector.broadcast %57 : vector<1x256xf32> to vector<16x256xf32>
    %59 = arith.mulf %56, %58 : vector<16x256xf32>
    %c7_i32 = arith.constant 7 : i32
    %60 = tpu.dynamic_rotate %50 by %c7_i32 dim 1 : vector<16x256xf32>, i32 -> vector<16x256xf32>
    %61 = vector.extract_strided_slice %51 {offsets = [2, 0], sizes = [1, 256], strides = [1, 1]} : vector<9x256xf32> to vector<1x256xf32>
    %62 = vector.broadcast %61 : vector<1x256xf32> to vector<16x256xf32>
    %63 = arith.mulf %60, %62 : vector<16x256xf32>
    %c1_i32_16 = arith.constant 1 : i32
    %64 = tpu.dynamic_rotate %50 by %c1_i32_16 dim 1 : vector<16x256xf32>, i32 -> vector<16x256xf32>
    %65 = vector.extract_strided_slice %51 {offsets = [3, 0], sizes = [1, 256], strides = [1, 1]} : vector<9x256xf32> to vector<1x256xf32>
    %66 = vector.broadcast %65 : vector<1x256xf32> to vector<16x256xf32>
    %67 = arith.mulf %64, %66 : vector<16x256xf32>
    %c255_i32 = arith.constant 255 : i32
    %68 = tpu.dynamic_rotate %50 by %c255_i32 dim 1 : vector<16x256xf32>, i32 -> vector<16x256xf32>
    %69 = vector.extract_strided_slice %51 {offsets = [5, 0], sizes = [1, 256], strides = [1, 1]} : vector<9x256xf32> to vector<1x256xf32>
    %70 = vector.broadcast %69 : vector<1x256xf32> to vector<16x256xf32>
    %71 = arith.mulf %68, %70 : vector<16x256xf32>
    %c249_i32 = arith.constant 249 : i32
    %72 = tpu.dynamic_rotate %50 by %c249_i32 dim 1 : vector<16x256xf32>, i32 -> vector<16x256xf32>
    %73 = vector.extract_strided_slice %51 {offsets = [6, 0], sizes = [1, 256], strides = [1, 1]} : vector<9x256xf32> to vector<1x256xf32>
    %74 = vector.broadcast %73 : vector<1x256xf32> to vector<16x256xf32>
    %75 = arith.mulf %72, %74 : vector<16x256xf32>
    %c248_i32 = arith.constant 248 : i32
    %76 = tpu.dynamic_rotate %50 by %c248_i32 dim 1 : vector<16x256xf32>, i32 -> vector<16x256xf32>
    %77 = vector.extract_strided_slice %51 {offsets = [7, 0], sizes = [1, 256], strides = [1, 1]} : vector<9x256xf32> to vector<1x256xf32>
    %78 = vector.broadcast %77 : vector<1x256xf32> to vector<16x256xf32>
    %79 = arith.mulf %76, %78 : vector<16x256xf32>
    %c247_i32 = arith.constant 247 : i32
    %80 = tpu.dynamic_rotate %50 by %c247_i32 dim 1 : vector<16x256xf32>, i32 -> vector<16x256xf32>
    %81 = vector.extract_strided_slice %51 {offsets = [8, 0], sizes = [1, 256], strides = [1, 1]} : vector<9x256xf32> to vector<1x256xf32>
    %82 = vector.broadcast %81 : vector<1x256xf32> to vector<16x256xf32>
    %83 = arith.mulf %80, %82 : vector<16x256xf32>
    %84 = tpu.concatenate %55, %59, %63, %67, %50, %71, %75, %79, %83 in 0 : vector<16x256xf32>, vector<16x256xf32>, vector<16x256xf32>, vector<16x256xf32>, vector<16x256xf32>, vector<16x256xf32>, vector<16x256xf32>, vector<16x256xf32>, vector<16x256xf32> -> vector<144x256xf32>
    %85 = arith.truncf %84 : vector<144x256xf32> to vector<144x256xbf16>
    %c0_17 = arith.constant 0 : index
    %c0_18 = arith.constant 0 : index
    %86 = vector.load %arg4[%c0_17, %c0_18] : memref<8x144xbf16, #tpu.memory_space<vmem>>, vector<8x144xbf16>
    %cst_19 = arith.constant dense<0.000000e+00> : vector<8x256xf32>
    %87 = tpu.matmul %86, %85, %cst_19 {dimension_numbers = #tpu.dot_dimension_numbers<[1], [0], [0], [1], [0, 0, 1, 1], [], []>} : vector<8x144xbf16>, vector<144x256xbf16>, vector<8x256xf32> -> vector<8x256xf32>
    %c0_20 = arith.constant 0 : index
    %c0_21 = arith.constant 0 : index
    %88 = vector.load %arg5[%c0_20, %c0_21] : memref<8x1xf32, #tpu.memory_space<vmem>>, vector<8x1xf32>
    %89 = vector.broadcast %88 : vector<8x1xf32> to vector<8x256xf32>
    %90 = arith.addf %87, %89 : vector<8x256xf32>
    %cst_22 = arith.constant 0.000000e+00 : f32
    %91 = vector.broadcast %cst_22 : f32 to vector<8x256xf32>
    %92 = arith.maximumf %90, %91 : vector<8x256xf32>
    %c255_i32_23 = arith.constant 255 : i32
    %93 = tpu.dynamic_rotate %92 by %c255_i32_23 dim 1 : vector<8x256xf32>, i32 -> vector<8x256xf32>
    %94 = arith.maximumf %92, %93 : vector<8x256xf32>
    %c248_i32_24 = arith.constant 248 : i32
    %95 = tpu.dynamic_rotate %94 by %c248_i32_24 dim 1 : vector<8x256xf32>, i32 -> vector<8x256xf32>
    %96 = arith.maximumf %94, %95 : vector<8x256xf32>
    %97 = arith.truncf %96 : vector<8x256xf32> to vector<8x256xbf16>
    %c0_25 = arith.constant 0 : index
    %c0_26 = arith.constant 0 : index
    %98 = vector.load %arg13[%c0_25, %c0_26] : memref<256x64xbf16, #tpu.memory_space<vmem>>, vector<256x64xbf16>
    %cst_27 = arith.constant dense<0.000000e+00> : vector<8x64xf32>
    %99 = tpu.matmul %97, %98, %cst_27 {dimension_numbers = #tpu.dot_dimension_numbers<[1], [0], [0], [1], [0, 0, 1, 1], [], []>} : vector<8x256xbf16>, vector<256x64xbf16>, vector<8x64xf32> -> vector<8x64xf32>
    %100 = arith.truncf %99 : vector<8x64xf32> to vector<8x64xbf16>
    %c0_28 = arith.constant 0 : index
    %c0_29 = arith.constant 0 : index
    %101 = vector.load %arg14[%c0_28, %c0_29] : memref<64x256xbf16, #tpu.memory_space<vmem>>, vector<64x256xbf16>
    %cst_30 = arith.constant dense<0.000000e+00> : vector<8x256xf32>
    %102 = tpu.matmul %100, %101, %cst_30 {dimension_numbers = #tpu.dot_dimension_numbers<[1], [0], [0], [1], [0, 0, 1, 1], [], []>} : vector<8x64xbf16>, vector<64x256xbf16>, vector<8x256xf32> -> vector<8x256xf32>
    %c1_i32_31 = arith.constant 1 : i32
    %103 = tpu.dynamic_rotate %102 by %c1_i32_31 dim 1 : vector<8x256xf32>, i32 -> vector<8x256xf32>
    %c8_i32_32 = arith.constant 8 : i32
    %104 = tpu.dynamic_rotate %102 by %c8_i32_32 dim 1 : vector<8x256xf32>, i32 -> vector<8x256xf32>
    %c9_i32_33 = arith.constant 9 : i32
    %105 = tpu.dynamic_rotate %102 by %c9_i32_33 dim 1 : vector<8x256xf32>, i32 -> vector<8x256xf32>
    %106 = tpu.concatenate %102, %103, %104, %105 in 0 : vector<8x256xf32>, vector<8x256xf32>, vector<8x256xf32>, vector<8x256xf32> -> vector<32x256xf32>
    %107 = arith.truncf %106 : vector<32x256xf32> to vector<32x256xbf16>
    %c0_34 = arith.constant 0 : index
    %c0_35 = arith.constant 0 : index
    %108 = vector.load %arg6[%c0_34, %c0_35] : memref<16x32xbf16, #tpu.memory_space<vmem>>, vector<16x32xbf16>
    %cst_36 = arith.constant dense<0.000000e+00> : vector<16x256xf32>
    %109 = tpu.matmul %108, %107, %cst_36 {dimension_numbers = #tpu.dot_dimension_numbers<[1], [0], [0], [1], [0, 0, 1, 1], [], []>} : vector<16x32xbf16>, vector<32x256xbf16>, vector<16x256xf32> -> vector<16x256xf32>
    %c0_37 = arith.constant 0 : index
    %c0_38 = arith.constant 0 : index
    %110 = vector.load %arg7[%c0_37, %c0_38] : memref<16x1xf32, #tpu.memory_space<vmem>>, vector<16x1xf32>
    %111 = vector.broadcast %110 : vector<16x1xf32> to vector<16x256xf32>
    %112 = arith.addf %109, %111 : vector<16x256xf32>
    %cst_39 = arith.constant 0.000000e+00 : f32
    %113 = vector.broadcast %cst_39 : f32 to vector<16x256xf32>
    %114 = arith.maximumf %112, %113 : vector<16x256xf32>
    %115 = arith.truncf %114 : vector<16x256xf32> to vector<16x256xbf16>
    %c0_40 = arith.constant 0 : index
    %c0_41 = arith.constant 0 : index
    %116 = vector.load %arg15[%c0_40, %c0_41] : memref<256x1024xbf16, #tpu.memory_space<vmem>>, vector<256x1024xbf16>
    %cst_42 = arith.constant dense<0.000000e+00> : vector<16x1024xf32>
    %117 = tpu.matmul %115, %116, %cst_42 {dimension_numbers = #tpu.dot_dimension_numbers<[1], [0], [0], [1], [0, 0, 1, 1], [], []>} : vector<16x256xbf16>, vector<256x1024xbf16>, vector<16x1024xf32> -> vector<16x1024xf32>
    %c1_i32_43 = arith.constant 1 : i32
    %118 = tpu.dynamic_rotate %117 by %c1_i32_43 dim 1 : vector<16x1024xf32>, i32 -> vector<16x1024xf32>
    %c16_i32_44 = arith.constant 16 : i32
    %119 = tpu.dynamic_rotate %117 by %c16_i32_44 dim 1 : vector<16x1024xf32>, i32 -> vector<16x1024xf32>
    %c17_i32_45 = arith.constant 17 : i32
    %120 = tpu.dynamic_rotate %117 by %c17_i32_45 dim 1 : vector<16x1024xf32>, i32 -> vector<16x1024xf32>
    %121 = tpu.concatenate %117, %118, %119, %120 in 0 : vector<16x1024xf32>, vector<16x1024xf32>, vector<16x1024xf32>, vector<16x1024xf32> -> vector<64x1024xf32>
    %122 = arith.truncf %121 : vector<64x1024xf32> to vector<64x1024xbf16>
    %c0_46 = arith.constant 0 : index
    %c0_47 = arith.constant 0 : index
    %123 = vector.load %arg8[%c0_46, %c0_47] : memref<3x64xbf16, #tpu.memory_space<vmem>>, vector<3x64xbf16>
    %cst_48 = arith.constant dense<0.000000e+00> : vector<3x1024xf32>
    %124 = tpu.matmul %123, %122, %cst_48 {dimension_numbers = #tpu.dot_dimension_numbers<[1], [0], [0], [1], [0, 0, 1, 1], [], []>} : vector<3x64xbf16>, vector<64x1024xbf16>, vector<3x1024xf32> -> vector<3x1024xf32>
    %c0_49 = arith.constant 0 : index
    %c0_50 = arith.constant 0 : index
    %125 = vector.load %arg9[%c0_49, %c0_50] : memref<3x1xf32, #tpu.memory_space<vmem>>, vector<3x1xf32>
    %126 = vector.broadcast %125 : vector<3x1xf32> to vector<3x1024xf32>
    %127 = arith.addf %124, %126 : vector<3x1024xf32>
    %cst_51 = arith.constant 0.000000e+00 : f32
    %128 = vector.broadcast %cst_51 : f32 to vector<3x1024xf32>
    %129 = arith.subf %128, %127 : vector<3x1024xf32>
    %130 = math.exp %129 : vector<3x1024xf32>
    %cst_52 = arith.constant 1.000000e+00 : f32
    %131 = vector.broadcast %cst_52 : f32 to vector<3x1024xf32>
    %132 = arith.addf %131, %130 : vector<3x1024xf32>
    %133 = tpu.reciprocal %132 {approx = true} : vector<3x1024xf32> -> vector<3x1024xf32>
    %cst_53 = arith.constant 0.000000e+00 : f32
    %cst_54 = arith.constant 1.000000e+00 : f32
    %134 = vector.broadcast %cst_53 : f32 to vector<3x1024xf32>
    %135 = arith.maximumf %134, %133 : vector<3x1024xf32>
    %136 = vector.broadcast %cst_54 : f32 to vector<3x1024xf32>
    %137 = arith.minimumf %136, %135 : vector<3x1024xf32>
    %c0_55 = arith.constant 0 : index
    %c0_56 = arith.constant 0 : index
    %c0_57 = arith.constant 0 : index
    %138 = vector.load %arg16[%c0_55, %c0_56, %c0_57] : memref<1x3x1024xf32, #tpu.memory_space<vmem>>, vector<1x3x1024xf32>
    %139 = vector.shape_cast %138 : vector<1x3x1024xf32> to vector<3x1024xf32>
    %140 = vector.shape_cast %137 : vector<3x1024xf32> to vector<1x3x1024xf32>
    tpu.vector_store %arg16[%c0_55, %c0_56, %c0_57], %140 {strides = array<i32>} : memref<1x3x1024xf32, #tpu.memory_space<vmem>>, vector<1x3x1024xf32>,
    return
  }
  func.func @transform_0(%arg0: i32) -> (i32, i32, i32) {
    %c0_i32 = arith.constant 0 : i32
    %c0_i32_0 = arith.constant 0 : i32
    %c0_i32_1 = arith.constant 0 : i32
    return %arg0, %c0_i32, %c0_i32_0 : i32, i32, i32
  }
  func.func @transform_1(%arg0: i32) -> (i32, i32) {
    %c0_i32 = arith.constant 0 : i32
    %c0_i32_0 = arith.constant 0 : i32
    %c0_i32_1 = arith.constant 0 : i32
    return %c0_i32, %c0_i32_0 : i32, i32
  }
  func.func @transform_2(%arg0: i32) -> (i32, i32) {
    %c0_i32 = arith.constant 0 : i32
    %c0_i32_0 = arith.constant 0 : i32
    %c0_i32_1 = arith.constant 0 : i32
    return %c0_i32, %c0_i32_0 : i32, i32
  }
  func.func @transform_3(%arg0: i32) -> (i32, i32) {
    %c0_i32 = arith.constant 0 : i32
    %c0_i32_0 = arith.constant 0 : i32
    %c0_i32_1 = arith.constant 0 : i32
    return %c0_i32, %c0_i32_0 : i32, i32
  }
  func.func @transform_4(%arg0: i32) -> (i32, i32) {
    %c0_i32 = arith.constant 0 : i32
    %c0_i32_0 = arith.constant 0 : i32
    %c0_i32_1 = arith.constant 0 : i32
    return %c0_i32, %c0_i32_0 : i32, i32
  }
  func.func @transform_5(%arg0: i32) -> (i32, i32) {
    %c0_i32 = arith.constant 0 : i32
    %c0_i32_0 = arith.constant 0 : i32
    %c0_i32_1 = arith.constant 0 : i32
    return %c0_i32, %c0_i32_0 : i32, i32
  }
  func.func @transform_6(%arg0: i32) -> (i32, i32) {
    %c0_i32 = arith.constant 0 : i32
    %c0_i32_0 = arith.constant 0 : i32
    %c0_i32_1 = arith.constant 0 : i32
    return %c0_i32, %c0_i32_0 : i32, i32
  }
  func.func @transform_7(%arg0: i32) -> (i32, i32) {
    %c0_i32 = arith.constant 0 : i32
    %c0_i32_0 = arith.constant 0 : i32
    %c0_i32_1 = arith.constant 0 : i32
    return %c0_i32, %c0_i32_0 : i32, i32
  }
  func.func @transform_8(%arg0: i32) -> (i32, i32) {
    %c0_i32 = arith.constant 0 : i32
    %c0_i32_0 = arith.constant 0 : i32
    %c0_i32_1 = arith.constant 0 : i32
    return %c0_i32, %c0_i32_0 : i32, i32
  }
  func.func @transform_9(%arg0: i32) -> (i32, i32) {
    %c0_i32 = arith.constant 0 : i32
    %c0_i32_0 = arith.constant 0 : i32
    %c0_i32_1 = arith.constant 0 : i32
    return %c0_i32, %c0_i32_0 : i32, i32
  }
  func.func @transform_10(%arg0: i32) -> (i32, i32) {
    %c0_i32 = arith.constant 0 : i32
    %c0_i32_0 = arith.constant 0 : i32
    %c0_i32_1 = arith.constant 0 : i32
    return %c0_i32, %c0_i32_0 : i32, i32
  }
  func.func @transform_11(%arg0: i32) -> (i32, i32) {
    %c0_i32 = arith.constant 0 : i32
    %c0_i32_0 = arith.constant 0 : i32
    %c0_i32_1 = arith.constant 0 : i32
    return %c0_i32, %c0_i32_0 : i32, i32
  }
  func.func @transform_12(%arg0: i32) -> (i32, i32) {
    %c0_i32 = arith.constant 0 : i32
    %c0_i32_0 = arith.constant 0 : i32
    %c0_i32_1 = arith.constant 0 : i32
    return %c0_i32, %c0_i32_0 : i32, i32
  }
  func.func @transform_13(%arg0: i32) -> (i32, i32) {
    %c0_i32 = arith.constant 0 : i32
    %c0_i32_0 = arith.constant 0 : i32
    %c0_i32_1 = arith.constant 0 : i32
    return %c0_i32, %c0_i32_0 : i32, i32
  }
  func.func @transform_14(%arg0: i32) -> (i32, i32) {
    %c0_i32 = arith.constant 0 : i32
    %c0_i32_0 = arith.constant 0 : i32
    %c0_i32_1 = arith.constant 0 : i32
    return %c0_i32, %c0_i32_0 : i32, i32
  }
  func.func @transform_15(%arg0: i32) -> (i32, i32, i32) {
    %c0_i32 = arith.constant 0 : i32
    %c0_i32_0 = arith.constant 0 : i32
    %c0_i32_1 = arith.constant 0 : i32
    return %arg0, %c0_i32, %c0_i32_0 : i32, i32, i32
  }
}

</mosaic_0001>

<bundles_post_ra>
// kernel: forward.1
= control target key start
LH: loop header
LB: loop body
LE: loop exit
PB: predicated region body
PF: predicated region fallthrough
CT: control target
= control target key end

     0   :  { %s5435_s18 = smov 0   ;;  %s7825_s0 = inlined_call_operand.vmem [shape: f32[2,8,1024], index: 0, kind: input, shape index: {}]   ;;  %s7826_s1 = inlined_call_operand.vmem [shape: bf16[16,72], index: 1, kind: input, shape index: {}]   ;;  %s7827_s2 = inlined_call_operand.vmem [shape: f32[16,1], index: 2, kind: input, shape index: {}]   ;;  %s7828_s3 = inlined_call_operand.vmem [shape: bf16[8,144], index: 3, kind: input, shape index: {}]   ;;  %s7829_s4 = inlined_call_operand.vmem [shape: f32[8,1], index: 4, kind: input, shape index: {}]   ;;  %s7830_s5 = inlined_call_operand.vmem [shape: bf16[16,32], index: 5, kind: input, shape index: {}]   ;;  %s7831_s6 = inlined_call_operand.vmem [shape: f32[16,1], index: 6, kind: input, shape index: {}]   ;;  %s7832_s7 = inlined_call_operand.vmem [shape: bf16[3,64], index: 7, kind: input, shape index: {}]   ;;  %s7833_s8 = inlined_call_operand.vmem [shape: f32[3,1], index: 8, kind: input, shape index: {}]   ;;  %s7834_s9 = inlined_call_operand.vmem [shape: f32[9,1024], index: 9, kind: input, shape index: {}]   ;;  %s7835_s10 = inlined_call_operand.vmem [shape: f32[9,256], index: 10, kind: input, shape index: {}]   ;;  %s7836_s11 = inlined_call_operand.vmem [shape: bf16[1024,256], index: 11, kind: input, shape index: {}]   ;;  %s7837_s12 = inlined_call_operand.vmem [shape: bf16[256,64], index: 12, kind: input, shape index: {}]   ;;  %s7838_s13 = inlined_call_operand.vmem [shape: bf16[64,256], index: 13, kind: input, shape index: {}]   ;;  %s7839_s14 = inlined_call_operand.vmem [shape: bf16[256,1024], index: 14, kind: input, shape index: {}]   ;;  %s7840_s15 = inlined_call_operand.vmem [shape: f32[2,3,1024], index: 15, kind: output, shape index: {}]  }
   0x1 LB: > { %s4469_s19 = sadd.s32 4294967295, %s5338_s18   ;;  %p4473_p0 = scmp.ge.s32.totalorder %s5338_s18, 1  ;;  %s5338_s18 = sphi %s5435_s18, %s25_s18  }
   0x2   : > { %p437_p1 = scmp.lt.s32.totalorder %s5338_s18, 3 }
   0x4   : > { %p438_p2 = pnand %p4473_p0, %p437_p1 }
   0x5   : > { %p485_p3 = scmp.lt.s32.totalorder (!%p438_p2), %s4469_s19, 1  ;;  %s7841_s24 = smov (!%p438_p2), 17   ;;  %v5347_v6 = vmov (!%p438_p2), 0   ;;  %v536_v9 = vlaneseq (!%p438_p2)  ;;  %v5612_v16 = vld [vmem:[%s7834_s9 + $0x8] sm:$0xff] (!%p438_p2)  ;;  %v5620_v19 = vld [vmem:[%s7834_s9 + $0x18] sm:$0xff] (!%p438_p2)  ;;  %v5634_v22 = vld [vmem:[%s7834_s9 + $0x10] sm:$0xff] (!%p438_p2) }
   0x6   : > { %441 = sbr.rel (%p438_p2) target bundleno = 3380 (0xd34), region = 80  ;;  %s7843_s25 = smov (!%p438_p2), 16   ;;  %1162 = vmatprep.mubr.bf16.mxu0 (!%p438_p2), %v5347_v6  ;;  %1205 = vmatprep.mubr.bf16.mxu1 (!%p438_p2), %v5347_v6  ;;  %v5651_v31 = vld [vmem:[%s7834_s9] sm:$0xff] (!%p438_p2)  ;;  %v1085_v36 = vld [vmem:[%s7827_s2 + $0x8] sm:$0xff] (!%p438_p2)  ;;  %vm1105_vm8 = vcmask (!%p438_p2), 1043456   ;;  %vm1101_vm9 = vcmask (!%p438_p2), 588800  }
   0x7   : > { %s5342_s26 = smov (!%p438_p2), 15   ;;  %s5343_s27 = smov (!%p438_p2), 1   ;;  %4849 = vset.pattern.permute.xlu1 (!%p438_p2), %v5347_v6  ;;  %4848 = vset.pattern.permute.xlu0 (!%p438_p2), %v5347_v6  ;;  %v5595_v10 = vshrl.u32 (!%p438_p2), %v536_v9, 7  ;;  %v5597_v13 = vand.u32 (!%p438_p2), 127, %v536_v9  ;;  %v1084_v41 = vld [vmem:[%s7827_s2] sm:$0xff] (!%p438_p2)  ;;  %vm2627_vm10 = vcmask (!%p438_p2), 130048  }
   0x8   : > { %s5344_s28 = smov (!%p438_p2), 127   ;;  %s5345_s29 = smov (!%p438_p2), 113  }
   0x9   : > { %s5346_s30 = smov (!%p438_p2), 112   ;;  %s5348_s16 = smov (!%p438_p2), 111   ;;  %v5604_v14 = vsub.s32 (!%p438_p2), 0, %v5595_v10  ;;  %v5607_v15 = vsub.s32 (!%p438_p2), 1, %v5595_v10  ;;  %vm538_vm0 = vcmp.lt.s32.totalorder (!%p438_p2), %v5597_v13, 17  ;;  %vm603_vm1 = vcmp.lt.s32.totalorder (!%p438_p2), %v5597_v13, 16 }
   0xa   : > { %v5690_v60 = vsub.s32 (!%p438_p2), 2, %v5595_v10  ;;  %v5693_v61 = vsub.s32 (!%p438_p2), 3, %v5595_v10  ;;  %vm668_vm2 = vcmp.lt.s32.totalorder (!%p438_p2), %v5597_v13, 15  ;;  %vm733_vm3 = vcmp.lt.s32.totalorder (!%p438_p2), %v5597_v13, 1  ;;  %s5350_s17 = smov (!%p438_p2), 8   ;;  %s5354_s21 = smov (!%p438_p2), 119  }
   0xb   : > { %v554_v20 = vrot.slane (!%p438_p2), %v5612_v16, %v5604_v14  ;;  %v619_v21 = vrot.slane (!%p438_p2), %v5612_v16, %v5607_v15  ;;  %v562_v26 = vrot.slane (!%p438_p2), %v5620_v19, %v5604_v14  ;;  %v627_v28 = vrot.slane (!%p438_p2), %v5620_v19, %v5607_v15 }
   0xc   : > { %v558_v29 = vrot.slane (!%p438_p2), %v5634_v22, %v5604_v14  ;;  %v623_v30 = vrot.slane (!%p438_p2), %v5634_v22, %v5607_v15  ;;  %v550_v40 = vrot.slane (!%p438_p2), %v5651_v31, %v5604_v14  ;;  %v615_v45 = vrot.slane (!%p438_p2), %v5651_v31, %v5607_v15 }
   0xd   : > { %s7850_s19 = smov (!%p485_p3, %s4469_s19), 1  ;;  %v749_v9 = vrot.slane %v5612_v16, %v5693_v61  ;;  %vm798_vm4 = vcmp.lt.s32.totalorder %v5597_v13, 127  ;;  %vm863_vm5 = vcmp.lt.s32.totalorder %v5597_v13, 113  ;;  %vm928_vm6 = vcmp.lt.s32.totalorder %v5597_v13, 112 }
   0xe   : > { %s4789_s20 = sshll.u32 %s7850_s19, 6  ;;  %vm993_vm7 = vcmp.lt.s32.totalorder %v5597_v13, 111  ;;  %vm2406_vm11 = vcmp.lt.s32.totalorder %v5597_v13, 9  ;;  %vm2431_vm12 = vcmp.lt.s32.totalorder %v5597_v13, 8  ;;  %vm2456_vm13 = vcmp.lt.s32.totalorder %v5597_v13, 7 }
   0xf   : > { %s5449_s23 = scalar_lea.vmem %s7825_s0, %s4789_s20  ;;  %s5352_s20 = smov 121   ;;  %vm2529_vm14 = vcmp.lt.s32.totalorder %v5597_v13, 121  ;;  %vm2554_vm15 = vcmp.lt.s32.totalorder %v5597_v13, 120 }
  0x10   : > { %v5452_v0 = vld [vmem:[%s5449_s23 + $0x10] sm:$0xff]  ;;  %v5455_v1 = vld [vmem:[%s5449_s23] sm:$0xff]  ;;  %v5462_v2 = vld [vmem:[%s5449_s23 + $0x18] sm:$0xff] }
  0x11   : > { %524 = vrot.lane.b32.xlu1 %v5452_v0, %s7841_s24  ;;  %520 = vrot.lane.b32.xlu0 %v5455_v1, %s7841_s24  ;;  %v5465_v3 = vld [vmem:[%s5449_s23 + $0x8] sm:$0xff]  ;;  %v5476_v4 = vld [vmem:[%s5449_s23 + $0x38] sm:$0xff] }
  0x12   : > { %v5507_v5 = vld [vmem:[%s5449_s23 + $0x20] sm:$0xff]  ;;  %v5554_v7 = vld [vmem:[%s5449_s23 + $0x28] sm:$0xff]  ;;  %v5573_v8 = vld [vmem:[%s5449_s23 + $0x30] sm:$0xff] }
  0x15   : > { %526 = vrot.lane.b32.xlu1 %v5462_v2, %s7841_s24  ;;  %522 = vrot.lane.b32.xlu0 %v5465_v3, %s7841_s24 }
  0x19   : > { %589 = vrot.lane.b32.xlu1 %v5465_v3, %s7843_s25  ;;  %587 = vrot.lane.b32.xlu0 %v5455_v1, %s7843_s25 }
  0x1d   : > { %593 = vrot.lane.b32.xlu1 %v5462_v2, %s7843_s25  ;;  %591 = vrot.lane.b32.xlu0 %v5452_v0, %s7843_s25 }
  0x21   : > { %601 = vrot.lane.b32.xlu1 %v5476_v4, %s7843_s25  ;;  %534 = vrot.lane.b32.xlu0 %v5476_v4, %s7841_s24 }
  0x25   : > { %654 = vrot.lane.b32.xlu1 %v5465_v3, %s5342_s26  ;;  %652 = vrot.lane.b32.xlu0 %v5455_v1, %s5342_s26 }
  0x29   : > { %658 = vrot.lane.b32.xlu1 %v5462_v2, %s5342_s26  ;;  %656 = vrot.lane.b32.xlu0 %v5452_v0, %s5342_s26 }
  0x2d   : > { %719 = vrot.lane.b32.xlu1 %v5465_v3, %s5343_s27  ;;  %717 = vrot.lane.b32.xlu0 %v5455_v1, %s5343_s27 }
  0x31   : > { %723 = vrot.lane.b32.xlu1 %v5462_v2, %s5343_s27  ;;  %721 = vrot.lane.b32.xlu0 %v5452_v0, %s5343_s27 }
  0x35   : > { %731 = vrot.lane.b32.xlu1 %v5476_v4, %s5343_s27  ;;  %666 = vrot.lane.b32.xlu0 %v5476_v4, %s5342_s26 }
  0x39   : > { %786 = vrot.lane.b32.xlu1 %v5452_v0, %s5344_s28  ;;  %784 = vrot.lane.b32.xlu0 %v5465_v3, %s5344_s28 }
  0x3d   : > { %790 = vrot.lane.b32.xlu1 %v5507_v5, %s5344_s28  ;;  %788 = vrot.lane.b32.xlu0 %v5462_v2, %s5344_s28 }
  0x41   : > { %849 = vrot.lane.b32.xlu1 %v5465_v3, %s5345_s29  ;;  %782 = vrot.lane.b32.xlu0 %v5455_v1, %s5344_s28 }
  0x45   : > { %853 = vrot.lane.b32.xlu1 %v5462_v2, %s5345_s29  ;;  %851 = vrot.lane.b32.xlu0 %v5452_v0, %s5345_s29 }
  0x49   : > { %914 = vrot.lane.b32.xlu1 %v5465_v3, %s5346_s30  ;;  %855 = vrot.lane.b32.xlu0 %v5507_v5, %s5345_s29 }
  0x4d   : > { %918 = vrot.lane.b32.xlu1 %v5462_v2, %s5346_s30  ;;  %916 = vrot.lane.b32.xlu0 %v5452_v0, %s5346_s30 }
  0x51   : > { %847 = vrot.lane.b32.xlu1 %v5455_v1, %s5345_s29  ;;  %920 = vrot.lane.b32.xlu0 %v5507_v5, %s5346_s30 }
  0x55   : > { %977 = vrot.lane.b32.xlu1 %v5455_v1, %s5348_s16  ;;  %912 = vrot.lane.b32.xlu0 %v5455_v1, %s5346_s30 }
  0x59   : > { %981 = vrot.lane.b32.xlu1 %v5452_v0, %s5348_s16  ;;  %979 = vrot.lane.b32.xlu0 %v5465_v3, %s5348_s16 }
  0x5d   : > { %985 = vrot.lane.b32.xlu1 %v5507_v5, %s5348_s16  ;;  %983 = vrot.lane.b32.xlu0 %v5462_v2, %s5348_s16 }
  0x61   : > { %530 = vrot.lane.b32.xlu1 %v5554_v7, %s7841_s24  ;;  %528 = vrot.lane.b32.xlu0 %v5507_v5, %s7841_s24 }
  0x65   : > { %597 = vrot.lane.b32.xlu1 %v5554_v7, %s7843_s25  ;;  %595 = vrot.lane.b32.xlu0 %v5507_v5, %s7843_s25 }
  0x69   : > { %662 = vrot.lane.b32.xlu1 %v5554_v7, %s5342_s26  ;;  %660 = vrot.lane.b32.xlu0 %v5507_v5, %s5342_s26 }
  0x6d   : > { %727 = vrot.lane.b32.xlu1 %v5554_v7, %s5343_s27  ;;  %725 = vrot.lane.b32.xlu0 %v5507_v5, %s5343_s27 }
  0x71   : > { %794 = vrot.lane.b32.xlu1 %v5573_v8, %s5344_s28  ;;  %792 = vrot.lane.b32.xlu0 %v5554_v7, %s5344_s28 }
  0x75   : > { %859 = vrot.lane.b32.xlu1 %v5573_v8, %s5345_s29  ;;  %857 = vrot.lane.b32.xlu0 %v5554_v7, %s5345_s29 }
  0x79   : > { %924 = vrot.lane.b32.xlu1 %v5573_v8, %s5346_s30  ;;  %922 = vrot.lane.b32.xlu0 %v5554_v7, %s5346_s30 }
  0x7d   : > { %989 = vrot.lane.b32.xlu1 %v5573_v8, %s5348_s16  ;;  %987 = vrot.lane.b32.xlu0 %v5554_v7, %s5348_s16 }
  0x81   : > { %599 = vrot.lane.b32.xlu1 %v5573_v8, %s7843_s25  ;;  %532 = vrot.lane.b32.xlu0 %v5573_v8, %s7841_s24  ;;  %s7847_s24 = smov 16  }
  0x83   : > { %v525_v11 = vpop.permute.xlu1 %524  ;;  %v521_v12 = vpop.permute.xlu0 %520 }
  0x85   : > { %729 = vrot.lane.b32.xlu1 %v5573_v8, %s5343_s27  ;;  %664 = vrot.lane.b32.xlu0 %v5573_v8, %s5342_s26 }
  0x87   : > { %v5614_v17 = vpop.permute.xlu1 %526  ;;  %v523_v18 = vpop.permute.xlu0 %522 }
  0x88   : > { %v545_v23 = vsel %vm538_vm0, %v521_v12, %v523_v18  ;;  %v543_v34 = vsel %vm538_vm0, %v525_v11, %v5614_v17  ;;  %v544_v35 = vsel %vm538_vm0, %v523_v18, %v525_v11 }
  0x89   : > { %861 = vrot.lane.b32.xlu1 %v5476_v4, %s5345_s29  ;;  %796 = vrot.lane.b32.xlu0 %v5476_v4, %s5344_s28  ;;  %v580_v32 = vmul.f32 %v554_v20, %v545_v23  ;;  %v582_v43 = vmul.f32 %v562_v26, %v543_v34  ;;  %v581_v47 = vmul.f32 %v558_v29, %v544_v35  ;;  %s5351_s29 = smov 7  }
  0x8a   : > { %v688_v20 = vrot.slane %v5634_v22, %v5690_v60  ;;  %v753_v26 = vrot.slane %v5634_v22, %v5693_v61  ;;  %v745_v34 = vrot.slane %v5651_v31, %v5693_v61 }
  0x8b   : > { %v590_v24 = vpop.permute.xlu1 %589  ;;  %v588_v25 = vpop.permute.xlu0 %587 }
  0x8c   : > { %v610_v27 = vsel %vm603_vm1, %v588_v25, %v590_v24 }
  0x8d   : > { %991 = vrot.lane.b32.xlu1 %v5476_v4, %s5348_s16  ;;  %926 = vrot.lane.b32.xlu0 %v5476_v4, %s5346_s30  ;;  %v645_v33 = vmul.f32 %v619_v21, %v610_v27  ;;  %v684_v4 = vrot.slane %v5612_v16, %v5690_v60  ;;  %v692_v21 = vrot.slane %v5620_v19, %v5690_v60 }
  0x8e   : > { %v757_v27 = vrot.slane %v5620_v19, %v5693_v61 }
  0x8f   : > { %v5665_v37 = vpop.permute.xlu1 %593  ;;  %v592_v38 = vpop.permute.xlu0 %591  ;;  %v1043_v39 = vpack.c.bf16 %v645_v33, %v580_v32 }
  0x90   : > { %v609_v42 = vsel %vm603_vm1, %v590_v24, %v592_v38  ;;  %v608_v44 = vsel %vm603_vm1, %v592_v38, %v5665_v37  ;;  %v680_v38 = vrot.slane %v5651_v31, %v5690_v60 }
  0x91   : > { %1130 = vmatprep.subr.bf16.mxu0 %v1043_v39  ;;  %v647_v46 = vmul.f32 %v627_v28, %v608_v44  ;;  %v646_v48 = vmul.f32 %v623_v30, %v609_v42  ;;  %1093 = vperm.xlu1 %4849, %v1085_v36   ;;  %v5732_v39 = vsub.s32 5, %v5595_v10 }
  0x92   : > { %1088 = vperm.xlu0 %4848, %v1084_v41  }
  0x93   : > { %v5679_v49 = vpop.permute.xlu1 %601  ;;  %v5681_v50 = vpop.permute.xlu0 %534  ;;  %v1045_v51 = vpack.c.bf16 %v647_v46, %v582_v43  ;;  %v1044_v52 = vpack.c.bf16 %v646_v48, %v581_v47 }
  0x94   : > { %v611_v53 = vsel %vm603_vm1, %v5679_v49, %v588_v25  ;;  %v546_v54 = vsel %vm538_vm0, %v5681_v50, %v521_v12 }
  0x95   : > { %1173 = vmatprep.subr.bf16.mxu1 %v1045_v51  ;;  %v579_v55 = vmul.f32 %v550_v40, %v546_v54  ;;  %v644_v56 = vmul.f32 %v615_v45, %v611_v53  ;;  %v814_v54 = vrot.slane %v5612_v16, %v5732_v39 }
  0x96   : > { %1174 = vmatpush1.bf16.msra.mxu1 %v1044_v52 }
  0x97   : > { %v655_v57 = vpop.permute.xlu1 %654  ;;  %v653_v58 = vpop.permute.xlu0 %652  ;;  %v1042_v59 = vpack.c.bf16 %v644_v56, %v579_v55 }
  0x98   : > { %v675_v11 = vsel %vm668_vm2, %v653_v58, %v655_v57 }
  0x99   : > { %1131 = vmatpush1.bf16.msra.mxu0 %v1042_v59  ;;  %v710_v24 = vmul.f32 %v684_v4, %v675_v11  ;;  %v822_v4 = vrot.slane %v5620_v19, %v5732_v39 }
  0x9b   : > { %v5696_v62 = vpop.permute.xlu1 %658  ;;  %v657_v63 = vpop.permute.xlu0 %656 }
  0x9c   : > { %v673_v28 = vsel %vm668_vm2, %v657_v63, %v5696_v62  ;;  %v674_v29 = vsel %vm668_vm2, %v655_v57, %v657_v63 }
  0x9d   : > { %v711_v40 = vmul.f32 %v688_v20, %v674_v29  ;;  %v712_v41 = vmul.f32 %v692_v21, %v673_v28 }
  0x9f   : > { %v720_v12 = vpop.permute.xlu1 %719  ;;  %v718_v18 = vpop.permute.xlu0 %717 }
  0xa0   : > { %v740_v23 = vsel %vm733_vm3, %v718_v18, %v720_v12 }
  0xa1   : > { %v775_v25 = vmul.f32 %v749_v9, %v740_v23 }
  0xa3   : > { %v5720_v30 = vpop.permute.xlu1 %723  ;;  %v722_v32 = vpop.permute.xlu0 %721  ;;  %v1051_v33 = vpack.c.bf16 %v775_v25, %v710_v24  ;;  %v810_v24 = vrot.slane %v5651_v31, %v5732_v39 }
  0xa4   : > { %v738_v35 = vsel %vm733_vm3, %v722_v32, %v5720_v30  ;;  %v739_v36 = vsel %vm733_vm3, %v720_v12, %v722_v32 }
  0xa5   : > { %v776_v42 = vmul.f32 %v753_v26, %v739_v36  ;;  %v777_v43 = vmul.f32 %v757_v27, %v738_v35  ;;  %1132 = vmatprep.subr.bf16.mxu0 %v1051_v33  ;;  %v5772_v35 = vsub.s32 6, %v5595_v10  ;;  %v5775_v36 = vsub.s32 7, %v5595_v10 }
  0xa7   : > { %v5734_v44 = vpop.permute.xlu1 %731  ;;  %v5736_v45 = vpop.permute.xlu0 %666  ;;  %v1053_v46 = vpack.c.bf16 %v777_v43, %v712_v41  ;;  %v1052_v47 = vpack.c.bf16 %v776_v42, %v711_v40  ;;  %v887_v10 = vrot.slane %v5620_v19, %v5772_v35  ;;  %v948_v43 = vrot.slane %v5634_v22, %v5775_v36 }
  0xa8   : > { %v741_v48 = vsel %vm733_vm3, %v5734_v44, %v718_v18  ;;  %v676_v51 = vsel %vm668_vm2, %v5736_v45, %v653_v58  ;;  %v818_v58 = vrot.slane %v5634_v22, %v5732_v39 }
  0xa9   : > { %v774_v52 = vmul.f32 %v745_v34, %v741_v48  ;;  %v709_v53 = vmul.f32 %v680_v38, %v676_v51  ;;  %1175 = vmatprep.subr.bf16.mxu1 %v1053_v46  ;;  %v879_v38 = vrot.slane %v5612_v16, %v5772_v35 }
  0xaa   : > { %1176 = vmatpush1.bf16.msra.mxu1 %v1052_v47 }
  0xab   : > { %v787_v55 = vpop.permute.xlu1 %786  ;;  %v785_v56 = vpop.permute.xlu0 %784  ;;  %v1050_v57 = vpack.c.bf16 %v774_v52, %v709_v53  ;;  %v883_v52 = vrot.slane %v5634_v22, %v5772_v35  ;;  %v875_v22 = vrot.slane %v5651_v31, %v5772_v35 }
  0xac   : > { %v804_v59 = vsel %vm798_vm4, %v785_v56, %v787_v55 }
  0xad   : > { %v840_v63 = vmul.f32 %v814_v54, %v804_v59  ;;  %1133 = vmatpush1.bf16.msra.mxu0 %v1050_v57 }
  0xaf   : > { %v5753_v9 = vpop.permute.xlu1 %790  ;;  %v789_v11 = vpop.permute.xlu0 %788  ;;  %v1059_v12 = vpack.c.bf16 %v840_v63, %v5465_v3 }
  0xb0   : > { %v802_v18 = vsel %vm798_vm4, %v789_v11, %v5753_v9  ;;  %v803_v20 = vsel %vm798_vm4, %v787_v55, %v789_v11 }
  0xb1   : > { %v841_v21 = vmul.f32 %v818_v58, %v803_v20  ;;  %v842_v23 = vmul.f32 %v822_v4, %v802_v18  ;;  %1134 = vmatprep.subr.bf16.mxu0 %v1059_v12  ;;  %v940_v4 = vrot.slane %v5651_v31, %v5775_v36  ;;  %v4479_v31 = vld [vmem:[%s7834_s9 + $0x48] ss:$0 sm:$0xff] }
  0xb3   : > { %v850_v25 = vpop.permute.xlu1 %849  ;;  %v5763_v26 = vpop.permute.xlu0 %782  ;;  %v1061_v27 = vpack.c.bf16 %v842_v23, %v5462_v2  ;;  %v1060_v3 = vpack.c.bf16 %v841_v21, %v5452_v0 }
  0xb4   : > { %v805_v28 = vsel %vm798_vm4, %v5763_v26, %v785_v56 }
  0xb5   : > { %v839_v29 = vmul.f32 %v810_v24, %v805_v28  ;;  %1177 = vmatprep.subr.bf16.mxu1 %v1061_v27 }
  0xb6   : > { %1178 = vmatpush1.bf16.msra.mxu1 %v1060_v3 }
  0xb7   : > { %v854_v32 = vpop.permute.xlu1 %853  ;;  %v852_v33 = vpop.permute.xlu0 %851  ;;  %v1058_v34 = vpack.c.bf16 %v839_v29, %v5455_v1  ;;  %v944_v1 = vrot.slane %v5612_v16, %v5775_v36  ;;  %v952_v16 = vrot.slane %v5620_v19, %v5775_v36 }
  0xb8   : > { %v869_v40 = vsel %vm863_vm5, %v850_v25, %v852_v33  ;;  %v868_v54 = vsel %vm863_vm5, %v852_v33, %v854_v32 }
  0xb9   : > { %1135 = vmatpush1.bf16.msra.mxu0 %v1058_v34  ;;  %v905_v47 = vmul.f32 %v879_v38, %v869_v40  ;;  %v906_v11 = vmul.f32 %v883_v52, %v868_v54  ;;  %v4480_v40 = vld [vmem:[%s7834_s9 + $0x50] ss:$0 sm:$0xff]  ;;  %v5860_v52 = vld [vmem:[%s7826_s1] sm:$0xff]  }
  0xba   : > { %v5865_v54 = vld [vmem:[%s7834_s9 + $0x20] sm:$0xff] }
  0xbb   : > { %v915_v0 = vpop.permute.xlu1 %914  ;;  %v5778_v2 = vpop.permute.xlu0 %855 }
  0xbc   : > { %v867_v53 = vsel %vm863_vm5, %v854_v32, %v5778_v2 }
  0xbd   : > { %v907_v63 = vmul.f32 %v887_v10, %v867_v53 }
  0xbf   : > { %v919_v41 = vpop.permute.xlu1 %918  ;;  %v917_v42 = vpop.permute.xlu0 %916 }
  0xc0   : > { %v934_v46 = vsel %vm928_vm6, %v915_v0, %v917_v42  ;;  %v933_v48 = vsel %vm928_vm6, %v917_v42, %v919_v41 }
  0xc1   : > { %v970_v51 = vmul.f32 %v944_v1, %v934_v46  ;;  %v971_v59 = vmul.f32 %v948_v43, %v933_v48  ;;  %v4481_v1 = vld [vmem:[%s7834_s9 + $0x58] ss:$0 sm:$0xff]  ;;  %v5853_v48 = vld [vmem:[%s7834_s9 + $0x28] sm:$0xff] }
  0xc3   : > { %v5804_v55 = vpop.permute.xlu1 %847  ;;  %v5806_v56 = vpop.permute.xlu0 %920  ;;  %v1067_v57 = vpack.c.bf16 %v970_v51, %v905_v47  ;;  %v1068_v24 = vpack.c.bf16 %v971_v59, %v906_v11 }
  0xc4   : > { %v932_v19 = vsel %vm928_vm6, %v919_v41, %v5806_v56  ;;  %v870_v12 = vsel %vm863_vm5, %v5804_v55, %v850_v25  ;;  %v4478_v25 = vld [vmem:[%s7834_s9 + $0x40] ss:$0 sm:$0xff] }
  0xc5   : > { %v972_v58 = vmul.f32 %v952_v16, %v932_v19  ;;  %1136 = vmatprep.subr.bf16.mxu0 %v1067_v57  ;;  %v904_v27 = vmul.f32 %v875_v22, %v870_v12  ;;  %v570_v19 = vrot.slane %v5853_v48, %v5604_v14  ;;  %v631_v12 = vrot.slane %v5865_v54, %v5607_v15 }
  0xc7   : > { %v5818_v18 = vpop.permute.xlu1 %977  ;;  %v5820_v20 = vpop.permute.xlu0 %912  ;;  %v1069_v21 = vpack.c.bf16 %v972_v58, %v907_v63 }
  0xc8   : > { %v935_v23 = vsel %vm928_vm6, %v5820_v20, %v915_v0 }
  0xc9   : > { %v969_v3 = vmul.f32 %v940_v4, %v935_v23  ;;  %1179 = vmatprep.subr.bf16.mxu1 %v1069_v21  ;;  %v566_v4 = vrot.slane %v5865_v54, %v5604_v14  ;;  %v635_v21 = vrot.slane %v5853_v48, %v5607_v15 }
  0xca   : > { %1180 = vmatpush1.bf16.msra.mxu1 %v1068_v24 }
  0xcb   : > { %v982_v28 = vpop.permute.xlu1 %981  ;;  %v980_v29 = vpop.permute.xlu0 %979  ;;  %v1066_v32 = vpack.c.bf16 %v969_v3, %v904_v27 }
  0xcc   : > { %v999_v33 = vsel %vm993_vm7, %v980_v29, %v982_v28  ;;  %v1000_v34 = vsel %vm993_vm7, %v5818_v18, %v980_v29 }
  0xcd   : > { %v1035_v0 = vmul.f32 %v4479_v31, %v999_v33  ;;  %1137 = vmatpush1.bf16.msra.mxu0 %v1066_v32  ;;  %v1034_v38 = vmul.f32 %v4478_v25, %v1000_v34  ;;  %v700_v34 = vrot.slane %v5853_v48, %v5690_v60 }
  0xcf   : > { %v1075_v41 = vpack.c.bf16 %v1035_v0, %v1035_v0  ;;  %v5843_v42 = vpop.permute.xlu1 %985  ;;  %v984_v10 = vpop.permute.xlu0 %983  ;;  %v1074_v43 = vpack.c.bf16 %v1034_v38, %v1034_v38 }
  0xd0   : > { %v997_v46 = vsel %vm993_vm7, %v984_v10, %v5843_v42  ;;  %v998_v47 = vsel %vm993_vm7, %v982_v28, %v984_v10 }
  0xd1   : > { %v1037_v51 = vmul.f32 %v4481_v1, %v997_v46  ;;  %4487 = vmatprep.subr.msk.bf16.mxu0 %vm1105_vm8, %v1075_v41  ;;  %v1107_v16 = vsel %vm1105_vm8, %v1074_v43, 0  ;;  %v1036_v53 = vmul.f32 %v4480_v40, %v998_v47  ;;  %v696_v1 = vrot.slane %v5865_v54, %v5690_v60 }
  0xd2   : > { %1139 = vmatpush1.bf16.msra.mxu0 %v1107_v16  ;;  %v761_v40 = vrot.slane %v5865_v54, %v5693_v61  ;;  %v765_v41 = vrot.slane %v5853_v48, %v5693_v61 }
  0xd3   : > { %v1077_v57 = vpack.c.bf16 %v1037_v51, %v1037_v51  ;;  %v5867_v59 = vpop.permute.xlu1 %530  ;;  %v529_v63 = vpop.permute.xlu0 %528  ;;  %v1076_v22 = vpack.c.bf16 %v1036_v53, %v1036_v53  ;;  %v826_v53 = vrot.slane %v5865_v54, %v5732_v39 }
  0xd4   : > { %v541_v58 = vsel %vm538_vm0, %v529_v63, %v5867_v59  ;;  %v542_v23 = vsel %vm538_vm0, %v5614_v17, %v529_v63 }
  0xd5   : > { %4488 = vmatmul.mubr.msk.bf16.vlgmr.msra.gmra.mrb[0].mxu0 %vm1101_vm9, %v5860_v52  ;;  %4489 = vmatprep.subr.msk.bf16.mxu1 %vm1105_vm8, %v1077_v57  ;;  %v1113_v11 = vsel %vm1105_vm8, %v1076_v22, 0  ;;  %v584_v24 = vmul.f32 %v570_v19, %v541_v58  ;;  %v583_v28 = vmul.f32 %v566_v4, %v542_v23 }
  0xd6   : > { %1182 = vmatpush1.bf16.msra.mxu1 %v1113_v11  ;;  %1248 = vmatprep.mubr.bf16.mxu0 %v5347_v6 }
  0xd7   : > { %v5888_v27 = vpop.permute.xlu1 %597  ;;  %v596_v3 = vpop.permute.xlu0 %595 }
  0xd8   : > { %v606_v31 = vsel %vm603_vm1, %v596_v3, %v5888_v27  ;;  %v607_v25 = vsel %vm603_vm1, %v5665_v37, %v596_v3 }
  0xd9   : > { %v648_v29 = vmul.f32 %v631_v12, %v607_v25  ;;  %v649_v32 = vmul.f32 %v635_v21, %v606_v31  ;;  %4490 = vmatmul.mubr.msk.bf16.vlgmr.msra.gmra.mrb[0].mxu1 %vm1101_vm9, %v5860_v52  ;;  %v895_v31 = vrot.slane %v5853_v48, %v5772_v35 }
  0xda   : > { %1291 = vmatprep.mubr.bf16.mxu1 %v5347_v6 }
  0xdb   : > { %v1046_v17 = vpack.c.bf16 %v648_v29, %v583_v28  ;;  %v5899_v33 = vpop.permute.xlu1 %662  ;;  %v661_v0 = vpop.permute.xlu0 %660  ;;  %v1047_v38 = vpack.c.bf16 %v649_v32, %v584_v24  ;;  %v956_v32 = vrot.slane %v5865_v54, %v5775_v36 }
  0xdc   : > { %v671_v37 = vsel %vm668_vm2, %v661_v0, %v5899_v33  ;;  %v672_v10 = vsel %vm668_vm2, %v5696_v62, %v661_v0  ;;  %v830_v62 = vrot.slane %v5853_v48, %v5732_v39 }
  0xdd   : > { %1216 = vmatprep.subr.bf16.mxu0 %v1047_v38  ;;  %v714_v43 = vmul.f32 %v700_v34, %v671_v37  ;;  %v713_v57 = vmul.f32 %v696_v1, %v672_v10 }
  0xde   : > { %1217 = vmatpush1.bf16.msra.mxu0 %v1046_v17 }
  0xdf   : > { %v5915_v46 = vpop.permute.xlu1 %727  ;;  %v726_v47 = vpop.permute.xlu0 %725 }
  0xe0   : > { %v736_v51 = vsel %vm733_vm3, %v726_v47, %v5915_v46  ;;  %v737_v16 = vsel %vm733_vm3, %v5720_v30, %v726_v47 }
  0xe1   : > { %v778_v19 = vmul.f32 %v761_v40, %v737_v16  ;;  %v779_v63 = vmul.f32 %v765_v41, %v736_v51  ;;  %v4482_v40 = vld [vmem:[%s7834_s9 + $0x60] ss:$0 sm:$0xff]  ;;  %v4483_v41 = vld [vmem:[%s7834_s9 + $0x68] ss:$0 sm:$0xff] }
  0xe3   : > { %v1054_v22 = vpack.c.bf16 %v778_v19, %v713_v57  ;;  %v5927_v58 = vpop.permute.xlu1 %794  ;;  %v793_v4 = vpop.permute.xlu0 %792  ;;  %v1055_v11 = vpack.c.bf16 %v779_v63, %v714_v43 }
  0xe4   : > { %v800_v12 = vsel %vm798_vm4, %v793_v4, %v5927_v58  ;;  %v801_v30 = vsel %vm798_vm4, %v5753_v9, %v793_v4  ;;  %v891_v9 = vrot.slane %v5865_v54, %v5772_v35 }
  0xe5   : > { %v843_v21 = vmul.f32 %v826_v53, %v801_v30  ;;  %v844_v23 = vmul.f32 %v830_v62, %v800_v12  ;;  %1218 = vmatprep.subr.bf16.mxu0 %v1055_v11 }
  0xe6   : > { %1219 = vmatpush1.bf16.msra.mxu0 %v1054_v22 }
  0xe7   : > { %v1062_v24 = vpack.c.bf16 %v843_v21, %v5507_v5  ;;  %v5936_v3 = vpop.permute.xlu1 %859  ;;  %v858_v25 = vpop.permute.xlu0 %857  ;;  %v1063_v28 = vpack.c.bf16 %v844_v23, %v5554_v7  ;;  %v960_v5 = vrot.slane %v5853_v48, %v5775_v36 }
  0xe8   : > { %v865_v29 = vsel %vm863_vm5, %v858_v25, %v5936_v3  ;;  %v866_v17 = vsel %vm863_vm5, %v5778_v2, %v858_v25  ;;  %v5964_v2 = vld [vmem:[%s7834_s9 + $0x38] sm:$0xff] }
  0xe9   : > { %1220 = vmatprep.subr.bf16.mxu0 %v1063_v28  ;;  %v909_v7 = vmul.f32 %v895_v31, %v865_v29  ;;  %v908_v37 = vmul.f32 %v891_v9, %v866_v17  ;;  %v643_v57 = vrot.slane %v5964_v2, %v5607_v15  ;;  %v578_v19 = vrot.slane %v5964_v2, %v5604_v14 }
  0xea   : > { %1221 = vmatpush1.bf16.msra.mxu0 %v1062_v24  ;;  %v708_v31 = vrot.slane %v5964_v2, %v5690_v60 }
  0xeb   : > { %v5953_v34 = vpop.permute.xlu1 %924  ;;  %v923_v0 = vpop.permute.xlu0 %922 }
  0xec   : > { %v930_v38 = vsel %vm928_vm6, %v923_v0, %v5953_v34  ;;  %v931_v54 = vsel %vm928_vm6, %v5806_v56, %v923_v0  ;;  %v5975_v56 = vld [vmem:[%s7834_s9 + $0x30] sm:$0xff] }
  0xed   : > { %v973_v1 = vmul.f32 %v956_v32, %v931_v54  ;;  %v974_v48 = vmul.f32 %v960_v5, %v930_v38  ;;  %v639_v22 = vrot.slane %v5975_v56, %v5607_v15  ;;  %v574_v4 = vrot.slane %v5975_v56, %v5604_v14 }
  0xee   : > { %v769_v11 = vrot.slane %v5975_v56, %v5693_v61  ;;  %v704_v24 = vrot.slane %v5975_v56, %v5690_v60 }
  0xef   : > { %v1070_v10 = vpack.c.bf16 %v973_v1, %v908_v37  ;;  %v5977_v43 = vpop.permute.xlu1 %989  ;;  %v988_v47 = vpop.permute.xlu0 %987  ;;  %v1071_v51 = vpack.c.bf16 %v974_v48, %v909_v7  ;;  %v838_v37 = vrot.slane %v5964_v2, %v5732_v39 }
  0xf0   : > { %v995_v16 = vsel %vm993_vm7, %v988_v47, %v5977_v43  ;;  %v996_v53 = vsel %vm993_vm7, %v5843_v42, %v988_v47  ;;  %v773_v42 = vrot.slane %v5964_v2, %v5693_v61 }
  0xf1   : > { %v1038_v63 = vmul.f32 %v4482_v40, %v996_v53  ;;  %v1039_v62 = vmul.f32 %v4483_v41, %v995_v16  ;;  %1222 = vmatprep.subr.bf16.mxu0 %v1071_v51 }
  0xf2   : > { %1223 = vmatpush1.bf16.msra.mxu0 %v1070_v10 }
  0xf3   : > { %v1078_v12 = vpack.c.bf16 %v1038_v63, %v1038_v63  ;;  %v1079_v30 = vpack.c.bf16 %v1039_v62, %v1039_v62  ;;  %v600_v21 = vpop.permute.xlu1 %599  ;;  %v533_v23 = vpop.permute.xlu0 %532 }
  0xf4   : > { %v604_v25 = vsel %vm603_vm1, %v600_v21, %v5679_v49  ;;  %v605_v28 = vsel %vm603_vm1, %v5888_v27, %v600_v21  ;;  %v539_v29 = vsel %vm538_vm0, %v533_v23, %v5681_v50  ;;  %v540_v9 = vsel %vm538_vm0, %v5867_v59, %v533_v23  ;;  %v5331_v23 = vld [vmem:[%s5449_s23 + $0x38] sm:$0xff]  ;;  %s5353_s23 = smov 120  }
  0xf5   : > { %v650_v32 = vmul.f32 %v639_v22, %v605_v28  ;;  %v651_v5 = vmul.f32 %v643_v57, %v604_v25  ;;  %v585_v17 = vmul.f32 %v574_v4, %v540_v9  ;;  %v586_v7 = vmul.f32 %v578_v19, %v539_v29  ;;  %4491 = vmatprep.subr.msk.bf16.mxu0 %vm1105_vm8, %v1079_v30 }
  0xf6   : > { %v1119_v49 = vsel %vm1105_vm8, %v1078_v12, 0  ;;  %v834_v50 = vrot.slane %v5975_v56, %v5732_v39 }
  0xf7   : > { %v1048_v0 = vpack.c.bf16 %v650_v32, %v585_v17  ;;  %1225 = vmatpush1.bf16.msra.mxu0 %v1119_v49  ;;  %v730_v38 = vpop.permute.xlu1 %729  ;;  %v665_v27 = vpop.permute.xlu0 %664  ;;  %v1049_v54 = vpack.c.bf16 %v651_v5, %v586_v7 }
  0xf8   : > { %v734_v59 = vsel %vm733_vm3, %v730_v38, %v5734_v44  ;;  %v735_v1 = vsel %vm733_vm3, %v5915_v46, %v730_v38  ;;  %v669_v48 = vsel %vm668_vm2, %v665_v27, %v5736_v45  ;;  %v670_v40 = vsel %vm668_vm2, %v5899_v33, %v665_v27 }
  0xf9   : > { %v780_v41 = vmul.f32 %v769_v11, %v735_v1  ;;  %v781_v10 = vmul.f32 %v773_v42, %v734_v59  ;;  %v715_v47 = vmul.f32 %v704_v24, %v670_v40  ;;  %v716_v51 = vmul.f32 %v708_v31, %v669_v48  ;;  %1259 = vmatprep.subr.bf16.mxu1 %v1049_v54 }
  0xfa   : > { %4492 = vmatmul.mubr.msk.bf16.vlgmr.msra.gmra.mrb[4].mxu0 %vm1101_vm9, %v5860_v52  ;;  %1260 = vmatpush1.bf16.msra.mxu1 %v1048_v0  ;;  %v899_v46 = vrot.slane %v5975_v56, %v5772_v35  ;;  %v903_v45 = vrot.slane %v5964_v2, %v5772_v35  ;;  %v964_v11 = vrot.slane %v5975_v56, %v5775_v36  ;;  %vm2579_vm2 = vcmp.lt.s32.totalorder %v5597_v13, 119 }
  0xfb   : > { %v1056_v44 = vpack.c.bf16 %v780_v41, %v715_v47  ;;  %v862_v16 = vpop.permute.xlu1 %861  ;;  %v797_v53 = vpop.permute.xlu0 %796  ;;  %v1057_v57 = vpack.c.bf16 %v781_v10, %v716_v51 }
  0xfc   : > { %v864_v33 = vsel %vm863_vm5, %v5936_v3, %v862_v16  ;;  %v871_v19 = vsel %vm863_vm5, %v862_v16, %v5804_v55  ;;  %v799_v63 = vsel %vm798_vm4, %v5927_v58, %v797_v53  ;;  %v806_v62 = vsel %vm798_vm4, %v797_v53, %v5763_v26  ;;  %v4484_v55 = vld [vmem:[%s7834_s9 + $0x70] ss:$0 sm:$0xff]  ;;  %v4485_v58 = vld [vmem:[%s7834_s9 + $0x78] ss:$0 sm:$0xff] }
  0xfd   : > { %v845_v22 = vmul.f32 %v834_v50, %v799_v63  ;;  %v846_v4 = vmul.f32 %v838_v37, %v806_v62  ;;  %1261 = vmatprep.subr.bf16.mxu1 %v1057_v57  ;;  %v968_v3 = vrot.slane %v5964_v2, %v5775_v36  ;;  %v910_v42 = vmul.f32 %v899_v46, %v864_v33 }
  0xfe   : > { %1262 = vmatpush1.bf16.msra.mxu1 %v1056_v44  ;;  %v911_v26 = vmul.f32 %v903_v45, %v871_v19  ;;  %vm2995_vm5 = vcmask 261120  }
  0xff   : > { %v1064_v12 = vpack.c.bf16 %v845_v22, %v5573_v8  ;;  %v992_v30 = vpop.permute.xlu1 %991  ;;  %v927_v21 = vpop.permute.xlu0 %926  ;;  %v1065_v56 = vpack.c.bf16 %v846_v4, %v5331_v23  ;;  %v5076_v4 = vld [vmem:[%s7836_s11] ss:$8 sps:$4 sm:$0xff]   ;;  %v5093_v23 = vld [vmem:[%s7836_s11 + $0x54] ss:$8 sps:$4 sm:$0xff]  }
 0x100   : > { %v994_v2 = vsel %vm993_vm7, %v5977_v43, %v992_v30  ;;  %v1001_v24 = vsel %vm993_vm7, %v992_v30, %v5818_v18  ;;  %v929_v31 = vsel %vm928_vm6, %v5953_v34, %v927_v21  ;;  %v936_v8 = vsel %vm928_vm6, %v927_v21, %v5820_v20  ;;  %v5090_v30 = vld [vmem:[%s7836_s11 + $0x44] ss:$8 sps:$4 sm:$0xff]   ;;  %v5088_v21 = vld [vmem:[%s7836_s11 + $0x40] ss:$8 sps:$4 sm:$0xff]  }
 0x101   : > { %v1040_v25 = vmul.f32 %v4484_v55, %v994_v2  ;;  %v1041_v28 = vmul.f32 %v4485_v58, %v1001_v24  ;;  %v975_v29 = vmul.f32 %v964_v11, %v929_v31  ;;  %v976_v9 = vmul.f32 %v968_v3, %v936_v8  ;;  %1263 = vmatprep.subr.bf16.mxu1 %v1065_v56  ;;  %v5078_v11 = vld [vmem:[%s7836_s11 + $0x4] ss:$8 sps:$4 sm:$0xff]   ;;  %v5081_v3 = vld [vmem:[%s7836_s11 + $0x14] ss:$8 sps:$4 sm:$0xff]   ;;  %v5079_v55 = vld [vmem:[%s7836_s11 + $0x10] ss:$8 sps:$4 sm:$0xff]  }
 0x102   : > { %1264 = vmatpush1.bf16.msra.mxu1 %v1064_v12  ;;  %2222 = vmatprep.subr.bf16.mxu0 %v5078_v11  ;;  %v5084_v58 = vld [vmem:[%s7836_s11 + $0x24] ss:$8 sps:$4 sm:$0xff]   ;;  %v5085_v12 = vld [vmem:[%s7836_s11 + $0x30] ss:$8 sps:$4 sm:$0xff]   ;;  %v5094_v8 = vld [vmem:[%s7836_s11 + $0x60] ss:$8 sps:$4 sm:$0xff]  }
 0x103   : > { %v1080_v32 = vpack.c.bf16 %v1040_v25, %v1040_v25  ;;  %v1072_v43 = vpack.c.bf16 %v975_v29, %v910_v42  ;;  %v1073_v5 = vpack.c.bf16 %v976_v9, %v911_v26  ;;  %v1081_v17 = vpack.c.bf16 %v1041_v28, %v1041_v28  ;;  %2223 = vmatpush1.bf16.msra.mxu0 %v5076_v4  ;;  %v5082_v42 = vld [vmem:[%s7836_s11 + $0x20] ss:$8 sps:$4 sm:$0xff]   ;;  %v5087_v26 = vld [vmem:[%s7836_s11 + $0x34] ss:$8 sps:$4 sm:$0xff]   ;;  %v5091_v56 = vld [vmem:[%s7836_s11 + $0x50] ss:$8 sps:$4 sm:$0xff]  }
 0x104   : > { %2224 = vmatprep.subr.bf16.mxu0 %v5081_v3  ;;  %v5096_v2 = vld [vmem:[%s7836_s11 + $0x64] ss:$8 sps:$4 sm:$0xff]   ;;  %v5099_v28 = vld [vmem:[%s7836_s11 + $0x74] ss:$8 sps:$4 sm:$0xff]   ;;  %v5097_v9 = vld [vmem:[%s7836_s11 + $0x70] ss:$8 sps:$4 sm:$0xff]  }
 0x105   : > { %1265 = vmatprep.subr.bf16.mxu1 %v1073_v5  ;;  %v1125_v18 = vsel %vm1105_vm8, %v1080_v32, 0  ;;  %v5102_v32 = vld [vmem:[%s7836_s11 + $0x84] ss:$8 sps:$4 sm:$0xff]   ;;  %v5105_v5 = vld [vmem:[%s7836_s11 + $0x94] ss:$8 sps:$4 sm:$0xff]  }
 0x106   : > { %1266 = vmatpush1.bf16.msra.mxu1 %v1072_v43  ;;  %v5100_v43 = vld [vmem:[%s7836_s11 + $0x80] ss:$8 sps:$4 sm:$0xff]   ;;  %v5120_v4 = vld [vmem:[%s7836_s11 + $0xe4] ss:$8 sps:$4 sm:$0xff]  }
 0x107   : > { %4493 = vmatprep.subr.msk.bf16.mxu1 %vm1105_vm8, %v1081_v17  ;;  %2225 = vmatpush1.bf16.msra.mxu0 %v5079_v55  ;;  %v5103_v17 = vld [vmem:[%s7836_s11 + $0x90] ss:$8 sps:$4 sm:$0xff]   ;;  %v5118_v11 = vld [vmem:[%s7836_s11 + $0xe0] ss:$8 sps:$4 sm:$0xff]  }
 0x108   : > { %2226 = vmatprep.subr.bf16.mxu0 %v5084_v58 }
 0x10a   : > { %1268 = vmatpush1.bf16.msra.mxu1 %v1125_v18  ;;  %v5108_v18 = vld [vmem:[%s7836_s11 + $0xa4] ss:$8 sps:$4 sm:$0xff]  }
 0x10b   : > { %2227 = vmatpush1.bf16.msra.mxu0 %v5082_v42 }
 0x10c   : > { %2228 = vmatprep.subr.bf16.mxu0 %v5087_v26 }
 0x10d   : > { %4494 = vmatmul.mubr.msk.bf16.vlgmr.msra.gmra.mrb[4].mxu1 %vm1101_vm9, %v5860_v52 }
 0x10f   : > { %2229 = vmatpush1.bf16.msra.mxu0 %v5085_v12 }
 0x110   : > { %v6079_v49 = vpop.permute.xlu1 %1093  ;;  %2230 = vmatprep.subr.bf16.mxu0 %v5090_v30  ;;  %v5123_v30 = vld [vmem:[%s7836_s11 + $0xf4] ss:$8 sps:$4 sm:$0xff]  }
 0x111   : > { %v6077_v20 = vpop.permute.xlu0 %1088 }
 0x113   : > { %2231 = vmatpush1.bf16.msra.mxu0 %v5088_v21 }
 0x114   : > { %2232 = vmatprep.subr.bf16.mxu0 %v5093_v23 }
 0x117   : > { %2233 = vmatpush1.bf16.msra.mxu0 %v5091_v56  ;;  %v5121_v56 = vld [vmem:[%s7836_s11 + $0xf0] ss:$8 sps:$4 sm:$0xff]  }
 0x118   : > { %2234 = vmatprep.subr.bf16.mxu0 %v5096_v2 }
 0x11b   : > { %2235 = vmatpush1.bf16.msra.mxu0 %v5094_v8 }
 0x11c   : > { %2236 = vmatprep.subr.bf16.mxu0 %v5099_v28 }
 0x11f   : > { %2237 = vmatpush1.bf16.msra.mxu0 %v5097_v9 }
 0x120   : > { %2238 = vmatprep.subr.bf16.mxu0 %v5102_v32 }
 0x123   : > { %2239 = vmatpush1.bf16.msra.mxu0 %v5100_v43 }
 0x124   : > { %2240 = vmatprep.subr.bf16.mxu0 %v5105_v5 }
 0x127   : > { %2241 = vmatpush1.bf16.msra.mxu0 %v5103_v17 }
 0x128   : > { %2242 = vmatprep.subr.bf16.mxu0 %v5108_v18 }
 0x1a8   : > { %v1164_v34 = vpop.f32.mrb[0].mxu0 }
 0x1a9   : > { %v1166_v7 = vpop.f32.mrb[1].mxu0  ;;  %v6099_v47 = vadd.f32 %v1164_v34, %v6077_v20  ;;  %v5106_v34 = vld [vmem:[%s7836_s11 + $0xa0] ss:$8 sps:$4 sm:$0xff]  }
 0x1aa   : > { %v1168_v0 = vpop.f32.mrb[2].mxu0  ;;  %v6082_v38 = vadd.f32 %v1166_v7, %v6077_v20  ;;  %v5111_v7 = vld [vmem:[%s7836_s11 + $0xb4] ss:$8 sps:$4 sm:$0xff]   ;;  %2243 = vmatpush1.bf16.msra.mxu0 %v5106_v34 }
 0x1ab   : > { %v1170_v27 = vpop.f32.mrb[3].mxu0  ;;  %v6102_v51 = vadd.f32 %v1168_v0, %v6079_v49  ;;  %v1302_v19 = vmax.f32 %v6099_v47, 0.0  ;;  %2244 = vmatprep.subr.bf16.mxu0 %v5111_v7 }
 0x1ac   : > { %v6085_v54 = vadd.f32 %v1170_v27, %v6079_v49  ;;  %v1207_v50 = vpop.f32.mrb[0].mxu1  ;;  %v1303_v37 = vmax.f32 %v6082_v38, 0.0 }
 0x1ad   : > { %v6089_v59 = vadd.f32 %v1207_v50, %v6077_v20  ;;  %v1209_v52 = vpop.f32.mrb[1].mxu1  ;;  %v1310_v63 = vmax.f32 %v6102_v51, 0.0  ;;  %v5126_v51 = vld [vmem:[%s7836_s11 + $0x104] ss:$8 sps:$4 sm:$0xff]  }
 0x1ae   : > { %v1311_v1 = vmax.f32 %v6085_v54, 0.0  ;;  %v6093_v48 = vadd.f32 %v1209_v52, %v6077_v20  ;;  %v1211_v40 = vpop.f32.mrb[2].mxu1  ;;  %v5109_v52 = vld [vmem:[%s7836_s11 + $0xb0] ss:$8 sps:$4 sm:$0xff]  }
 0x1af   : > { %v6096_v41 = vadd.f32 %v1211_v40, %v6079_v49  ;;  %v1213_v10 = vpop.f32.mrb[3].mxu1  ;;  %v1304_v45 = vmax.f32 %v6089_v59, 0.0  ;;  %v4865_v22 = vpack.i.bf16 %v1310_v63, %v1302_v19  ;;  %2245 = vmatpush1.bf16.msra.mxu0 %v5109_v52 }
 0x1b0   : > { %v6105_v44 = vadd.f32 %v1213_v10, %v6079_v49  ;;  %v4855_v46 = vpack.i.bf16 %v1311_v1, %v1303_v37  ;;  %v1305_v53 = vmax.f32 %v6093_v48, 0.0  ;;  %v5114_v10 = vld [vmem:[%s7836_s11 + $0xc4] ss:$8 sps:$4 sm:$0xff]  }
 0x1b1   : > { %v1312_v16 = vmax.f32 %v6096_v41, 0.0  ;;  %2246 = vmatprep.subr.bf16.mxu0 %v5114_v10 }
 0x1b2   : > { %v1313_v57 = vmax.f32 %v6105_v44, 0.0  ;;  %4856 = vrot.lane.b32.xlu1 %v4855_v46, %s5344_s28  ;;  %v5112_v46 = vld [vmem:[%s7836_s11 + $0xc0] ss:$8 sps:$4 sm:$0xff]  }
 0x1b3   : > { %v4850_v33 = vpack.i.bf16 %v1312_v16, %v1304_v45  ;;  %2247 = vmatpush1.bf16.msra.mxu0 %v5112_v46 }
 0x1b4   : > { %v4860_v62 = vpack.i.bf16 %v1313_v57, %v1305_v53 }
 0x1b5   : > { %4851 = vrot.lane.b32.xlu0 %v4850_v33, %s5344_s28  ;;  %v5117_v33 = vld [vmem:[%s7836_s11 + $0xd4] ss:$8 sps:$4 sm:$0xff]  }
 0x1b6   : > { %4861 = vrot.lane.b32.xlu1 %v4860_v62, %s5344_s28  ;;  %v5115_v62 = vld [vmem:[%s7836_s11 + $0xd0] ss:$8 sps:$4 sm:$0xff]   ;;  %2248 = vmatprep.subr.bf16.mxu0 %v5117_v33 }
 0x1b7   : > { %2249 = vmatpush1.bf16.msra.mxu0 %v5115_v62 }
 0x1b8   : > { %2250 = vmatprep.subr.bf16.mxu0 %v5120_v4 }
 0x1b9   : > { %4866 = vrot.lane.b32.xlu0 %v4865_v22, %s5344_s28 }
 0x1bb   : > { %2251 = vmatpush1.bf16.msra.mxu0 %v5118_v11 }
 0x1bc   : > { %2252 = vmatprep.subr.bf16.mxu0 %v5123_v30 }
 0x1bf   : > { %2253 = vmatpush1.bf16.msra.mxu0 %v5121_v56 }
 0x1c0   : > { %2265 = vmatprep.subr.bf16.mxu0 %v5126_v51 }
 0x1cd   : > { %v1250_v24 = vpop.f32.mrb[4].mxu0 }
 0x1ce   : > { %v6172_v31 = vpop.f32.mrb[5].mxu0  ;;  %v6246_v2 = vadd.f32 %v1250_v24, %v6077_v20 }
 0x1cf   : > { %v1254_v25 = vpop.f32.mrb[6].mxu0 }
 0x1d0   : > { %v6180_v29 = vpop.f32.mrb[7].mxu0  ;;  %v6249_v8 = vadd.f32 %v1254_v25, %v6079_v49  ;;  %v1306_v52 = vmax.f32 %v6246_v2, 0.0 }
 0x1d1   : > { %v6281_v38 = vadd.f32 %v6180_v29, %v6079_v49 }
 0x1d2   : > { %v1314_v54 = vmax.f32 %v6249_v8, 0.0 }
 0x1d3   : > { %v1315_v10 = vmax.f32 %v6281_v38, 0.0 }
 0x1d4   : > { %v4880_v33 = vpack.i.bf16 %v1314_v54, %v1306_v52 }
 0x1e0   : > { %v6206_v0 = vpop.f32.mrb[4].mxu1 }
 0x1e1   : > { %v6208_v27 = vpop.f32.mrb[5].mxu1  ;;  %v6335_v8 = vadd.f32 %v6206_v0, %v6077_v20 }
 0x1e2   : > { %v6210_v50 = vpop.f32.mrb[6].mxu1 }
 0x1e3   : > { %v6215_v40 = vpop.f32.mrb[7].mxu1  ;;  %v1308_v51 = vmax.f32 %v6335_v8, 0.0 }
 0x224   : > { %v4857_v22 = vpop.permute.xlu1 %4856 }
 0x225   : > { %v4859_v55 = vunpack.i.h.bf16 %v4857_v22  ;;  %v4858_v58 = vunpack.i.l.bf16 %v4857_v22 }
 0x227   : > { %v4852_v3 = vpop.permute.xlu0 %4851 }
 0x228   : > { %v4854_v42 = vunpack.i.h.bf16 %v4852_v3  ;;  %v4853_v26 = vunpack.i.l.bf16 %v4852_v3  ;;  %v6235_v12 = vpop.permute.xlu1 %4861 }
 0x229   : > { %v4864_v21 = vunpack.i.h.bf16 %v6235_v12  ;;  %v4863_v23 = vunpack.i.l.bf16 %v6235_v12  ;;  %v5124_v12 = vld [vmem:[%s7836_s11 + $0x100] ss:$8 sps:$4 sm:$0xff]  }
 0x22a   : > { %v1360_v28 = vsel %vm798_vm4, %v4858_v58, %v4853_v26  ;;  %v1361_v9 = vsel %vm798_vm4, %v4859_v55, %v4854_v42 }
 0x22b   : > { %v1359_v32 = vsel %vm798_vm4, %v4854_v42, %v4864_v21  ;;  %v1358_v24 = vsel %vm798_vm4, %v4853_v26, %v4863_v23  ;;  %v6263_v43 = vpop.permute.xlu0 %4866  ;;  %v1367_v25 = vmax.f32 %v1303_v37, %v1360_v28  ;;  %v1375_v5 = vmax.f32 %v1311_v1, %v1361_v9 }
 0x22c   : > { %v4869_v17 = vunpack.i.h.bf16 %v6263_v43  ;;  %v4868_v18 = vunpack.i.l.bf16 %v6263_v43  ;;  %v6273_v34 = vmax.f32 %v1304_v45, %v1358_v24  ;;  %v6277_v7 = vmax.f32 %v1312_v16, %v1359_v32 }
 0x22d   : > { %v4870_v37 = vpack.i.bf16 %v1375_v5, %v1367_v25  ;;  %v6296_v45 = vadd.f32 %v6172_v31, %v6077_v20  ;;  %v6339_v32 = vadd.f32 %v6210_v50, %v6079_v49 }
 0x22e   : > { %v1363_v1 = vsel %vm798_vm4, %v4869_v17, %v4859_v55  ;;  %v1362_v59 = vsel %vm798_vm4, %v4868_v18, %v4858_v58  ;;  %v4875_v41 = vpack.i.bf16 %v6277_v7, %v6273_v34 }
 0x22f   : > { %4871 = vrot.lane.b32.xlu1 %v4870_v37, %s5346_s30  ;;  %v1366_v16 = vmax.f32 %v1302_v19, %v1362_v59  ;;  %v1374_v29 = vmax.f32 %v1310_v63, %v1363_v1  ;;  %v1307_v62 = vmax.f32 %v6296_v45, 0.0  ;;  %v1316_v48 = vmax.f32 %v6339_v32, 0.0  ;;  %v5175_v32 = vld [vmem:[%s7836_s11 + $0x210] ss:$8 sps:$4 sm:$0xff]  }
 0x230   : > { %4876 = vrot.lane.b32.xlu0 %v4875_v41, %s5346_s30 }
 0x231   : > { %v4885_v46 = vpack.i.bf16 %v1374_v29, %v1366_v16  ;;  %v4890_v47 = vpack.i.bf16 %v1315_v10, %v1307_v62 }
 0x233   : > { %4886 = vrot.lane.b32.xlu1 %v4885_v46, %s5346_s30 }
 0x234   : > { %4881 = vrot.lane.b32.xlu0 %v4880_v33, %s5344_s28  ;;  %v5129_v33 = vld [vmem:[%s7836_s11 + $0x114] ss:$8 sps:$4 sm:$0xff]  }
 0x237   : > { %4891 = vrot.lane.b32.xlu1 %v4890_v47, %s5344_s28 }
 0x2a1   : > { %v4872_v19 = vpop.permute.xlu1 %4871 }
 0x2a2   : > { %v4874_v63 = vunpack.i.h.bf16 %v4872_v19  ;;  %v4873_v31 = vunpack.i.l.bf16 %v4872_v19  ;;  %v6317_v22 = vpop.permute.xlu0 %4876  ;;  %v5127_v19 = vld [vmem:[%s7836_s11 + $0x110] ss:$8 sps:$4 sm:$0xff]  }
 0x2a3   : > { %v4879_v4 = vunpack.i.h.bf16 %v6317_v22  ;;  %v4878_v11 = vunpack.i.l.bf16 %v6317_v22 }
 0x2a5   : > { %v1425_v3 = vsel %vm928_vm6, %v4874_v63, %v4879_v4  ;;  %v1424_v55 = vsel %vm928_vm6, %v4873_v31, %v4878_v11  ;;  %v6329_v58 = vpop.permute.xlu1 %4886 }
 0x2a6   : > { %v4889_v42 = vunpack.i.h.bf16 %v6329_v58  ;;  %v4888_v26 = vunpack.i.l.bf16 %v6329_v58  ;;  %v4882_v30 = vpop.permute.xlu0 %4881  ;;  %v1431_v56 = vmax.f32 %v1367_v25, %v1424_v55  ;;  %v1439_v2 = vmax.f32 %v1375_v5, %v1425_v3  ;;  %v5135_v55 = vld [vmem:[%s7836_s11 + $0x134] ss:$8 sps:$4 sm:$0xff]  }
 0x2a7   : > { %v4884_v28 = vunpack.i.h.bf16 %v4882_v30  ;;  %v4883_v9 = vunpack.i.l.bf16 %v4882_v30  ;;  %v5133_v30 = vld [vmem:[%s7836_s11 + $0x130] ss:$8 sps:$4 sm:$0xff]   ;;  %v5225_v58 = vld [vmem:[%s7836_s11 + $0x314] ss:$8 sps:$4 sm:$0xff]  }
 0x2a8   : > { %v1427_v24 = vsel %vm928_vm6, %v4889_v42, %v4874_v63  ;;  %v1426_v25 = vsel %vm928_vm6, %v4888_v26, %v4873_v31  ;;  %v1447_v5 = vpack.c.bf16 %v1439_v2, %v1431_v56  ;;  %v5130_v31 = vld [vmem:[%s7836_s11 + $0x120] ss:$8 sps:$4 sm:$0xff]   ;;  %v5138_v56 = vld [vmem:[%s7836_s11 + $0x144] ss:$8 sps:$4 sm:$0xff]  }
 0x2a9   : > { %v1438_v37 = vmax.f32 %v1374_v29, %v1427_v24  ;;  %v1430_v0 = vmax.f32 %v1366_v16, %v1426_v25  ;;  %v1357_v1 = vsel %vm798_vm4, %v4864_v21, %v4884_v28  ;;  %v1356_v50 = vsel %vm798_vm4, %v4863_v23, %v4883_v9  ;;  %v6357_v59 = vpop.permute.xlu1 %4891  ;;  %v5136_v2 = vld [vmem:[%s7836_s11 + $0x140] ss:$8 sps:$4 sm:$0xff]   ;;  %v5144_v24 = vld [vmem:[%s7836_s11 + $0x164] ss:$8 sps:$4 sm:$0xff]  }
 0x2aa   : > { %v4894_v41 = vunpack.i.h.bf16 %v6357_v59  ;;  %v4893_v46 = vunpack.i.l.bf16 %v6357_v59  ;;  %2254 = vmatprep.mubr.bf16.mxu0 %v1447_v5  ;;  %v6363_v16 = vmax.f32 %v1305_v53, %v1356_v50  ;;  %v6367_v29 = vmax.f32 %v1313_v57, %v1357_v1  ;;  %v5142_v25 = vld [vmem:[%s7836_s11 + $0x160] ss:$8 sps:$4 sm:$0xff]   ;;  %v5147_v5 = vld [vmem:[%s7836_s11 + $0x174] ss:$8 sps:$4 sm:$0xff]  }
 0x2ab   : > { %v6374_v21 = vadd.f32 %v6215_v40, %v6079_v49  ;;  %v1446_v23 = vpack.c.bf16 %v1438_v37, %v1430_v0  ;;  %v6392_v57 = vadd.f32 %v6208_v27, %v6077_v20  ;;  %v5132_v27 = vld [vmem:[%s7836_s11 + $0x124] ss:$8 sps:$4 sm:$0xff]   ;;  %v5145_v37 = vld [vmem:[%s7836_s11 + $0x170] ss:$8 sps:$4 sm:$0xff]   ;;  %v5148_v1 = vld [vmem:[%s7836_s11 + $0x180] ss:$8 sps:$4 sm:$0xff]  }
 0x2ac   : > { %v1355_v44 = vsel %vm798_vm4, %v4884_v28, %v4894_v41  ;;  %v1354_v53 = vsel %vm798_vm4, %v4883_v9, %v4893_v46  ;;  %v4895_v49 = vpack.i.bf16 %v6367_v29, %v6363_v16  ;;  %v5141_v28 = vld [vmem:[%s7836_s11 + $0x154] ss:$8 sps:$4 sm:$0xff]   ;;  %v5139_v9 = vld [vmem:[%s7836_s11 + $0x150] ss:$8 sps:$4 sm:$0xff]   ;;  %v5150_v0 = vld [vmem:[%s7836_s11 + $0x184] ss:$8 sps:$4 sm:$0xff]  }
 0x2ad   : > { %2255 = vmatmul.mubr.bf16.vlgmr.msra.gmra.mrb[8].mxu0 %v1446_v23  ;;  %v6394_v40 = vmax.f32 %v1306_v52, %v1354_v53  ;;  %v6396_v47 = vmax.f32 %v1314_v54, %v1355_v44  ;;  %v1317_v63 = vmax.f32 %v6374_v21, 0.0  ;;  %v4900_v54 = vpack.i.bf16 %v1316_v48, %v1308_v51  ;;  %v5153_v50 = vld [vmem:[%s7836_s11 + $0x194] ss:$8 sps:$4 sm:$0xff]   ;;  %v5156_v23 = vld [vmem:[%s7836_s11 + $0x1a4] ss:$8 sps:$4 sm:$0xff]  }
 0x2ae   : > { %4896 = vrot.lane.b32.xlu0 %v4895_v49, %s5346_s30  ;;  %2266 = vmatpush1.bf16.msra.mxu0 %v5124_v12  ;;  %v1309_v52 = vmax.f32 %v6392_v57, 0.0  ;;  %v5151_v12 = vld [vmem:[%s7836_s11 + $0x190] ss:$8 sps:$4 sm:$0xff]   ;;  %v5159_v44 = vld [vmem:[%s7836_s11 + $0x1b4] ss:$8 sps:$4 sm:$0xff]  }
 0x2af   : > { %v4905_v20 = vpack.i.bf16 %v6396_v47, %v6394_v40  ;;  %2267 = vmatprep.subr.bf16.mxu0 %v5129_v33  ;;  %v5154_v33 = vld [vmem:[%s7836_s11 + $0x1a0] ss:$8 sps:$4 sm:$0xff]   ;;  %v5157_v53 = vld [vmem:[%s7836_s11 + $0x1b0] ss:$8 sps:$4 sm:$0xff]   ;;  %v5162_v49 = vld [vmem:[%s7836_s11 + $0x1c4] ss:$8 sps:$4 sm:$0xff]  }
 0x2b0   : > { %v4910_v3 = vpack.i.bf16 %v1317_v63, %v1309_v52  ;;  %v5180_v21 = vld [vmem:[%s7836_s11 + $0x224] ss:$8 sps:$4 sm:$0xff]   ;;  %v5178_v57 = vld [vmem:[%s7836_s11 + $0x220] ss:$8 sps:$4 sm:$0xff]  }
 0x2b1   : > { %4906 = vrot.lane.b32.xlu1 %v4905_v20, %s5346_s30  ;;  %v5165_v20 = vld [vmem:[%s7836_s11 + $0x1d4] ss:$8 sps:$4 sm:$0xff]  }
 0x2b2   : > { %4901 = vrot.lane.b32.xlu0 %v4900_v54, %s5344_s28  ;;  %2268 = vmatpush1.bf16.msra.mxu0 %v5127_v19  ;;  %v5160_v19 = vld [vmem:[%s7836_s11 + $0x1c0] ss:$8 sps:$4 sm:$0xff]   ;;  %v5168_v54 = vld [vmem:[%s7836_s11 + $0x1e4] ss:$8 sps:$4 sm:$0xff]  }
 0x2b3   : > { %2269 = vmatprep.subr.bf16.mxu0 %v5132_v27  ;;  %v5163_v27 = vld [vmem:[%s7836_s11 + $0x1d0] ss:$8 sps:$4 sm:$0xff]  }
 0x2b5   : > { %4911 = vrot.lane.b32.xlu1 %v4910_v3, %s5344_s28  ;;  %v5171_v3 = vld [vmem:[%s7836_s11 + $0x1f4] ss:$8 sps:$4 sm:$0xff]  }
 0x2b6   : > { %2270 = vmatpush1.bf16.msra.mxu0 %v5130_v31  ;;  %v5166_v31 = vld [vmem:[%s7836_s11 + $0x1e0] ss:$8 sps:$4 sm:$0xff]  }
 0x2b7   : > { %2271 = vmatprep.subr.bf16.mxu0 %v5135_v55  ;;  %v5169_v55 = vld [vmem:[%s7836_s11 + $0x1f0] ss:$8 sps:$4 sm:$0xff]  }
 0x2ba   : > { %2272 = vmatpush1.bf16.msra.mxu0 %v5133_v30  ;;  %v5174_v30 = vld [vmem:[%s7836_s11 + $0x204] ss:$8 sps:$4 sm:$0xff]  }
 0x2bb   : > { %2273 = vmatprep.subr.bf16.mxu0 %v5138_v56 }
 0x2be   : > { %2274 = vmatpush1.bf16.msra.mxu0 %v5136_v2 }
 0x2bf   : > { %2275 = vmatprep.subr.bf16.mxu0 %v5141_v28 }
 0x2c2   : > { %2276 = vmatpush1.bf16.msra.mxu0 %v5139_v9 }
 0x2c3   : > { %2277 = vmatprep.subr.bf16.mxu0 %v5144_v24 }
 0x2c6   : > { %2278 = vmatpush1.bf16.msra.mxu0 %v5142_v25 }
 0x2c7   : > { %2279 = vmatprep.subr.bf16.mxu0 %v5147_v5 }
 0x2ca   : > { %2280 = vmatpush1.bf16.msra.mxu0 %v5145_v37 }
 0x2cb   : > { %2281 = vmatprep.subr.bf16.mxu0 %v5150_v0 }
 0x2ce   : > { %2282 = vmatpush1.bf16.msra.mxu0 %v5148_v1 }
 0x2cf   : > { %2283 = vmatprep.subr.bf16.mxu0 %v5153_v50 }
 0x2d2   : > { %2284 = vmatpush1.bf16.msra.mxu0 %v5151_v12 }
 0x2d3   : > { %2285 = vmatprep.subr.bf16.mxu0 %v5156_v23 }
 0x2d6   : > { %2286 = vmatpush1.bf16.msra.mxu0 %v5154_v33 }
 0x2d7   : > { %2287 = vmatprep.subr.bf16.mxu0 %v5159_v44 }
 0x2da   : > { %2288 = vmatpush1.bf16.msra.mxu0 %v5157_v53 }
 0x2db   : > { %2289 = vmatprep.subr.bf16.mxu0 %v5162_v49 }
 0x2de   : > { %2290 = vmatpush1.bf16.msra.mxu0 %v5160_v19 }
 0x2df   : > { %2291 = vmatprep.subr.bf16.mxu0 %v5165_v20 }
 0x2e2   : > { %2292 = vmatpush1.bf16.msra.mxu0 %v5163_v27 }
 0x2e3   : > { %2293 = vmatprep.subr.bf16.mxu0 %v5168_v54  ;;  %v5184_v54 = vld [vmem:[%s7836_s11 + $0x240] ss:$8 sps:$4 sm:$0xff]  }
 0x2e6   : > { %2294 = vmatpush1.bf16.msra.mxu0 %v5166_v31  ;;  %v5189_v31 = vld [vmem:[%s7836_s11 + $0x254] ss:$8 sps:$4 sm:$0xff]  }
 0x2e7   : > { %2295 = vmatprep.subr.bf16.mxu0 %v5171_v3  ;;  %v5187_v3 = vld [vmem:[%s7836_s11 + $0x250] ss:$8 sps:$4 sm:$0xff]  }
 0x2ea   : > { %2296 = vmatpush1.bf16.msra.mxu0 %v5169_v55  ;;  %v5192_v55 = vld [vmem:[%s7836_s11 + $0x264] ss:$8 sps:$4 sm:$0xff]  }
 0x2eb   : > { %2308 = vmatprep.subr.bf16.mxu0 %v5174_v30  ;;  %v5190_v30 = vld [vmem:[%s7836_s11 + $0x260] ss:$8 sps:$4 sm:$0xff]  }
 0x320   : > { %v4897_v56 = vpop.permute.xlu0 %4896 }
 0x321   : > { %v4899_v2 = vunpack.i.h.bf16 %v4897_v56  ;;  %v4898_v28 = vunpack.i.l.bf16 %v4897_v56  ;;  %v5195_v56 = vld [vmem:[%s7836_s11 + $0x274] ss:$8 sps:$4 sm:$0xff]  }
 0x323   : > { %v1422_v9 = vsel %vm928_vm6, %v4878_v11, %v4898_v28  ;;  %v1423_v24 = vsel %vm928_vm6, %v4879_v4, %v4899_v2  ;;  %v6513_v25 = vpop.permute.xlu1 %4906 }
 0x324   : > { %v4909_v5 = vunpack.i.h.bf16 %v6513_v25  ;;  %v4908_v37 = vunpack.i.l.bf16 %v6513_v25  ;;  %v4902_v0 = vpop.permute.xlu0 %4901  ;;  %v1432_v1 = vmax.f32 %v6273_v34, %v1422_v9  ;;  %v1440_v50 = vmax.f32 %v6277_v7, %v1423_v24  ;;  %v5196_v9 = vld [vmem:[%s7836_s11 + $0x280] ss:$8 sps:$4 sm:$0xff]   ;;  %v5201_v24 = vld [vmem:[%s7836_s11 + $0x294] ss:$8 sps:$4 sm:$0xff]  }
 0x325   : > { %v4904_v12 = vunpack.i.h.bf16 %v4902_v0  ;;  %v4903_v23 = vunpack.i.l.bf16 %v4902_v0  ;;  %v5199_v0 = vld [vmem:[%s7836_s11 + $0x290] ss:$8 sps:$4 sm:$0xff]  }
 0x326   : > { %v1421_v22 = vsel %vm928_vm6, %v4899_v2, %v4909_v5  ;;  %v1420_v4 = vsel %vm928_vm6, %v4898_v28, %v4908_v37  ;;  %v1448_v59 = vpack.c.bf16 %v1440_v50, %v1432_v1  ;;  %v5193_v2 = vld [vmem:[%s7836_s11 + $0x270] ss:$8 sps:$4 sm:$0xff]   ;;  %v5198_v28 = vld [vmem:[%s7836_s11 + $0x284] ss:$8 sps:$4 sm:$0xff]   ;;  %v5202_v50 = vld [vmem:[%s7836_s11 + $0x2a0] ss:$8 sps:$4 sm:$0xff]  }
 0x327   : > { %v1352_v11 = vsel %vm798_vm4, %v4893_v46, %v4903_v23  ;;  %v1353_v34 = vsel %vm798_vm4, %v4894_v41, %v4904_v12  ;;  %v4912_v7 = vpop.permute.xlu1 %4911  ;;  %v1433_v33 = vmax.f32 %v6363_v16, %v1420_v4  ;;  %v1441_v44 = vmax.f32 %v6367_v29, %v1421_v22  ;;  %v5172_v41 = vld [vmem:[%s7836_s11 + $0x200] ss:$8 sps:$4 sm:$0xff]   ;;  %v5204_v1 = vld [vmem:[%s7836_s11 + $0x2a4] ss:$8 sps:$4 sm:$0xff]  }
 0x328   : > { %v4914_v53 = vunpack.i.h.bf16 %v4912_v7  ;;  %v4913_v49 = vunpack.i.l.bf16 %v4912_v7  ;;  %v6539_v19 = vmax.f32 %v1307_v62, %v1352_v11  ;;  %v6543_v20 = vmax.f32 %v1315_v10, %v1353_v34  ;;  %v5177_v10 = vld [vmem:[%s7836_s11 + $0x214] ss:$8 sps:$4 sm:$0xff]   ;;  %v5210_v22 = vld [vmem:[%s7836_s11 + $0x2c4] ss:$8 sps:$4 sm:$0xff]   ;;  %v5208_v4 = vld [vmem:[%s7836_s11 + $0x2c0] ss:$8 sps:$4 sm:$0xff]  }
 0x329   : > { %v1449_v46 = vpack.c.bf16 %v1441_v44, %v1433_v33  ;;  %v5213_v11 = vld [vmem:[%s7836_s11 + $0x2d4] ss:$8 sps:$4 sm:$0xff]   ;;  %v5211_v34 = vld [vmem:[%s7836_s11 + $0x2d0] ss:$8 sps:$4 sm:$0xff]   ;;  %v5216_v7 = vld [vmem:[%s7836_s11 + $0x2e4] ss:$8 sps:$4 sm:$0xff]  }
 0x32a   : > { %v1351_v16 = vsel %vm798_vm4, %v4904_v12, %v4914_v53  ;;  %v1365_v45 = vsel %vm798_vm4, %v4914_v53, %v4869_v17  ;;  %v1350_v62 = vsel %vm798_vm4, %v4903_v23, %v4913_v49  ;;  %v1364_v38 = vsel %vm798_vm4, %v4913_v49, %v4868_v18  ;;  %v5207_v12 = vld [vmem:[%s7836_s11 + $0x2b4] ss:$8 sps:$4 sm:$0xff]   ;;  %v5205_v23 = vld [vmem:[%s7836_s11 + $0x2b0] ss:$8 sps:$4 sm:$0xff]   ;;  %v5214_v33 = vld [vmem:[%s7836_s11 + $0x2e0] ss:$8 sps:$4 sm:$0xff]  }
 0x32b   : > { %2297 = vmatprep.mubr.bf16.mxu0 %v1449_v46  ;;  %v4915_v29 = vpack.i.bf16 %v6543_v20, %v6539_v19  ;;  %v6567_v27 = vmax.f32 %v1308_v51, %v1350_v62  ;;  %v6571_v17 = vmax.f32 %v1316_v48, %v1351_v16  ;;  %v6575_v43 = vmax.f32 %v1309_v52, %v1364_v38  ;;  %v5183_v51 = vld [vmem:[%s7836_s11 + $0x234] ss:$8 sps:$4 sm:$0xff]   ;;  %v5186_v52 = vld [vmem:[%s7836_s11 + $0x244] ss:$8 sps:$4 sm:$0xff]   ;;  %v5217_v53 = vld [vmem:[%s7836_s11 + $0x2f0] ss:$8 sps:$4 sm:$0xff]  }
 0x32c   : > { %2298 = vmatmul.mubr.bf16.vlgmr.msra.gmra.mrb[8].mxu0 %v1448_v59  ;;  %v6579_v18 = vmax.f32 %v1317_v63, %v1365_v45  ;;  %v5181_v63 = vld [vmem:[%s7836_s11 + $0x230] ss:$8 sps:$4 sm:$0xff]   ;;  %v5219_v44 = vld [vmem:[%s7836_s11 + $0x2f4] ss:$8 sps:$4 sm:$0xff]   ;;  %v5222_v49 = vld [vmem:[%s7836_s11 + $0x304] ss:$8 sps:$4 sm:$0xff]  }
 0x32d   : > { %4916 = vrot.lane.b32.xlu0 %v4915_v29, %s5346_s30  ;;  %v4920_v8 = vpack.i.bf16 %v6571_v17, %v6567_v27  ;;  %2309 = vmatpush1.bf16.msra.mxu0 %v5172_v41 }
 0x32e   : > { %v4925_v48 = vpack.i.bf16 %v6579_v18, %v6575_v43  ;;  %2310 = vmatprep.subr.bf16.mxu0 %v5177_v10 }
 0x32f   : > { %4921 = vrot.lane.b32.xlu1 %v4920_v8, %s5346_s30 }
 0x331   : > { %4926 = vrot.lane.b32.xlu0 %v4925_v48, %s5346_s30  ;;  %2311 = vmatpush1.bf16.msra.mxu0 %v5175_v32  ;;  %s7845_s30 = smov 9  }
 0x332   : > { %2312 = vmatprep.subr.bf16.mxu0 %v5180_v21 }
 0x335   : > { %2313 = vmatpush1.bf16.msra.mxu0 %v5178_v57 }
 0x336   : > { %2314 = vmatprep.subr.bf16.mxu0 %v5183_v51 }
 0x339   : > { %2315 = vmatpush1.bf16.msra.mxu0 %v5181_v63 }
 0x33a   : > { %2316 = vmatprep.subr.bf16.mxu0 %v5186_v52 }
 0x33d   : > { %2317 = vmatpush1.bf16.msra.mxu0 %v5184_v54  ;;  %v5220_v54 = vld [vmem:[%s7836_s11 + $0x300] ss:$8 sps:$4 sm:$0xff]  }
 0x33e   : > { %2318 = vmatprep.subr.bf16.mxu0 %v5189_v31 }
 0x341   : > { %2319 = vmatpush1.bf16.msra.mxu0 %v5187_v3 }
 0x342   : > { %2320 = vmatprep.subr.bf16.mxu0 %v5192_v55 }
 0x345   : > { %2321 = vmatpush1.bf16.msra.mxu0 %v5190_v30  ;;  %v5229_v30 = vld [vmem:[%s7836_s11 + $0x330] ss:$8 sps:$4 sm:$0xff]  }
 0x346   : > { %2322 = vmatprep.subr.bf16.mxu0 %v5195_v56  ;;  %v5234_v56 = vld [vmem:[%s7836_s11 + $0x344] ss:$8 sps:$4 sm:$0xff]  }
 0x349   : > { %2323 = vmatpush1.bf16.msra.mxu0 %v5193_v2  ;;  %v5232_v2 = vld [vmem:[%s7836_s11 + $0x340] ss:$8 sps:$4 sm:$0xff]  }
 0x34a   : > { %2324 = vmatprep.subr.bf16.mxu0 %v5198_v28  ;;  %v5237_v28 = vld [vmem:[%s7836_s11 + $0x354] ss:$8 sps:$4 sm:$0xff]  }
 0x34d   : > { %2325 = vmatpush1.bf16.msra.mxu0 %v5196_v9  ;;  %v5235_v9 = vld [vmem:[%s7836_s11 + $0x350] ss:$8 sps:$4 sm:$0xff]  }
 0x34e   : > { %2326 = vmatprep.subr.bf16.mxu0 %v5201_v24  ;;  %v5240_v24 = vld [vmem:[%s7836_s11 + $0x364] ss:$8 sps:$4 sm:$0xff]  }
 0x351   : > { %2327 = vmatpush1.bf16.msra.mxu0 %v5199_v0  ;;  %v5238_v0 = vld [vmem:[%s7836_s11 + $0x360] ss:$8 sps:$4 sm:$0xff]  }
 0x352   : > { %2328 = vmatprep.subr.bf16.mxu0 %v5204_v1  ;;  %v5243_v1 = vld [vmem:[%s7836_s11 + $0x374] ss:$8 sps:$4 sm:$0xff]  }
 0x355   : > { %2329 = vmatpush1.bf16.msra.mxu0 %v5202_v50  ;;  %v5241_v50 = vld [vmem:[%s7836_s11 + $0x370] ss:$8 sps:$4 sm:$0xff]  }
 0x356   : > { %2330 = vmatprep.subr.bf16.mxu0 %v5207_v12  ;;  %v5246_v12 = vld [vmem:[%s7836_s11 + $0x384] ss:$8 sps:$4 sm:$0xff]  }
 0x359   : > { %2331 = vmatpush1.bf16.msra.mxu0 %v5205_v23  ;;  %v5244_v23 = vld [vmem:[%s7836_s11 + $0x380] ss:$8 sps:$4 sm:$0xff]  }
 0x35a   : > { %2332 = vmatprep.subr.bf16.mxu0 %v5210_v22  ;;  %v5249_v22 = vld [vmem:[%s7836_s11 + $0x394] ss:$8 sps:$4 sm:$0xff]  }
 0x35d   : > { %2333 = vmatpush1.bf16.msra.mxu0 %v5208_v4  ;;  %v5247_v4 = vld [vmem:[%s7836_s11 + $0x390] ss:$8 sps:$4 sm:$0xff]  }
 0x35e   : > { %2334 = vmatprep.subr.bf16.mxu0 %v5213_v11  ;;  %v5252_v11 = vld [vmem:[%s7836_s11 + $0x3a4] ss:$8 sps:$4 sm:$0xff]  }
 0x361   : > { %2335 = vmatpush1.bf16.msra.mxu0 %v5211_v34  ;;  %v5250_v34 = vld [vmem:[%s7836_s11 + $0x3a0] ss:$8 sps:$4 sm:$0xff]  }
 0x362   : > { %2336 = vmatprep.subr.bf16.mxu0 %v5216_v7  ;;  %v5255_v7 = vld [vmem:[%s7836_s11 + $0x3b4] ss:$8 sps:$4 sm:$0xff]  }
 0x365   : > { %2337 = vmatpush1.bf16.msra.mxu0 %v5214_v33  ;;  %v5253_v33 = vld [vmem:[%s7836_s11 + $0x3b0] ss:$8 sps:$4 sm:$0xff]  }
 0x366   : > { %2338 = vmatprep.subr.bf16.mxu0 %v5219_v44  ;;  %v5258_v44 = vld [vmem:[%s7836_s11 + $0x3c4] ss:$8 sps:$4 sm:$0xff]  }
 0x369   : > { %2339 = vmatpush1.bf16.msra.mxu0 %v5217_v53  ;;  %v5256_v53 = vld [vmem:[%s7836_s11 + $0x3c0] ss:$8 sps:$4 sm:$0xff]  }
 0x36a   : > { %2351 = vmatprep.subr.bf16.mxu0 %v5222_v49  ;;  %v5261_v49 = vld [vmem:[%s7836_s11 + $0x3d4] ss:$8 sps:$4 sm:$0xff]  }
 0x39f   : > { %v4917_v46 = vpop.permute.xlu0 %4916 }
 0x3a0   : > { %v4919_v59 = vunpack.i.h.bf16 %v4917_v46  ;;  %v4918_v41 = vunpack.i.l.bf16 %v4917_v46  ;;  %v5259_v46 = vld [vmem:[%s7836_s11 + $0x3d0] ss:$8 sps:$4 sm:$0xff]  }
 0x3a1   : > { %v4922_v16 = vpop.permute.xlu1 %4921 }
 0x3a2   : > { %v1419_v45 = vsel %vm928_vm6, %v4909_v5, %v4919_v59  ;;  %v1418_v62 = vsel %vm928_vm6, %v4908_v37, %v4918_v41  ;;  %v4924_v38 = vunpack.i.h.bf16 %v4922_v16  ;;  %v4923_v10 = vunpack.i.l.bf16 %v4922_v16  ;;  %v5267_v16 = vld [vmem:[%s7836_s11 + $0x3f4] ss:$8 sps:$4 sm:$0xff]  }
 0x3a3   : > { %v1442_v29 = vmax.f32 %v6396_v47, %v1419_v45  ;;  %v1434_v8 = vmax.f32 %v6394_v40, %v1418_v62  ;;  %v4927_v32 = vpop.permute.xlu0 %4926  ;;  %v5265_v45 = vld [vmem:[%s7836_s11 + $0x3f0] ss:$8 sps:$4 sm:$0xff]  }
 0x3a4   : > { %v1416_v48 = vsel %vm928_vm6, %v4918_v41, %v4923_v10  ;;  %v1417_v21 = vsel %vm928_vm6, %v4919_v59, %v4924_v38  ;;  %v4929_v57 = vunpack.i.h.bf16 %v4927_v32  ;;  %v4928_v5 = vunpack.i.l.bf16 %v4927_v32  ;;  %v5264_v59 = vld [vmem:[%s7836_s11 + $0x3e4] ss:$8 sps:$4 sm:$0xff]   ;;  %v5262_v41 = vld [vmem:[%s7836_s11 + $0x3e0] ss:$8 sps:$4 sm:$0xff]  }
 0x3a5   : > { %v1435_v25 = vmax.f32 %v6539_v19, %v1416_v48  ;;  %v1443_v51 = vmax.f32 %v6543_v20, %v1417_v21  ;;  %v1450_v3 = vpack.c.bf16 %v1442_v29, %v1434_v8  ;;  %v6867_v48 = vld [vmem:[%s7828_s3] sm:$0xff] }
 0x3a6   : > { %v1415_v37 = vsel %vm928_vm6, %v4924_v38, %v4929_v57  ;;  %v1414_v47 = vsel %vm928_vm6, %v4923_v10, %v4928_v5  ;;  %v1428_v40 = vsel %vm928_vm6, %v4928_v5, %v4888_v26  ;;  %v1429_v63 = vsel %vm928_vm6, %v4929_v57, %v4889_v42  ;;  %v2615_v57 = vld [vmem:[%s7829_s4] sm:$0xff] }
 0x3a7   : > { %v1444_v19 = vmax.f32 %v6571_v17, %v1415_v37  ;;  %v1436_v20 = vmax.f32 %v6567_v27, %v1414_v47  ;;  %v1451_v52 = vpack.c.bf16 %v1443_v51, %v1435_v25  ;;  %v1437_v31 = vmax.f32 %v6575_v43, %v1428_v40  ;;  %v5223_v27 = vld [vmem:[%s7836_s11 + $0x310] ss:$8 sps:$4 sm:$0xff]   ;;  %v5228_v17 = vld [vmem:[%s7836_s11 + $0x324] ss:$8 sps:$4 sm:$0xff]   ;;  %v5226_v43 = vld [vmem:[%s7836_s11 + $0x320] ss:$8 sps:$4 sm:$0xff]  }
 0x3a8   : > { %v1445_v55 = vmax.f32 %v6579_v18, %v1429_v63  ;;  %v5231_v18 = vld [vmem:[%s7836_s11 + $0x334] ss:$8 sps:$4 sm:$0xff]   ;;  %v4626_v21 = vcombine.high %v6867_v48, %v6867_v48 }
 0x3a9   : > { %2340 = vmatprep.mubr.bf16.mxu0 %v1451_v52  ;;  %v6716_v42 = vpack.c.bf16 %v1444_v19, %v1436_v20 }
 0x3aa   : > { %2341 = vmatmul.mubr.bf16.vlgmr.msra.gmra.mrb[8].mxu0 %v1450_v3  ;;  %v1453_v26 = vpack.c.bf16 %v1445_v55, %v1437_v31  ;;  %4627 = vmatprep.mubr.msk.bf16.mxu1 %vm2627_vm10, %v4626_v21  ;;  %v6895_v55 = vld [vmem:[%s7835_s10] sm:$0xff] }
 0x3ab   : > { %2352 = vmatpush1.bf16.msra.mxu0 %v5220_v54 }
 0x3ac   : > { %2383 = vmatprep.mubr.bf16.mxu0 %v1453_v26  ;;  %2353 = vmatprep.subr.bf16.mxu0 %v5225_v58  ;;  %v6900_v58 = vld [vmem:[%s7835_s10 + $0x8] sm:$0xff]  ;;  %v2414_v26 = vrot.slane %v6895_v55, %v5604_v14 }
 0x3af   : > { %2354 = vmatpush1.bf16.msra.mxu0 %v5223_v27  ;;  %v2418_v27 = vrot.slane %v6900_v58, %v5604_v14  ;;  %v2443_v14 = vrot.slane %v6900_v58, %v5607_v15 }
 0x3b0   : > { %2355 = vmatprep.subr.bf16.mxu0 %v5228_v17 }
 0x3b3   : > { %2356 = vmatpush1.bf16.msra.mxu0 %v5226_v43 }
 0x3b4   : > { %2357 = vmatprep.subr.bf16.mxu0 %v5231_v18 }
 0x3b7   : > { %2358 = vmatpush1.bf16.msra.mxu0 %v5229_v30 }
 0x3b8   : > { %2359 = vmatprep.subr.bf16.mxu0 %v5234_v56 }
 0x3bb   : > { %2360 = vmatpush1.bf16.msra.mxu0 %v5232_v2 }
 0x3bc   : > { %2361 = vmatprep.subr.bf16.mxu0 %v5237_v28  ;;  %v2439_v28 = vrot.slane %v6895_v55, %v5607_v15 }
 0x3bf   : > { %2362 = vmatpush1.bf16.msra.mxu0 %v5235_v9 }
 0x3c0   : > { %2363 = vmatprep.subr.bf16.mxu0 %v5240_v24 }
 0x3c3   : > { %2364 = vmatpush1.bf16.msra.mxu0 %v5238_v0 }
 0x3c4   : > { %2365 = vmatprep.subr.bf16.mxu0 %v5243_v1 }
 0x3c7   : > { %2366 = vmatpush1.bf16.msra.mxu0 %v5241_v50 }
 0x3c8   : > { %2367 = vmatprep.subr.bf16.mxu0 %v5246_v12 }
 0x3cb   : > { %2368 = vmatpush1.bf16.msra.mxu0 %v5244_v23 }
 0x3cc   : > { %2369 = vmatprep.subr.bf16.mxu0 %v5249_v22 }
 0x3cf   : > { %2370 = vmatpush1.bf16.msra.mxu0 %v5247_v4 }
 0x3d0   : > { %2371 = vmatprep.subr.bf16.mxu0 %v5252_v11 }
 0x3d3   : > { %2372 = vmatpush1.bf16.msra.mxu0 %v5250_v34 }
 0x3d4   : > { %2373 = vmatprep.subr.bf16.mxu0 %v5255_v7  ;;  %v2464_v7 = vrot.slane %v6895_v55, %v5690_v60 }
 0x3d7   : > { %2374 = vmatpush1.bf16.msra.mxu0 %v5253_v33  ;;  %v2468_v33 = vrot.slane %v6900_v58, %v5690_v60 }
 0x3d8   : > { %2375 = vmatprep.subr.bf16.mxu0 %v5258_v44 }
 0x3db   : > { %2376 = vmatpush1.bf16.msra.mxu0 %v5256_v53 }
 0x3dc   : > { %2377 = vmatprep.subr.bf16.mxu0 %v5261_v49 }
 0x3df   : > { %2378 = vmatpush1.bf16.msra.mxu0 %v5259_v46 }
 0x3e0   : > { %2379 = vmatprep.subr.bf16.mxu0 %v5264_v59 }
 0x3e3   : > { %2380 = vmatpush1.bf16.msra.mxu0 %v5262_v41 }
 0x3e4   : > { %2381 = vmatprep.subr.bf16.mxu0 %v5267_v16 }
 0x3e7   : > { %2382 = vmatpush1.bf16.msra.mxu0 %v5265_v45 }
 0x3ea   : > { %2384 = vmatmul.mubr.bf16.vlgmr.msra.gmra.mrb[8].mxu0 %v6716_v42 }
 0x4bd   : > { %v6806_v62 = vpop.f32.mrb[8].mxu0 }
 0x4be   : > { %2398 = vrot.lane.b32.xlu1 %v6806_v62, %s7845_s30  ;;  %v6810_v38 = vpop.f32.mrb[9].mxu0 }
 0x4bf   : > { %v6812_v10 = vpop.f32.mrb[10].mxu0 }
 0x4c0   : > { %2400 = vrot.lane.b32.xlu0 %v6812_v10, %s7845_s30  ;;  %v6816_v29 = vpop.f32.mrb[11].mxu0  ;;  %v2604_v8 = vpack.c.bf16 %v6812_v10, %v6806_v62 }
 0x4c1   : > { %v2605_v32 = vpack.c.bf16 %v6816_v29, %v6810_v38 }
 0x4c2   : > { %2423 = vrot.lane.b32.xlu1 %v6806_v62, %s5350_s17 }
 0x4c4   : > { %2425 = vrot.lane.b32.xlu0 %v6812_v10, %s5350_s17 }
 0x4c6   : > { %2448 = vrot.lane.b32.xlu1 %v6806_v62, %s5351_s29 }
 0x4c8   : > { %2450 = vrot.lane.b32.xlu0 %v6812_v10, %s5351_s29 }
 0x4ca   : > { %2473 = vrot.lane.b32.xlu1 %v6806_v62, %s5343_s27 }
 0x4cc   : > { %2475 = vrot.lane.b32.xlu0 %v6812_v10, %s5343_s27 }
 0x4ce   : > { %2497 = vrot.lane.b32.xlu1 %v6806_v62, %s5344_s28 }
 0x4d0   : > { %2499 = vrot.lane.b32.xlu0 %v6812_v10, %s5344_s28 }
 0x4d2   : > { %2521 = vrot.lane.b32.xlu1 %v6806_v62, %s5352_s20 }
 0x4d4   : > { %2523 = vrot.lane.b32.xlu0 %v6812_v10, %s5352_s20 }
 0x4d6   : > { %2546 = vrot.lane.b32.xlu1 %v6806_v62, %s5353_s23 }
 0x4d8   : > { %2548 = vrot.lane.b32.xlu0 %v6812_v10, %s5353_s23 }
 0x4da   : > { %2402 = vrot.lane.b32.xlu1 %v6810_v38, %s7845_s30 }
 0x4dc   : > { %2404 = vrot.lane.b32.xlu0 %v6816_v29, %s7845_s30  ;;  %s7846_s30 = smov 9  }
 0x4de   : > { %2427 = vrot.lane.b32.xlu1 %v6810_v38, %s5350_s17 }
 0x4e0   : > { %2429 = vrot.lane.b32.xlu0 %v6816_v29, %s5350_s17 }
 0x4e2   : > { %2452 = vrot.lane.b32.xlu1 %v6810_v38, %s5351_s29 }
 0x4e4   : > { %2454 = vrot.lane.b32.xlu0 %v6816_v29, %s5351_s29  ;;  %s7848_s29 = smov 17  }
 0x4e6   : > { %2477 = vrot.lane.b32.xlu1 %v6810_v38, %s5343_s27 }
 0x4e8   : > { %2479 = vrot.lane.b32.xlu0 %v6816_v29, %s5343_s27 }
 0x4ea   : > { %2571 = vrot.lane.b32.xlu1 %v6806_v62, %s5354_s21  ;;  %v2566_v62 = vrot.slane %v6900_v58, %v5775_v36 }
 0x4ec   : > { %2573 = vrot.lane.b32.xlu0 %v6812_v10, %s5354_s21 }
 0x4ee   : > { %2501 = vrot.lane.b32.xlu1 %v6810_v38, %s5344_s28 }
 0x4f0   : > { %2503 = vrot.lane.b32.xlu0 %v6816_v29, %s5344_s28 }
 0x4f2   : > { %2525 = vrot.lane.b32.xlu1 %v6810_v38, %s5352_s20 }
 0x4f4   : > { %2527 = vrot.lane.b32.xlu0 %v6816_v29, %s5352_s20  ;;  %s4790_s20 = sshll.u32 %s7850_s19, 5 }
 0x4f5   : > { %s7816_s16 = scalar_lea.vmem %s7840_s15, %s4790_s20 }
 0x4f6   : > { %2550 = vrot.lane.b32.xlu1 %v6810_v38, %s5353_s23 }
 0x4f8   : > { %2552 = vrot.lane.b32.xlu0 %v6816_v29, %s5353_s23 }
 0x4fa   : > { %2575 = vrot.lane.b32.xlu1 %v6810_v38, %s5354_s21 }
 0x4fc   : > { %2577 = vrot.lane.b32.xlu0 %v6816_v29, %s5354_s21 }
 0x4fe   : > { %2618 = vperm.xlu1 %4849, %v2615_v57  }
 0x530   : > { %v2399_v5 = vpop.permute.xlu1 %2398 }
 0x532   : > { %v2401_v25 = vpop.permute.xlu0 %2400 }
 0x534   : > { %v2424_v51 = vpop.permute.xlu1 %2423 }
 0x536   : > { %v2426_v37 = vpop.permute.xlu0 %2425 }
 0x538   : > { %v2449_v47 = vpop.permute.xlu1 %2448 }
 0x53a   : > { %v2451_v40 = vpop.permute.xlu0 %2450 }
 0x53c   : > { %v2474_v63 = vpop.permute.xlu1 %2473 }
 0x53e   : > { %v6880_v19 = vpop.permute.xlu0 %2475 }
 0x540   : > { %v6882_v20 = vpop.permute.xlu1 %2497 }
 0x542   : > { %v6884_v52 = vpop.permute.xlu0 %2499 }
 0x544   : > { %v6886_v54 = vpop.permute.xlu1 %2521 }
 0x546   : > { %v6888_v31 = vpop.permute.xlu0 %2523 }
 0x548   : > { %v6890_v3 = vpop.permute.xlu1 %2546 }
 0x54a   : > { %v6902_v42 = vpop.permute.xlu0 %2548 }
 0x54c   : > { %v2403_v17 = vpop.permute.xlu1 %2402 }
 0x54d   : > { %v2407_v43 = vsel %vm2406_vm11, %v2399_v5, %v2403_v17  ;;  %v2409_v18 = vsel %vm2406_vm11, %v2403_v17, %v2399_v5 }
 0x54e   : > { %v2405_v30 = vpop.permute.xlu0 %2404  ;;  %v2419_v9 = vmul.f32 %v2414_v26, %v2409_v18  ;;  %v2420_v24 = vmul.f32 %v2418_v27, %v2407_v43 }
 0x54f   : > { %v2408_v56 = vsel %vm2406_vm11, %v2401_v25, %v2405_v30  ;;  %v2410_v2 = vsel %vm2406_vm11, %v2405_v30, %v2401_v25  ;;  %v2488_v25 = vrot.slane %v6895_v55, %v5693_v61 }
 0x550   : > { %v2421_v0 = vmul.f32 %v2414_v26, %v2410_v2  ;;  %v2422_v1 = vmul.f32 %v2418_v27, %v2408_v56  ;;  %v2428_v50 = vpop.permute.xlu1 %2427 }
 0x551   : > { %v2432_v12 = vsel %vm2431_vm12, %v2424_v51, %v2428_v50  ;;  %v2434_v23 = vsel %vm2431_vm12, %v2428_v50, %v2424_v51  ;;  %v2492_v51 = vrot.slane %v6900_v58, %v5693_v61 }
 0x552   : > { %v2596_v22 = vpack.c.bf16 %v2421_v0, %v2419_v9  ;;  %v2430_v4 = vpop.permute.xlu0 %2429  ;;  %v2597_v11 = vpack.c.bf16 %v2422_v1, %v2420_v24  ;;  %v2444_v44 = vmul.f32 %v2439_v28, %v2434_v23  ;;  %v2445_v53 = vmul.f32 %v2443_v14, %v2432_v12 }
 0x553   : > { %v2433_v34 = vsel %vm2431_vm12, %v2426_v37, %v2430_v4  ;;  %v2435_v15 = vsel %vm2431_vm12, %v2430_v4, %v2426_v37  ;;  %v2512_v12 = vrot.slane %v6895_v55, %v5732_v39  ;;  %v2516_v23 = vrot.slane %v6900_v58, %v5732_v39 }
 0x554   : > { %v2446_v49 = vmul.f32 %v2439_v28, %v2435_v15  ;;  %v2447_v46 = vmul.f32 %v2443_v14, %v2433_v34  ;;  %v2453_v59 = vpop.permute.xlu1 %2452  ;;  %2631 = vmatprep.subr.bf16.mxu1 %v2597_v11  ;;  %v2537_v15 = vrot.slane %v6895_v55, %v5772_v35 }
 0x555   : > { %v2457_v41 = vsel %vm2456_vm13, %v2449_v47, %v2453_v59  ;;  %v2459_v16 = vsel %vm2456_vm13, %v2453_v59, %v2449_v47  ;;  %2632 = vmatpush1.bf16.msra.mxu1 %v2596_v22 }
 0x556   : > { %v2598_v45 = vpack.c.bf16 %v2446_v49, %v2444_v44  ;;  %v2455_v21 = vpop.permute.xlu0 %2454  ;;  %v2599_v57 = vpack.c.bf16 %v2447_v46, %v2445_v53  ;;  %v2469_v37 = vmul.f32 %v2464_v7, %v2459_v16  ;;  %v2470_v26 = vmul.f32 %v2468_v33, %v2457_v41 }
 0x557   : > { %v2458_v5 = vsel %vm2456_vm13, %v2451_v40, %v2455_v21  ;;  %v2460_v60 = vsel %vm2456_vm13, %v2455_v21, %v2451_v40 }
 0x558   : > { %v2471_v27 = vmul.f32 %v2464_v7, %v2460_v60  ;;  %v2472_v47 = vmul.f32 %v2468_v33, %v2458_v5  ;;  %v2478_v17 = vpop.permute.xlu1 %2477  ;;  %2633 = vmatprep.subr.bf16.mxu1 %v2599_v57 }
 0x559   : > { %v2481_v43 = vsel %vm733_vm3, %v2474_v63, %v2478_v17  ;;  %v2483_v18 = vsel %vm733_vm3, %v2478_v17, %v2474_v63  ;;  %2634 = vmatpush1.bf16.msra.mxu1 %v2598_v45 }
 0x55a   : > { %v2600_v40 = vpack.c.bf16 %v2471_v27, %v2469_v37  ;;  %v2480_v30 = vpop.permute.xlu0 %2479  ;;  %v2601_v56 = vpack.c.bf16 %v2472_v47, %v2470_v26  ;;  %v2493_v28 = vmul.f32 %v2488_v25, %v2483_v18  ;;  %v2494_v14 = vmul.f32 %v2492_v51, %v2481_v43  ;;  %v4624_v27 = vld [vmem:[%s7835_s10 + $0x18] ss:$0 sm:$0xff] }
 0x55b   : > { %v2482_v61 = vsel %vm733_vm3, %v6880_v19, %v2480_v30  ;;  %v2484_v2 = vsel %vm733_vm3, %v2480_v30, %v6880_v19 }
 0x55c   : > { %v2495_v9 = vmul.f32 %v2488_v25, %v2484_v2  ;;  %v2496_v24 = vmul.f32 %v2492_v51, %v2482_v61  ;;  %v2572_v0 = vpop.permute.xlu1 %2571  ;;  %2635 = vmatprep.subr.bf16.mxu1 %v2601_v56 }
 0x55d   : > { %2636 = vmatpush1.bf16.msra.mxu1 %v2600_v40 }
 0x55e   : > { %v2602_v63 = vpack.c.bf16 %v2495_v9, %v2493_v28  ;;  %v6957_v1 = vpop.permute.xlu0 %2573  ;;  %v2603_v50 = vpack.c.bf16 %v2496_v24, %v2494_v14  ;;  %v4625_v24 = vcombine.low %v6867_v48, %v6867_v48  ;;  %v5272_v48 = vld [vmem:[%s7837_s12 + $0x48] sm:$0xff]  }
 0x560   : > { %v2502_v22 = vpop.permute.xlu1 %2501  ;;  %2637 = vmatprep.subr.bf16.mxu1 %v2603_v50 }
 0x561   : > { %v2505_v19 = vsel %vm798_vm4, %v6882_v20, %v2502_v22  ;;  %v2507_v4 = vsel %vm798_vm4, %v2502_v22, %v6882_v20  ;;  %2638 = vmatpush1.bf16.msra.mxu1 %v2602_v63  ;;  %v2541_v20 = vrot.slane %v6900_v58, %v5772_v35  ;;  %v5270_v22 = vld [vmem:[%s7837_s12 + $0x40] sm:$0xff]  }
 0x562   : > { %v2504_v11 = vpop.permute.xlu0 %2503  ;;  %2639 = vmatprep.subr.bf16.mxu1 %v2605_v32  ;;  %v2517_v7 = vmul.f32 %v2512_v12, %v2505_v19  ;;  %v2518_v33 = vmul.f32 %v2516_v23, %v2507_v4  ;;  %v5271_v19 = vld [vmem:[%s7837_s12] sm:$0xff]  }
 0x563   : > { %v2506_v39 = vsel %vm798_vm4, %v6884_v52, %v2504_v11  ;;  %v2508_v34 = vsel %vm798_vm4, %v2504_v11, %v6884_v52 }
 0x564   : > { %v2519_v38 = vmul.f32 %v2512_v12, %v2506_v39  ;;  %v2520_v29 = vmul.f32 %v2516_v23, %v2508_v34  ;;  %v2526_v32 = vpop.permute.xlu1 %2525  ;;  %v5273_v34 = vld [vmem:[%s7837_s12 + $0x8] sm:$0xff]  }
 0x565   : > { %v2530_v44 = vsel %vm2529_vm14, %v6886_v54, %v2526_v32  ;;  %v2532_v53 = vsel %vm2529_vm14, %v2526_v32, %v6886_v54  ;;  %2640 = vmatpush1.bf16.msra.mxu1 %v2604_v8  ;;  %v2562_v54 = vrot.slane %v6895_v55, %v5775_v36  ;;  %v5279_v32 = vld [vmem:[%s7837_s12 + $0x20] sm:$0xff]  }
 0x566   : > { %v2606_v52 = vpack.c.bf16 %v2519_v38, %v2517_v7  ;;  %v2528_v49 = vpop.permute.xlu0 %2527  ;;  %v2607_v35 = vpack.c.bf16 %v2520_v29, %v2518_v33  ;;  %v2542_v10 = vmul.f32 %v2537_v15, %v2530_v44  ;;  %v2543_v8 = vmul.f32 %v2541_v20, %v2532_v53  ;;  %v5275_v7 = vld [vmem:[%s7837_s12 + $0x10] sm:$0xff]   ;;  %v5276_v33 = vld [vmem:[%s7837_s12 + $0x58] sm:$0xff]   ;;  %v5278_v29 = vld [vmem:[%s7837_s12 + $0x60] sm:$0xff]  }
 0x567   : > { %v2531_v46 = vsel %vm2529_vm14, %v6888_v31, %v2528_v49  ;;  %v2533_v59 = vsel %vm2529_vm14, %v2528_v49, %v6888_v31  ;;  %v5277_v38 = vld [vmem:[%s7837_s12 + $0x18] sm:$0xff]   ;;  %v5280_v44 = vld [vmem:[%s7837_s12 + $0x68] sm:$0xff]   ;;  %v5283_v49 = vld [vmem:[%s7837_s12 + $0x30] sm:$0xff]  }
 0x568   : > { %v2544_v41 = vmul.f32 %v2537_v15, %v2531_v46  ;;  %v2545_v16 = vmul.f32 %v2541_v20, %v2533_v59  ;;  %v2551_v45 = vpop.permute.xlu1 %2550  ;;  %2641 = vmatprep.subr.bf16.mxu1 %v2607_v35  ;;  %v5274_v20 = vld [vmem:[%s7837_s12 + $0x50] sm:$0xff]   ;;  %v5281_v53 = vld [vmem:[%s7837_s12 + $0x28] sm:$0xff]   ;;  %v5284_v35 = vld [vmem:[%s7837_s12 + $0x78] sm:$0xff]  }
 0x569   : > { %v2555_v21 = vsel %vm2554_vm15, %v6890_v3, %v2551_v45  ;;  %v2557_v31 = vsel %vm2554_vm15, %v2551_v45, %v6890_v3  ;;  %2642 = vmatpush1.bf16.msra.mxu1 %v2606_v52  ;;  %v4623_v3 = vld [vmem:[%s7835_s10 + $0x10] ss:$0 sm:$0xff]  ;;  %v5285_v46 = vld [vmem:[%s7837_s12 + $0x38] sm:$0xff]  }
 0x56a   : > { %v2608_v57 = vpack.c.bf16 %v2544_v41, %v2542_v10  ;;  %v2553_v55 = vpop.permute.xlu0 %2552  ;;  %v2609_v36 = vpack.c.bf16 %v2545_v16, %v2543_v8  ;;  %v2567_v60 = vmul.f32 %v2562_v54, %v2555_v21  ;;  %v2568_v25 = vmul.f32 %v2566_v62, %v2557_v31  ;;  %v5282_v52 = vld [vmem:[%s7837_s12 + $0x70] sm:$0xff]   ;;  %v5288_v41 = vld [vmem:[%s7838_s13 + $0x4] ss:$8 sps:$4 sm:$0xff]  }
 0x56b   : > { %v2556_v58 = vsel %vm2554_vm15, %v6902_v42, %v2553_v55  ;;  %v2558_v5 = vsel %vm2554_vm15, %v2553_v55, %v6902_v42 }
 0x56c   : > { %v2569_v51 = vmul.f32 %v2562_v54, %v2556_v58  ;;  %v2570_v37 = vmul.f32 %v2566_v62, %v2558_v5  ;;  %v2576_v26 = vpop.permute.xlu1 %2575  ;;  %2643 = vmatprep.subr.bf16.mxu1 %v2609_v36 }
 0x56d   : > { %v2580_v47 = vsel %vm2579_vm2, %v2572_v0, %v2576_v26  ;;  %v2582_v42 = vsel %vm2579_vm2, %v2576_v26, %v2572_v0  ;;  %2644 = vmatpush1.bf16.msra.mxu1 %v2608_v57  ;;  %v5291_v26 = vld [vmem:[%s7838_s13 + $0x14] ss:$8 sps:$4 sm:$0xff]  }
 0x56e   : > { %v2610_v17 = vpack.c.bf16 %v2569_v51, %v2567_v60  ;;  %v2578_v43 = vpop.permute.xlu0 %2577  ;;  %v2611_v18 = vpack.c.bf16 %v2570_v37, %v2568_v25  ;;  %v2592_v56 = vmul.f32 %v4623_v3, %v2580_v47  ;;  %v2593_v61 = vmul.f32 %v4624_v27, %v2582_v42  ;;  %v5286_v37 = vld [vmem:[%s7838_s13] ss:$8 sps:$4 sm:$0xff]   ;;  %v5297_v42 = vld [vmem:[%s7838_s13 + $0x34] ss:$8 sps:$4 sm:$0xff]  }
 0x56f   : > { %v2581_v40 = vsel %vm2579_vm2, %v6957_v1, %v2578_v43  ;;  %v2583_v30 = vsel %vm2579_vm2, %v2578_v43, %v6957_v1  ;;  %v5292_v47 = vld [vmem:[%s7838_s13 + $0x20] ss:$8 sps:$4 sm:$0xff]  }
 0x570   : > { %v2594_v2 = vmul.f32 %v4623_v3, %v2581_v40  ;;  %v2595_v28 = vmul.f32 %v4624_v27, %v2583_v30  ;;  %2645 = vmatprep.subr.bf16.mxu1 %v2611_v18  ;;  %v5289_v3 = vld [vmem:[%s7838_s13 + $0x10] ss:$8 sps:$4 sm:$0xff]   ;;  %v5294_v27 = vld [vmem:[%s7838_s13 + $0x24] ss:$8 sps:$4 sm:$0xff]  }
 0x571   : > { %2646 = vmatpush1.bf16.msra.mxu1 %v2610_v17  ;;  %v5295_v17 = vld [vmem:[%s7838_s13 + $0x30] ss:$8 sps:$4 sm:$0xff]  }
 0x572   : > { %v2612_v14 = vpack.c.bf16 %v2594_v2, %v2592_v56  ;;  %v2613_v9 = vpack.c.bf16 %v2595_v28, %v2593_v61 }
 0x574   : > { %2647 = vmatprep.subr.bf16.mxu1 %v2613_v9 }
 0x575   : > { %2648 = vmatpush1.bf16.msra.mxu1 %v2612_v14 }
 0x576   : > { %4791 = vmatprep.subr.bf16.mxu1 %v5270_v22  ;;  %v3059_v22 = vld [vmem:[%s7839_s14 + $0x58] sm:$0xff] }
 0x578   : > { %2664 = vmatmul.mubr.bf16.vlgmr.msra.gmra.mrb[8].mxu1 %v4625_v24 }
 0x579   : > { %4792 = vmatpush3.bf16.msra.mxu1 %v5271_v19  ;;  %v3063_v19 = vld [vmem:[%s7839_s14 + $0x78] sm:$0xff] }
 0x57a   : > { %4793 = vmatprep.subr.bf16.mxu1 %v5272_v48  ;;  %v4670_v48 = vcombine.high %v3059_v22, %v3063_v19 }
 0x57d   : > { %v2619_v0 = vpop.permute.xlu1 %2618  ;;  %4794 = vmatpush3.bf16.msra.mxu1 %v5273_v34 }
 0x57e   : > { %4795 = vmatprep.subr.bf16.mxu1 %v5274_v20  ;;  %v3079_v20 = vld [vmem:[%s7839_s14 + $0xf8] sm:$0xff] }
 0x581   : > { %4796 = vmatpush3.bf16.msra.mxu1 %v5275_v7 }
 0x582   : > { %4797 = vmatprep.subr.bf16.mxu1 %v5276_v33 }
 0x585   : > { %4798 = vmatpush3.bf16.msra.mxu1 %v5277_v38  ;;  %v3083_v38 = vld [vmem:[%s7839_s14 + $0x118] sm:$0xff] }
 0x586   : > { %4799 = vmatprep.subr.bf16.mxu1 %v5278_v29  ;;  %v3087_v29 = vld [vmem:[%s7839_s14 + $0x138] sm:$0xff] }
 0x589   : > { %4800 = vmatpush3.bf16.msra.mxu1 %v5279_v32 }
 0x58a   : > { %4801 = vmatprep.subr.bf16.mxu1 %v5280_v44  ;;  %v4694_v44 = vcombine.high %v3083_v38, %v3087_v29 }
 0x58d   : > { %4802 = vmatpush3.bf16.msra.mxu1 %v5281_v53  ;;  %v3091_v53 = vld [vmem:[%s7839_s14 + $0x158] sm:$0xff] }
 0x58e   : > { %4803 = vmatprep.subr.bf16.mxu1 %v5282_v52  ;;  %v3095_v52 = vld [vmem:[%s7839_s14 + $0x178] sm:$0xff] }
 0x591   : > { %4804 = vmatpush3.bf16.msra.mxu1 %v5283_v49  ;;  %v4693_v49 = vcombine.low %v3083_v38, %v3087_v29  ;;  %v3056_v29 = vld [vmem:[%s7839_s14 + $0x40] sm:$0xff] }
 0x592   : > { %4805 = vmatprep.subr.bf16.mxu1 %v5284_v35  ;;  %v4702_v35 = vcombine.high %v3091_v53, %v3095_v52 }
 0x595   : > { %4806 = vmatpush3.bf16.msra.mxu1 %v5285_v46  ;;  %v3099_v46 = vld [vmem:[%s7839_s14 + $0x198] sm:$0xff] }
 0x596   : > { %2913 = vmatprep.subr.bf16.mxu1 %v5288_v41 }
 0x64b   : > { %v2665_v63 = vpop.f32.mrb[8].mxu1 }
 0x64c   : > { %v2666_v50 = vadd.f32 %v2665_v63, %v2619_v0  ;;  %v2667_v12 = vpop.f32.mrb[9].mxu1  ;;  %v2979_v63 = vld [vmem:[%s7831_s6 + $0x8] sm:$0xff] }
 0x64d   : > { %v2668_v23 = vadd.f32 %v2667_v12, %v2619_v0  ;;  %v2669_v1 = vpop.f32.mrb[10].mxu1  ;;  %v2978_v0 = vld [vmem:[%s7831_s6] sm:$0xff]  ;;  %v3055_v12 = vld [vmem:[%s7839_s14 + $0x38] sm:$0xff] }
 0x64e   : > { %v2672_v4 = vmax.f32 %v2666_v50, 0.0  ;;  %v2670_v11 = vpop.f32.mrb[11].mxu1  ;;  %v3051_v50 = vld [vmem:[%s7839_s14 + $0x18] sm:$0xff] }
 0x64f   : > { %v2673_v39 = vmax.f32 %v2668_v23, 0.0  ;;  %v4661_v23 = vcombine.low %v3051_v50, %v3055_v12  ;;  %v4662_v1 = vcombine.high %v3051_v50, %v3055_v12  ;;  %v3071_v11 = vld [vmem:[%s7839_s14 + $0xb8] sm:$0xff] }
 0x651   : > { %v4930_v15 = vpack.i.bf16 %v2673_v39, %v2672_v4  ;;  %3945 = vmatprep.subr.bf16.mxu0 %v4662_v1 }
 0x652   : > { %3946 = vmatpush1.bf16.msra.mxu0 %v4661_v23 }
 0x653   : > { %4931 = vrot.lane.b32.xlu0 %v4930_v15, %s5344_s28  ;;  %3947 = vmatprep.subr.bf16.mxu0 %v4670_v48  ;;  %v3075_v15 = vld [vmem:[%s7839_s14 + $0xd8] sm:$0xff] }
 0x654   : > { %v4686_v33 = vcombine.high %v3075_v15, %v3079_v20  ;;  %v4685_v32 = vcombine.low %v3075_v15, %v3079_v20 }
 0x6c5   : > { %v4932_v59 = vpop.permute.xlu0 %4931 }
 0x6c6   : > { %v4934_v54 = vunpack.i.h.bf16 %v4932_v59  ;;  %v4933_v62 = vunpack.i.l.bf16 %v4932_v59  ;;  %v3103_v59 = vld [vmem:[%s7839_s14 + $0x1b8] sm:$0xff] }
 0x6c7   : > { %v4709_v41 = vcombine.low %v3099_v46, %v3103_v59 }
 0x6c8   : > { %v2678_v10 = vsel %vm798_vm4, %v4933_v62, %v4934_v54  ;;  %v2679_v8 = vsel %vm798_vm4, %v4934_v54, %v4933_v62  ;;  %vm2909_vm4 = vcmask 523264   ;;  %v4701_v54 = vcombine.low %v3091_v53, %v3095_v52 }
 0x6c9   : > { %v2680_v16 = vmax.f32 %v2672_v4, %v2678_v10  ;;  %v2681_v45 = vmax.f32 %v2673_v39, %v2679_v8  ;;  %v3067_v4 = vld [vmem:[%s7839_s14 + $0x98] sm:$0xff]  ;;  %v4669_v39 = vcombine.low %v3059_v22, %v3063_v19  ;;  %v4710_v62 = vcombine.high %v3099_v46, %v3103_v59 }
 0x6ca   : > { %v4678_v34 = vcombine.high %v3067_v4, %v3071_v11  ;;  %v4677_v7 = vcombine.low %v3067_v4, %v3071_v11  ;;  %v3107_v10 = vld [vmem:[%s7839_s14 + $0x1d8] sm:$0xff] }
 0x6cb   : > { %v4935_v21 = vpack.i.bf16 %v2681_v45, %v2680_v16  ;;  %3948 = vmatpush1.bf16.msra.mxu0 %v4669_v39  ;;  %v3111_v8 = vld [vmem:[%s7839_s14 + $0x1f8] sm:$0xff]  ;;  %v3048_v39 = vld [vmem:[%s7839_s14] sm:$0xff] }
 0x6cc   : > { %3949 = vmatprep.subr.bf16.mxu0 %v4678_v34  ;;  %v3052_v34 = vld [vmem:[%s7839_s14 + $0x20] sm:$0xff] }
 0x6cd   : > { %4936 = vrot.lane.b32.xlu1 %v4935_v21, %s5353_s23  ;;  %v3119_v21 = vld [vmem:[%s7839_s14 + $0x238] sm:$0xff]  ;;  %v4656_v38 = vcombine.high %v3048_v39, %v3052_v34  ;;  %v4655_v53 = vcombine.low %v3048_v39, %v3052_v34  ;;  %v3160_v34 = vld [vmem:[%s7839_s14 + $0x380] sm:$0xff] }
 0x6cf   : > { %3950 = vmatpush1.bf16.msra.mxu0 %v4677_v7 }
 0x6d0   : > { %3951 = vmatprep.subr.bf16.mxu0 %v4686_v33 }
 0x6d3   : > { %3952 = vmatpush1.bf16.msra.mxu0 %v4685_v32  ;;  %v3060_v32 = vld [vmem:[%s7839_s14 + $0x60] sm:$0xff] }
 0x6d4   : > { %3953 = vmatprep.subr.bf16.mxu0 %v4694_v44  ;;  %v5298_v44 = vld [vmem:[%s7830_s5] sm:$0xff]   ;;  %v4664_v52 = vcombine.high %v3056_v29, %v3060_v32  ;;  %v4663_v46 = vcombine.low %v3056_v29, %v3060_v32 }
 0x6d5   : > { %v3168_v29 = vld [vmem:[%s7839_s14 + $0x3c0] sm:$0xff] }
 0x6d6   : > { %v3172_v32 = vld [vmem:[%s7839_s14 + $0x3e0] sm:$0xff] }
 0x6d7   : > { %3954 = vmatpush1.bf16.msra.mxu0 %v4693_v49  ;;  %v3064_v49 = vld [vmem:[%s7839_s14 + $0x80] sm:$0xff] }
 0x6d8   : > { %3955 = vmatprep.subr.bf16.mxu0 %v4702_v35  ;;  %v3068_v35 = vld [vmem:[%s7839_s14 + $0xa0] sm:$0xff] }
 0x6d9   : > { %v4672_v59 = vcombine.high %v3064_v49, %v3068_v35 }
 0x6db   : > { %3956 = vmatpush1.bf16.msra.mxu0 %v4701_v54  ;;  %v3072_v54 = vld [vmem:[%s7839_s14 + $0xc0] sm:$0xff] }
 0x6dc   : > { %3957 = vmatprep.subr.bf16.mxu0 %v4710_v62  ;;  %v3076_v62 = vld [vmem:[%s7839_s14 + $0xe0] sm:$0xff] }
 0x6df   : > { %3958 = vmatpush1.bf16.msra.mxu0 %v4709_v41  ;;  %v3080_v41 = vld [vmem:[%s7839_s14 + $0x100] sm:$0xff] }
 0x73f   : > { %v4937_v31 = vpop.permute.xlu1 %4936 }
 0x740   : > { %v4939_v57 = vunpack.i.h.bf16 %v4937_v31  ;;  %v4938_v55 = vunpack.i.l.bf16 %v4937_v31  ;;  %v4717_v31 = vcombine.low %v3107_v10, %v3111_v8 }
 0x742   : > { %v2686_v36 = vsel %vm2554_vm15, %v4938_v55, %v4939_v57  ;;  %v2687_v58 = vsel %vm2554_vm15, %v4939_v57, %v4938_v55  ;;  %v3123_v55 = vld [vmem:[%s7839_s14 + $0x258] sm:$0xff] }
 0x743   : > { %v2688_v5 = vmax.f32 %v2680_v16, %v2686_v36  ;;  %v2689_v60 = vmax.f32 %v2681_v45, %v2687_v58  ;;  %v4718_v16 = vcombine.high %v3107_v10, %v3111_v8  ;;  %v3115_v45 = vld [vmem:[%s7839_s14 + $0x218] sm:$0xff]  ;;  %v4671_v10 = vcombine.low %v3064_v49, %v3068_v35 }
 0x744   : > { %v4726_v57 = vcombine.high %v3115_v45, %v3119_v21  ;;  %v3127_v36 = vld [vmem:[%s7839_s14 + $0x278] sm:$0xff]  ;;  %v4725_v58 = vcombine.low %v3115_v45, %v3119_v21  ;;  %v4680_v8 = vcombine.high %v3072_v54, %v3076_v62  ;;  %v4679_v45 = vcombine.low %v3072_v54, %v3076_v62  ;;  %v3053_v54 = vld [vmem:[%s7839_s14 + $0x28] sm:$0xff] }
 0x745   : > { %v2691_v25 = vpack.c.bf16 %v2689_v60, %v2689_v60  ;;  %v2690_v51 = vpack.c.bf16 %v2688_v5, %v2688_v5  ;;  %3959 = vmatprep.subr.bf16.mxu0 %v4718_v16  ;;  %v4734_v5 = vcombine.high %v3123_v55, %v3127_v36  ;;  %v3131_v60 = vld [vmem:[%s7839_s14 + $0x298] sm:$0xff]  ;;  %v3084_v16 = vld [vmem:[%s7839_s14 + $0x120] sm:$0xff]  ;;  %v4775_v49 = vcombine.low %v3168_v29, %v3172_v32 }
 0x746   : > { %3960 = vmatpush1.bf16.msra.mxu0 %v4717_v31  ;;  %v4688_v21 = vcombine.high %v3080_v41, %v3084_v16  ;;  %v3088_v31 = vld [vmem:[%s7839_s14 + $0x140] sm:$0xff] }
 0x747   : > { %2852 = vmatprep.mubr.bf16.mxu1 %v2691_v25  ;;  %3961 = vmatprep.subr.bf16.mxu0 %v4726_v57  ;;  %v3135_v25 = vld [vmem:[%s7839_s14 + $0x2b8] sm:$0xff]  ;;  %v3092_v57 = vld [vmem:[%s7839_s14 + $0x160] sm:$0xff] }
 0x748   : > { %2853 = vmatmul.mubr.bf16.vlgmr.msra.gmra.mrb[12].mxu1 %v2690_v51  ;;  %v4733_v51 = vcombine.low %v3123_v55, %v3127_v36  ;;  %v4687_v55 = vcombine.low %v3080_v41, %v3084_v16  ;;  %v4696_v36 = vcombine.high %v3088_v31, %v3092_v57 }
 0x749   : > { %2914 = vmatpush1.bf16.msra.mxu1 %v5286_v37  ;;  %2945 = vmatprep.mubr.bf16.mxu1 %v5347_v6  ;;  %v4742_v37 = vcombine.high %v3131_v60, %v3135_v25 }
 0x74a   : > { %2915 = vmatprep.subr.bf16.mxu1 %v5291_v26  ;;  %3962 = vmatpush1.bf16.msra.mxu0 %v4725_v58  ;;  %v3139_v26 = vld [vmem:[%s7839_s14 + $0x2d8] sm:$0xff]  ;;  %v3096_v58 = vld [vmem:[%s7839_s14 + $0x180] sm:$0xff] }
 0x74b   : > { %3963 = vmatprep.subr.bf16.mxu0 %v4734_v5  ;;  %v3100_v5 = vld [vmem:[%s7839_s14 + $0x1a0] sm:$0xff] }
 0x74d   : > { %2916 = vmatpush1.bf16.msra.mxu1 %v5289_v3  ;;  %v3143_v3 = vld [vmem:[%s7839_s14 + $0x2f8] sm:$0xff] }
 0x74e   : > { %2917 = vmatprep.subr.bf16.mxu1 %v5294_v27  ;;  %3964 = vmatpush1.bf16.msra.mxu0 %v4733_v51  ;;  %v4741_v27 = vcombine.low %v3131_v60, %v3135_v25  ;;  %v4695_v60 = vcombine.low %v3088_v31, %v3092_v57  ;;  %v4704_v25 = vcombine.high %v3096_v58, %v3100_v5  ;;  %v3104_v51 = vld [vmem:[%s7839_s14 + $0x1c0] sm:$0xff] }
 0x74f   : > { %3965 = vmatprep.subr.bf16.mxu0 %v4742_v37  ;;  %v3108_v37 = vld [vmem:[%s7839_s14 + $0x1e0] sm:$0xff] }
 0x751   : > { %2918 = vmatpush1.bf16.msra.mxu1 %v5292_v47  ;;  %v4750_v47 = vcombine.high %v3139_v26, %v3143_v3 }
 0x752   : > { %2919 = vmatprep.subr.bf16.mxu1 %v5297_v42  ;;  %v3147_v42 = vld [vmem:[%s7839_s14 + $0x318] sm:$0xff]  ;;  %3966 = vmatpush1.bf16.msra.mxu0 %v4741_v27  ;;  %v3112_v27 = vld [vmem:[%s7839_s14 + $0x200] sm:$0xff] }
 0x753   : > { %3967 = vmatprep.subr.bf16.mxu0 %v4750_v47  ;;  %v3116_v47 = vld [vmem:[%s7839_s14 + $0x220] sm:$0xff] }
 0x755   : > { %2920 = vmatpush1.bf16.msra.mxu1 %v5295_v17  ;;  %v3151_v17 = vld [vmem:[%s7839_s14 + $0x338] sm:$0xff] }
 0x81b   : > { %v4807_v43 = vpop.f32.mrb[12].mxu1 }
 0x81c   : > { %v4808_v18 = vpop.f32.mrb[13].mxu1 }
 0x81d   : > { %v4809_v40 = vadd.f32 %v4808_v18, %v4807_v43  ;;  %v4810_v30 = vpop.f32.mrb[14].mxu1  ;;  %v4749_v43 = vcombine.low %v3139_v26, %v3143_v3  ;;  %v4758_v18 = vcombine.high %v3147_v42, %v3151_v17  ;;  %v4703_v26 = vcombine.low %v3096_v58, %v3100_v5 }
 0x81e   : > { %v4811_v56 = vpop.f32.mrb[15].mxu1  ;;  %v3159_v30 = vld [vmem:[%s7839_s14 + $0x378] sm:$0xff]  ;;  %v4712_v3 = vcombine.high %v3104_v51, %v3108_v37 }
 0x81f   : > { %v2860_v61 = vpack.c.bf16 %v4809_v40, %v4809_v40  ;;  %v3155_v40 = vld [vmem:[%s7839_s14 + $0x358] sm:$0xff]  ;;  %3968 = vmatpush1.bf16.msra.mxu0 %v4749_v43  ;;  %v4757_v56 = vcombine.low %v3147_v42, %v3151_v17  ;;  %v4711_v42 = vcombine.low %v3104_v51, %v3108_v37  ;;  %v4720_v17 = vcombine.high %v3112_v27, %v3116_v47  ;;  %v3120_v43 = vld [vmem:[%s7839_s14 + $0x240] sm:$0xff]  ;;  %v3057_v37 = vld [vmem:[%s7839_s14 + $0x48] sm:$0xff] }
 0x820   : > { %3969 = vmatprep.subr.bf16.mxu0 %v4758_v18  ;;  %v3124_v18 = vld [vmem:[%s7839_s14 + $0x260] sm:$0xff] }
 0x821   : > { %4652 = vmatmul.mubr.msk.bf16.vlgmr.msra.gmra.mrb[16].mxu1 %vm2909_vm4, %v2860_v61  ;;  %v4766_v61 = vcombine.high %v3155_v40, %v3159_v30 }
 0x822   : > { %3031 = vmatprep.mubr.bf16.mxu1 %v5347_v6 }
 0x823   : > { %3970 = vmatpush1.bf16.msra.mxu0 %v4757_v56  ;;  %v3128_v56 = vld [vmem:[%s7839_s14 + $0x280] sm:$0xff] }
 0x824   : > { %3971 = vmatprep.subr.bf16.mxu0 %v4766_v61  ;;  %v3132_v61 = vld [vmem:[%s7839_s14 + $0x2a0] sm:$0xff] }
 0x8f4   : > { %v7119_v2 = vpop.f32.mrb[16].mxu1 }
 0x8f5   : > { %v7121_v28 = vpop.f32.mrb[17].mxu1 }
 0x8f6   : > { %v4950_v14 = vpack.i.bf16 %v7121_v28, %v7119_v2  ;;  %v2951_v9 = vpop.f32.mrb[18].mxu1 }
 0x8f7   : > { %v2952_v24 = vpop.f32.mrb[19].mxu1 }
 0x8f8   : > { %4946 = vrot.lane.b32.xlu1 %v4950_v14, %s5350_s17  ;;  %4941 = vrot.lane.b32.xlu0 %v4950_v14, %s5343_s27 }
 0x8fc   : > { %2982 = vperm.xlu1 %4849, %v2978_v0   ;;  %4951 = vrot.lane.b32.xlu0 %v4950_v14, %s7846_s30  ;;  %v4765_v14 = vcombine.low %v3155_v40, %v3159_v30  ;;  %v4719_v40 = vcombine.low %v3112_v27, %v3116_v47  ;;  %v4728_v30 = vcombine.high %v3120_v43, %v3124_v18 }
 0x8fe   : > { %3972 = vmatpush1.bf16.msra.mxu0 %v4765_v14  ;;  %v4727_v14 = vcombine.low %v3120_v43, %v3124_v18 }
 0x900   : > { %2987 = vperm.xlu0 %4848, %v2979_v63  }
 0x96a   : > { %v4947_v9 = vpop.permute.xlu1 %4946  ;;  %v4942_v24 = vpop.permute.xlu0 %4941 }
 0x96b   : > { %v4944_v0 = vunpack.i.h.bf16 %v4942_v24  ;;  %v4943_v63 = vunpack.i.l.bf16 %v4942_v24  ;;  %v4949_v50 = vunpack.i.h.bf16 %v4947_v9  ;;  %v4948_v12 = vunpack.i.l.bf16 %v4947_v9  ;;  %v3136_v24 = vld [vmem:[%s7839_s14 + $0x2c0] sm:$0xff] }
 0x96c   : > { %v4736_v9 = vcombine.high %v3128_v56, %v3132_v61 }
 0x96d   : > { %v2959_v23 = vsel %vm733_vm3, %v4944_v0, %v4943_v63  ;;  %v2958_v1 = vsel %vm733_vm3, %v4943_v63, %v4944_v0  ;;  %v2965_v15 = vsel %vm2431_vm12, %v4949_v50, %v4948_v12  ;;  %v3140_v0 = vld [vmem:[%s7839_s14 + $0x2e0] sm:$0xff]  ;;  %v4735_v63 = vcombine.low %v3128_v56, %v3132_v61 }
 0x96e   : > { %v2972_v22 = vpack.c.bf16 %v2959_v23, %v7119_v2  ;;  %v4952_v19 = vpop.permute.xlu0 %4951  ;;  %v2973_v48 = vpack.c.bf16 %v2958_v1, %v7121_v28  ;;  %v2964_v28 = vsel %vm2431_vm12, %v4948_v12, %v4949_v50  ;;  %v4744_v50 = vcombine.high %v3136_v24, %v3140_v0  ;;  %v3144_v12 = vld [vmem:[%s7839_s14 + $0x300] sm:$0xff] }
 0x96f   : > { %v4954_v4 = vunpack.i.h.bf16 %v4952_v19  ;;  %v4953_v11 = vunpack.i.l.bf16 %v4952_v19  ;;  %v3148_v23 = vld [vmem:[%s7839_s14 + $0x320] sm:$0xff]  ;;  %v4743_v1 = vcombine.low %v3136_v24, %v3140_v0 }
 0x970   : > { %2999 = vmatprep.subr.bf16.mxu1 %v2973_v48  ;;  %v3152_v19 = vld [vmem:[%s7839_s14 + $0x340] sm:$0xff] }
 0x971   : > { %v2971_v2 = vsel %vm2406_vm11, %v4954_v4, %v4953_v11  ;;  %3000 = vmatpush1.bf16.msra.mxu1 %v2972_v22  ;;  %v2970_v20 = vsel %vm2406_vm11, %v4953_v11, %v4954_v4  ;;  %v4752_v22 = vcombine.high %v3144_v12, %v3148_v23  ;;  %v3156_v48 = vld [vmem:[%s7839_s14 + $0x360] sm:$0xff]  ;;  %v4751_v4 = vcombine.low %v3144_v12, %v3148_v23 }
 0x972   : > { %v2974_v7 = vpack.c.bf16 %v2971_v2, %v2965_v15  ;;  %v2975_v33 = vpack.c.bf16 %v2970_v20, %v2964_v28  ;;  %v4760_v11 = vcombine.high %v3152_v19, %v3156_v48  ;;  %v4759_v39 = vcombine.low %v3152_v19, %v3156_v48  ;;  %v3164_v15 = vld [vmem:[%s7839_s14 + $0x3a0] sm:$0xff]  ;;  %v3163_v28 = vld [vmem:[%s7839_s14 + $0x398] sm:$0xff] }
 0x973   : > { %v4768_v2 = vcombine.high %v3160_v34, %v3164_v15  ;;  %v3167_v20 = vld [vmem:[%s7839_s14 + $0x3b8] sm:$0xff] }
 0x974   : > { %3001 = vmatprep.subr.bf16.mxu1 %v2975_v33  ;;  %v4774_v33 = vcombine.high %v3163_v28, %v3167_v20 }
 0x975   : > { %3002 = vmatpush1.bf16.msra.mxu1 %v2974_v7  ;;  %v4767_v7 = vcombine.low %v3160_v34, %v3164_v15  ;;  %v3113_v15 = vld [vmem:[%s7839_s14 + $0x208] sm:$0xff] }
 0x976   : > { %3816 = vmatprep.subr.bf16.mxu1 %v4656_v38  ;;  %v4773_v38 = vcombine.low %v3163_v28, %v3167_v20  ;;  %3973 = vmatprep.subr.bf16.mxu0 %v4774_v33  ;;  %v3125_v33 = vld [vmem:[%s7839_s14 + $0x268] sm:$0xff] }
 0x978   : > { %4654 = vmatmul.mubr.msk.bf16.vlgmr.msra.gmra.mrb[20].mxu1 %vm2995_vm5, %v5298_v44  ;;  %3974 = vmatpush1.bf16.msra.mxu0 %v4773_v38  ;;  %v4776_v44 = vcombine.high %v3168_v29, %v3172_v32  ;;  %v3129_v32 = vld [vmem:[%s7839_s14 + $0x288] sm:$0xff] }
 0x979   : > { %3817 = vmatpush1.bf16.msra.mxu1 %v4655_v53  ;;  %v3171_v53 = vld [vmem:[%s7839_s14 + $0x3d8] sm:$0xff] }
 0x97a   : > { %3818 = vmatprep.subr.bf16.mxu1 %v4664_v52  ;;  %v3175_v52 = vld [vmem:[%s7839_s14 + $0x3f8] sm:$0xff] }
 0x97b   : > { %v4782_v35 = vcombine.high %v3171_v53, %v3175_v52 }
 0x97d   : > { %3819 = vmatpush1.bf16.msra.mxu1 %v4663_v46  ;;  %v4781_v46 = vcombine.low %v3171_v53, %v3175_v52  ;;  %3975 = vmatprep.subr.bf16.mxu0 %v4782_v35  ;;  %v3141_v35 = vld [vmem:[%s7839_s14 + $0x2e8] sm:$0xff] }
 0x97e   : > { %3820 = vmatprep.subr.bf16.mxu1 %v4672_v59  ;;  %v3049_v59 = vld [vmem:[%s7839_s14 + $0x8] sm:$0xff] }
 0x97f   : > { %3976 = vmatpush1.bf16.msra.mxu0 %v4781_v46  ;;  %v4658_v62 = vcombine.high %v3049_v59, %v3053_v54 }
 0x981   : > { %3821 = vmatpush1.bf16.msra.mxu1 %v4671_v10  ;;  %v4657_v10 = vcombine.low %v3049_v59, %v3053_v54  ;;  %v3145_v54 = vld [vmem:[%s7839_s14 + $0x308] sm:$0xff] }
 0x982   : > { %3822 = vmatprep.subr.bf16.mxu1 %v4680_v8  ;;  %v2983_v8 = vpop.permute.xlu1 %2982 }
 0x985   : > { %3823 = vmatpush1.bf16.msra.mxu1 %v4679_v45 }
 0x986   : > { %3824 = vmatprep.subr.bf16.mxu1 %v4688_v21  ;;  %v2988_v21 = vpop.permute.xlu0 %2987 }
 0x989   : > { %3825 = vmatpush1.bf16.msra.mxu1 %v4687_v55 }
 0x98a   : > { %3826 = vmatprep.subr.bf16.mxu1 %v4696_v36 }
 0x98d   : > { %3827 = vmatpush1.bf16.msra.mxu1 %v4695_v60 }
 0x98e   : > { %3828 = vmatprep.subr.bf16.mxu1 %v4704_v25 }
 0x991   : > { %3829 = vmatpush1.bf16.msra.mxu1 %v4703_v26  ;;  %v3061_v26 = vld [vmem:[%s7839_s14 + $0x68] sm:$0xff] }
 0x992   : > { %3830 = vmatprep.subr.bf16.mxu1 %v4712_v3  ;;  %v4666_v47 = vcombine.high %v3057_v37, %v3061_v26  ;;  %v4665_v43 = vcombine.low %v3057_v37, %v3061_v26  ;;  %v3054_v37 = vld [vmem:[%s7839_s14 + $0x30] sm:$0xff] }
 0x995   : > { %3831 = vmatpush1.bf16.msra.mxu1 %v4711_v42  ;;  %v3065_v42 = vld [vmem:[%s7839_s14 + $0x88] sm:$0xff] }
 0x996   : > { %3832 = vmatprep.subr.bf16.mxu1 %v4720_v17  ;;  %v3069_v17 = vld [vmem:[%s7839_s14 + $0xa8] sm:$0xff] }
 0x997   : > { %v4674_v18 = vcombine.high %v3065_v42, %v3069_v17  ;;  %v4673_v56 = vcombine.low %v3065_v42, %v3069_v17  ;;  %v3058_v42 = vld [vmem:[%s7839_s14 + $0x50] sm:$0xff] }
 0x998   : > { %v3062_v17 = vld [vmem:[%s7839_s14 + $0x70] sm:$0xff] }
 0x999   : > { %3833 = vmatpush1.bf16.msra.mxu1 %v4719_v40  ;;  %v3073_v40 = vld [vmem:[%s7839_s14 + $0xc8] sm:$0xff] }
 0x99a   : > { %3834 = vmatprep.subr.bf16.mxu1 %v4728_v30  ;;  %v3077_v30 = vld [vmem:[%s7839_s14 + $0xe8] sm:$0xff] }
 0x99b   : > { %v4682_v61 = vcombine.high %v3073_v40, %v3077_v30  ;;  %v4681_v24 = vcombine.low %v3073_v40, %v3077_v30  ;;  %v3066_v40 = vld [vmem:[%s7839_s14 + $0x90] sm:$0xff] }
 0x99c   : > { %v3070_v30 = vld [vmem:[%s7839_s14 + $0xb0] sm:$0xff] }
 0x99d   : > { %3835 = vmatpush1.bf16.msra.mxu1 %v4727_v14  ;;  %v3081_v14 = vld [vmem:[%s7839_s14 + $0x108] sm:$0xff] }
 0x99e   : > { %3836 = vmatprep.subr.bf16.mxu1 %v4736_v9  ;;  %v3085_v9 = vld [vmem:[%s7839_s14 + $0x128] sm:$0xff] }
 0x99f   : > { %v4690_v0 = vcombine.high %v3081_v14, %v3085_v9  ;;  %v4689_v12 = vcombine.low %v3081_v14, %v3085_v9  ;;  %v3074_v14 = vld [vmem:[%s7839_s14 + $0xd0] sm:$0xff] }
 0x9a0   : > { %v3078_v9 = vld [vmem:[%s7839_s14 + $0xf0] sm:$0xff] }
 0x9a1   : > { %3837 = vmatpush1.bf16.msra.mxu1 %v4735_v63  ;;  %v3089_v63 = vld [vmem:[%s7839_s14 + $0x148] sm:$0xff] }
 0x9a2   : > { %3838 = vmatprep.subr.bf16.mxu1 %v4744_v50  ;;  %v3093_v50 = vld [vmem:[%s7839_s14 + $0x168] sm:$0xff] }
 0x9a3   : > { %v4698_v23 = vcombine.high %v3089_v63, %v3093_v50  ;;  %v4697_v19 = vcombine.low %v3089_v63, %v3093_v50  ;;  %v3082_v63 = vld [vmem:[%s7839_s14 + $0x110] sm:$0xff]  ;;  %v4683_v50 = vcombine.low %v3074_v14, %v3078_v9 }
 0x9a5   : > { %3839 = vmatpush1.bf16.msra.mxu1 %v4743_v1  ;;  %v3097_v1 = vld [vmem:[%s7839_s14 + $0x188] sm:$0xff] }
 0x9a6   : > { %3840 = vmatprep.subr.bf16.mxu1 %v4752_v22  ;;  %v3101_v22 = vld [vmem:[%s7839_s14 + $0x1a8] sm:$0xff] }
 0x9a7   : > { %v4706_v48 = vcombine.high %v3097_v1, %v3101_v22 }
 0x9a9   : > { %3841 = vmatpush1.bf16.msra.mxu1 %v4751_v4  ;;  %v3105_v4 = vld [vmem:[%s7839_s14 + $0x1c8] sm:$0xff] }
 0x9aa   : > { %3842 = vmatprep.subr.bf16.mxu1 %v4760_v11  ;;  %v3109_v11 = vld [vmem:[%s7839_s14 + $0x1e8] sm:$0xff] }
 0x9ab   : > { %v4714_v34 = vcombine.high %v3105_v4, %v3109_v11  ;;  %v4713_v28 = vcombine.low %v3105_v4, %v3109_v11  ;;  %v3102_v4 = vld [vmem:[%s7839_s14 + $0x1b0] sm:$0xff] }
 0x9ad   : > { %3843 = vmatpush1.bf16.msra.mxu1 %v4759_v39  ;;  %v4705_v39 = vcombine.low %v3097_v1, %v3101_v22  ;;  %v3094_v1 = vld [vmem:[%s7839_s14 + $0x170] sm:$0xff] }
 0x9ae   : > { %3844 = vmatprep.subr.bf16.mxu1 %v4768_v2  ;;  %v3117_v2 = vld [vmem:[%s7839_s14 + $0x228] sm:$0xff] }
 0x9af   : > { %v4722_v20 = vcombine.high %v3113_v15, %v3117_v2  ;;  %v4721_v38 = vcombine.low %v3113_v15, %v3117_v2  ;;  %v3110_v15 = vld [vmem:[%s7839_s14 + $0x1f0] sm:$0xff] }
 0x9b1   : > { %3845 = vmatpush1.bf16.msra.mxu1 %v4767_v7  ;;  %v3121_v7 = vld [vmem:[%s7839_s14 + $0x248] sm:$0xff] }
 0x9b2   : > { %3846 = vmatprep.subr.bf16.mxu1 %v4776_v44  ;;  %v4730_v29 = vcombine.high %v3121_v7, %v3125_v33  ;;  %v3133_v44 = vld [vmem:[%s7839_s14 + $0x2a8] sm:$0xff]  ;;  %v4729_v53 = vcombine.low %v3121_v7, %v3125_v33  ;;  %v3118_v7 = vld [vmem:[%s7839_s14 + $0x230] sm:$0xff] }
 0x9b3   : > { %v4738_v52 = vcombine.high %v3129_v32, %v3133_v44  ;;  %v4737_v46 = vcombine.low %v3129_v32, %v3133_v44  ;;  %v3126_v32 = vld [vmem:[%s7839_s14 + $0x270] sm:$0xff] }
 0x9b5   : > { %3847 = vmatpush1.bf16.msra.mxu1 %v4775_v49  ;;  %v3137_v49 = vld [vmem:[%s7839_s14 + $0x2c8] sm:$0xff] }
 0x9b6   : > { %3859 = vmatprep.subr.bf16.mxu1 %v4658_v62  ;;  %v4746_v59 = vcombine.high %v3137_v49, %v3141_v35  ;;  %v3149_v62 = vld [vmem:[%s7839_s14 + $0x328] sm:$0xff] }
 0xa4b   : > { %v3033_v41 = vpop.f32.mrb[20].mxu1 }
 0xa4c   : > { %v3034_v16 = vadd.f32 %v3033_v41, %v2983_v8  ;;  %v3035_v45 = vpop.f32.mrb[21].mxu1  ;;  %v3153_v41 = vld [vmem:[%s7839_s14 + $0x348] sm:$0xff] }
 0xa4d   : > { %v3036_v31 = vadd.f32 %v3035_v45, %v2983_v8  ;;  %v3037_v57 = vpop.f32.mrb[22].mxu1  ;;  %v4754_v8 = vcombine.high %v3145_v54, %v3149_v62  ;;  %v4753_v45 = vcombine.low %v3145_v54, %v3149_v62  ;;  %v3142_v54 = vld [vmem:[%s7839_s14 + $0x2f0] sm:$0xff] }
 0xa4e   : > { %v3038_v55 = vadd.f32 %v3037_v57, %v2988_v21  ;;  %v3039_v36 = vpop.f32.mrb[23].mxu1  ;;  %v3042_v5 = vmax.f32 %v3034_v16, 0.0  ;;  %v3157_v16 = vld [vmem:[%s7839_s14 + $0x368] sm:$0xff] }
 0xa4f   : > { %v3040_v58 = vadd.f32 %v3039_v36, %v2988_v21  ;;  %v3043_v25 = vmax.f32 %v3036_v31, 0.0  ;;  %v4762_v21 = vcombine.high %v3153_v41, %v3157_v16  ;;  %v3161_v31 = vld [vmem:[%s7839_s14 + $0x388] sm:$0xff] }
 0xa50   : > { %v3044_v60 = vmax.f32 %v3038_v55, 0.0  ;;  %v3165_v57 = vld [vmem:[%s7839_s14 + $0x3a8] sm:$0xff]  ;;  %v4761_v55 = vcombine.low %v3153_v41, %v3157_v16  ;;  %v3150_v41 = vld [vmem:[%s7839_s14 + $0x330] sm:$0xff] }
 0xa51   : > { %v3045_v51 = vmax.f32 %v3040_v58, 0.0  ;;  %v4770_v36 = vcombine.high %v3161_v31, %v3165_v57  ;;  %v3169_v58 = vld [vmem:[%s7839_s14 + $0x3c8] sm:$0xff] }
 0xa52   : > { %v7355_v3 = vpack.c.bf16 %v3044_v60, %v3042_v5  ;;  %v3173_v5 = vld [vmem:[%s7839_s14 + $0x3e8] sm:$0xff]  ;;  %v4769_v60 = vcombine.low %v3161_v31, %v3165_v57  ;;  %v3158_v31 = vld [vmem:[%s7839_s14 + $0x370] sm:$0xff] }
 0xa53   : > { %v7357_v27 = vpack.c.bf16 %v3045_v51, %v3043_v25  ;;  %v4778_v25 = vcombine.high %v3169_v58, %v3173_v5  ;;  %v3050_v51 = vld [vmem:[%s7839_s14 + $0x10] sm:$0xff]  ;;  %v4777_v26 = vcombine.low %v3169_v58, %v3173_v5 }
 0xa54   : > { %v3166_v58 = vld [vmem:[%s7839_s14 + $0x3b0] sm:$0xff] }
 0xa55   : > { %3848 = vmatprep.mubr.bf16.mxu1 %v7357_v27  ;;  %3977 = vmatprep.mubr.bf16.mxu0 %v7357_v27 }
 0xa56   : > { %3849 = vmatmul.mubr.bf16.vlgmr.msra.gmra.mrb[24].mxu1 %v7355_v3  ;;  %3978 = vmatmul.mubr.bf16.vlgmr.msra.gmra.mrb[12].mxu0 %v7355_v3 }
 0xa57   : > { %3860 = vmatpush1.bf16.msra.mxu1 %v4657_v10  ;;  %3891 = vmatprep.mubr.bf16.mxu1 %v7357_v27  ;;  %v4745_v10 = vcombine.low %v3137_v49, %v3141_v35  ;;  %v3134_v49 = vld [vmem:[%s7839_s14 + $0x2b0] sm:$0xff] }
 0xa58   : > { %3861 = vmatprep.subr.bf16.mxu1 %v4666_v47  ;;  %4329 = vmatprep.mubr.bf16.mxu0 %v5347_v6  ;;  %v4660_v47 = vcombine.high %v3050_v51, %v3054_v37 }
 0xa5b   : > { %3862 = vmatpush1.bf16.msra.mxu1 %v4665_v43  ;;  %v4659_v43 = vcombine.low %v3050_v51, %v3054_v37  ;;  %v3174_v51 = vld [vmem:[%s7839_s14 + $0x3f0] sm:$0xff] }
 0xa5c   : > { %3863 = vmatprep.subr.bf16.mxu1 %v4674_v18  ;;  %v4668_v18 = vcombine.high %v3058_v42, %v3062_v17 }
 0xa5f   : > { %3864 = vmatpush1.bf16.msra.mxu1 %v4673_v56  ;;  %v4667_v56 = vcombine.low %v3058_v42, %v3062_v17 }
 0xa60   : > { %3865 = vmatprep.subr.bf16.mxu1 %v4682_v61  ;;  %v4676_v61 = vcombine.high %v3066_v40, %v3070_v30 }
 0xa63   : > { %3866 = vmatpush1.bf16.msra.mxu1 %v4681_v24  ;;  %v4675_v24 = vcombine.low %v3066_v40, %v3070_v30 }
 0xa64   : > { %3867 = vmatprep.subr.bf16.mxu1 %v4690_v0  ;;  %v4684_v0 = vcombine.high %v3074_v14, %v3078_v9 }
 0xa67   : > { %3868 = vmatpush1.bf16.msra.mxu1 %v4689_v12 }
 0xa68   : > { %3869 = vmatprep.subr.bf16.mxu1 %v4698_v23  ;;  %v3090_v23 = vld [vmem:[%s7839_s14 + $0x150] sm:$0xff] }
 0xa69   : > { %v4699_v11 = vcombine.low %v3090_v23, %v3094_v1 }
 0xa6b   : > { %3870 = vmatpush1.bf16.msra.mxu1 %v4697_v19  ;;  %v4700_v19 = vcombine.high %v3090_v23, %v3094_v1 }
 0xa6c   : > { %3871 = vmatprep.subr.bf16.mxu1 %v4706_v48  ;;  %v3098_v48 = vld [vmem:[%s7839_s14 + $0x190] sm:$0xff] }
 0xa6d   : > { %v4707_v2 = vcombine.low %v3098_v48, %v3102_v4 }
 0xa6f   : > { %3872 = vmatpush1.bf16.msra.mxu1 %v4705_v39  ;;  %v4708_v39 = vcombine.high %v3098_v48, %v3102_v4 }
 0xa70   : > { %3873 = vmatprep.subr.bf16.mxu1 %v4714_v34  ;;  %v3106_v34 = vld [vmem:[%s7839_s14 + $0x1d0] sm:$0xff] }
 0xa71   : > { %v4715_v33 = vcombine.low %v3106_v34, %v3110_v15 }
 0xa73   : > { %3874 = vmatpush1.bf16.msra.mxu1 %v4713_v28  ;;  %v4716_v28 = vcombine.high %v3106_v34, %v3110_v15 }
 0xa74   : > { %3875 = vmatprep.subr.bf16.mxu1 %v4722_v20  ;;  %v3114_v20 = vld [vmem:[%s7839_s14 + $0x210] sm:$0xff] }
 0xa75   : > { %v4723_v44 = vcombine.low %v3114_v20, %v3118_v7 }
 0xa77   : > { %3876 = vmatpush1.bf16.msra.mxu1 %v4721_v38  ;;  %v4724_v38 = vcombine.high %v3114_v20, %v3118_v7 }
 0xa78   : > { %3877 = vmatprep.subr.bf16.mxu1 %v4730_v29  ;;  %v3122_v29 = vld [vmem:[%s7839_s14 + $0x250] sm:$0xff] }
 0xa79   : > { %v4731_v35 = vcombine.low %v3122_v29, %v3126_v32 }
 0xa7b   : > { %3878 = vmatpush1.bf16.msra.mxu1 %v4729_v53  ;;  %v4732_v53 = vcombine.high %v3122_v29, %v3126_v32 }
 0xa7c   : > { %3879 = vmatprep.subr.bf16.mxu1 %v4738_v52  ;;  %v3130_v52 = vld [vmem:[%s7839_s14 + $0x290] sm:$0xff] }
 0xa7d   : > { %v4739_v62 = vcombine.low %v3130_v52, %v3134_v49 }
 0xa7f   : > { %3880 = vmatpush1.bf16.msra.mxu1 %v4737_v46  ;;  %v4740_v46 = vcombine.high %v3130_v52, %v3134_v49 }
 0xa80   : > { %3881 = vmatprep.subr.bf16.mxu1 %v4746_v59  ;;  %v3138_v59 = vld [vmem:[%s7839_s14 + $0x2d0] sm:$0xff] }
 0xa81   : > { %v4747_v16 = vcombine.low %v3138_v59, %v3142_v54 }
 0xa83   : > { %3882 = vmatpush1.bf16.msra.mxu1 %v4745_v10  ;;  %v4748_v10 = vcombine.high %v3138_v59, %v3142_v54 }
 0xa84   : > { %3883 = vmatprep.subr.bf16.mxu1 %v4754_v8  ;;  %v3146_v8 = vld [vmem:[%s7839_s14 + $0x310] sm:$0xff] }
 0xa85   : > { %v4755_v57 = vcombine.low %v3146_v8, %v3150_v41 }
 0xa87   : > { %3884 = vmatpush1.bf16.msra.mxu1 %v4753_v45  ;;  %v4756_v45 = vcombine.high %v3146_v8, %v3150_v41 }
 0xa88   : > { %3885 = vmatprep.subr.bf16.mxu1 %v4762_v21  ;;  %v3154_v21 = vld [vmem:[%s7839_s14 + $0x350] sm:$0xff] }
 0xa89   : > { %v4763_v5 = vcombine.low %v3154_v21, %v3158_v31 }
 0xa8b   : > { %3886 = vmatpush1.bf16.msra.mxu1 %v4761_v55  ;;  %v4764_v55 = vcombine.high %v3154_v21, %v3158_v31 }
 0xa8c   : > { %3887 = vmatprep.subr.bf16.mxu1 %v4770_v36  ;;  %v3162_v36 = vld [vmem:[%s7839_s14 + $0x390] sm:$0xff] }
 0xa8d   : > { %v4771_v37 = vcombine.low %v3162_v36, %v3166_v58 }
 0xa8f   : > { %3888 = vmatpush1.bf16.msra.mxu1 %v4769_v60  ;;  %v4772_v60 = vcombine.high %v3162_v36, %v3166_v58 }
 0xa90   : > { %3889 = vmatprep.subr.bf16.mxu1 %v4778_v25  ;;  %v3170_v25 = vld [vmem:[%s7839_s14 + $0x3d0] sm:$0xff] }
 0xa93   : > { %3890 = vmatpush1.bf16.msra.mxu1 %v4777_v26  ;;  %v4780_v26 = vcombine.high %v3170_v25, %v3174_v51 }
 0xa94   : > { %3902 = vmatprep.subr.bf16.mxu1 %v4660_v47  ;;  %v4779_v47 = vcombine.low %v3170_v25, %v3174_v51 }
 0xa96   : > { %3892 = vmatmul.mubr.bf16.vlgmr.msra.gmra.mrb[28].mxu1 %v7355_v3 }
 0xa97   : > { %3903 = vmatpush1.bf16.msra.mxu1 %v4659_v43  ;;  %3934 = vmatprep.mubr.bf16.mxu1 %v7357_v27  ;;  %v3086_v27 = vld [vmem:[%s7839_s14 + $0x130] sm:$0xff] }
 0xa98   : > { %3904 = vmatprep.subr.bf16.mxu1 %v4668_v18  ;;  %v4692_v12 = vcombine.high %v3082_v63, %v3086_v27  ;;  %v4691_v22 = vcombine.low %v3082_v63, %v3086_v27 }
 0xa9b   : > { %3905 = vmatpush1.bf16.msra.mxu1 %v4667_v56 }
 0xa9c   : > { %3906 = vmatprep.subr.bf16.mxu1 %v4676_v61 }
 0xa9f   : > { %3907 = vmatpush1.bf16.msra.mxu1 %v4675_v24 }
 0xaa0   : > { %3908 = vmatprep.subr.bf16.mxu1 %v4684_v0 }
 0xaa3   : > { %3909 = vmatpush1.bf16.msra.mxu1 %v4683_v50 }
 0xaa4   : > { %3910 = vmatprep.subr.bf16.mxu1 %v4692_v12 }
 0xaa7   : > { %3911 = vmatpush1.bf16.msra.mxu1 %v4691_v22 }
 0xaa8   : > { %3912 = vmatprep.subr.bf16.mxu1 %v4700_v19 }
 0xaab   : > { %3913 = vmatpush1.bf16.msra.mxu1 %v4699_v11 }
 0xaac   : > { %3914 = vmatprep.subr.bf16.mxu1 %v4708_v39 }
 0xaaf   : > { %3915 = vmatpush1.bf16.msra.mxu1 %v4707_v2 }
 0xab0   : > { %3916 = vmatprep.subr.bf16.mxu1 %v4716_v28 }
 0xab3   : > { %3917 = vmatpush1.bf16.msra.mxu1 %v4715_v33 }
 0xab4   : > { %3918 = vmatprep.subr.bf16.mxu1 %v4724_v38 }
 0xab7   : > { %3919 = vmatpush1.bf16.msra.mxu1 %v4723_v44 }
 0xab8   : > { %3920 = vmatprep.subr.bf16.mxu1 %v4732_v53 }
 0xabb   : > { %3921 = vmatpush1.bf16.msra.mxu1 %v4731_v35 }
 0xabc   : > { %3922 = vmatprep.subr.bf16.mxu1 %v4740_v46 }
 0xabf   : > { %3923 = vmatpush1.bf16.msra.mxu1 %v4739_v62 }
 0xac0   : > { %3924 = vmatprep.subr.bf16.mxu1 %v4748_v10 }
 0xac3   : > { %3925 = vmatpush1.bf16.msra.mxu1 %v4747_v16 }
 0xac4   : > { %3926 = vmatprep.subr.bf16.mxu1 %v4756_v45 }
 0xac7   : > { %3927 = vmatpush1.bf16.msra.mxu1 %v4755_v57 }
 0xac8   : > { %3928 = vmatprep.subr.bf16.mxu1 %v4764_v55 }
 0xacb   : > { %3929 = vmatpush1.bf16.msra.mxu1 %v4763_v5 }
 0xacc   : > { %3930 = vmatprep.subr.bf16.mxu1 %v4772_v60 }
 0xacf   : > { %3931 = vmatpush1.bf16.msra.mxu1 %v4771_v37 }
 0xad0   : > { %3932 = vmatprep.subr.bf16.mxu1 %v4780_v26 }
 0xad3   : > { %3933 = vmatpush1.bf16.msra.mxu1 %v4779_v47 }
 0xad6   : > { %3935 = vmatmul.mubr.bf16.vlgmr.msra.gmra.mrb[32].mxu1 %v7355_v3 }
 0xad7   : > { %4206 = vmatprep.mubr.bf16.mxu1 %v5347_v6 }
 0xb29   : > { %v3850_v42 = vpop.f32.mrb[24].mxu1  ;;  %v3979_v17 = vpop.f32.mrb[12].mxu0 }
 0xb2a   : > { %v3852_v43 = vpop.f32.mrb[25].mxu1  ;;  %v3981_v18 = vpop.f32.mrb[13].mxu0 }
 0xb2b   : > { %v3854_v40 = vpop.f32.mrb[26].mxu1  ;;  %v3983_v30 = vpop.f32.mrb[14].mxu0 }
 0xb2c   : > { %v4980_v56 = vpack.i.bf16 %v3854_v40, %v3850_v42  ;;  %v4132_v61 = vpack.c.bf16 %v3854_v40, %v3850_v42  ;;  %v3856_v14 = vpop.f32.mrb[27].mxu1  ;;  %v3985_v9 = vpop.f32.mrb[15].mxu0  ;;  %v7549_v24 = vpack.i.bf16 %v3983_v30, %v3979_v17  ;;  %v4138_v0 = vpack.c.bf16 %v3983_v30, %v3979_v17 }
 0xb2d   : > { %v4990_v63 = vpack.i.bf16 %v3856_v14, %v3852_v43  ;;  %v4995_v27 = vpack.i.bf16 %v3985_v9, %v3981_v18  ;;  %v4133_v3 = vpack.c.bf16 %v3856_v14, %v3852_v43  ;;  %v4139_v50 = vpack.c.bf16 %v3985_v9, %v3981_v18 }
 0xb2e   : > { %4961 = vrot.lane.b32.xlu0 %v4980_v56, %s7847_s24  ;;  %4956 = vrot.lane.b32.xlu1 %v4980_v56, %s5343_s27 }
 0xb2f   : > { %4174 = vmatprep.subr.bf16.mxu1 %v4133_v3  ;;  %4297 = vmatprep.subr.bf16.mxu0 %v4139_v50 }
 0xb30   : > { %4175 = vmatpush1.bf16.msra.mxu1 %v4132_v61  ;;  %4298 = vmatpush1.bf16.msra.mxu0 %v4138_v0 }
 0xb32   : > { %4971 = vrot.lane.b32.xlu1 %v4995_v27, %s5343_s27  ;;  %4966 = vrot.lane.b32.xlu0 %v4990_v63, %s5343_s27 }
 0xb36   : > { %4976 = vrot.lane.b32.xlu1 %v4990_v63, %s7847_s24  ;;  %4986 = vrot.lane.b32.xlu0 %v4995_v27, %s7847_s24 }
 0xb3a   : > { %4981 = vrot.lane.b32.xlu1 %v4980_v56, %s7848_s29  ;;  %4991 = vrot.lane.b32.xlu0 %v4990_v63, %s7848_s29 }
 0xb3e   : > { %4996 = vrot.lane.b32.xlu1 %v4995_v27, %s7848_s29  ;;  %5001 = vrot.lane.b32.xlu0 %v7549_v24, %s5343_s27 }
 0xb69   : > { %v7562_v12 = vpop.f32.mrb[28].mxu1 }
 0xb6a   : > { %v7564_v23 = vpop.f32.mrb[29].mxu1 }
 0xb6b   : > { %v7566_v1 = vpop.f32.mrb[30].mxu1 }
 0xb6c   : > { %v5015_v22 = vpack.i.bf16 %v7566_v1, %v7562_v12  ;;  %v4134_v19 = vpack.c.bf16 %v7566_v1, %v7562_v12  ;;  %v7572_v48 = vpop.f32.mrb[31].mxu1 }
 0xb6d   : > { %v5030_v4 = vpack.i.bf16 %v7572_v48, %v7564_v23  ;;  %v4135_v11 = vpack.c.bf16 %v7572_v48, %v7564_v23 }
 0xb6e   : > { %5006 = vrot.lane.b32.xlu0 %v5015_v22, %s5343_s27 }
 0xb6f   : > { %5021 = vrot.lane.b32.xlu1 %v5030_v4, %s5343_s27 }
 0xb72   : > { %5011 = vrot.lane.b32.xlu0 %v5015_v22, %s7847_s24 }
 0xb73   : > { %5026 = vrot.lane.b32.xlu1 %v5030_v4, %s7847_s24 }
 0xb76   : > { %5016 = vrot.lane.b32.xlu0 %v5015_v22, %s7848_s29 }
 0xb77   : > { %5031 = vrot.lane.b32.xlu1 %v5030_v4, %s7848_s29 }
 0xba0   : > { %v4962_v39 = vpop.permute.xlu0 %4961  ;;  %v4957_v34 = vpop.permute.xlu1 %4956 }
 0xba1   : > { %v4959_v15 = vunpack.i.h.bf16 %v4957_v34  ;;  %v4958_v2 = vunpack.i.l.bf16 %v4957_v34  ;;  %v4964_v49 = vunpack.i.h.bf16 %v4962_v39  ;;  %v4963_v35 = vunpack.i.l.bf16 %v4962_v39 }
 0xba4   : > { %v7584_v28 = vpop.permute.xlu1 %4971  ;;  %v7586_v20 = vpop.permute.xlu0 %4966 }
 0xba5   : > { %v4974_v7 = vunpack.i.h.bf16 %v7584_v28  ;;  %v4973_v33 = vunpack.i.l.bf16 %v7584_v28  ;;  %v4969_v38 = vunpack.i.h.bf16 %v7586_v20  ;;  %v4968_v29 = vunpack.i.l.bf16 %v7586_v20  ;;  %v7688_v28 = vld [vmem:[%s7832_s7] sm:$0x3] }
 0xba7   : > { %v4034_v32 = vsel %vm733_vm3, %v4973_v33, %v4958_v2  ;;  %v4035_v44 = vsel %vm733_vm3, %v4974_v7, %v4959_v15  ;;  %v4032_v53 = vsel %vm733_vm3, %v4958_v2, %v4968_v29  ;;  %v4033_v52 = vsel %vm733_vm3, %v4959_v15, %v4969_v38 }
 0xba8   : > { %v4140_v46 = vpack.c.bf16 %v4035_v44, %v4034_v32  ;;  %v7604_v59 = vpop.permute.xlu1 %4976  ;;  %v7606_v54 = vpop.permute.xlu0 %4986  ;;  %v4141_v62 = vpack.c.bf16 %v4033_v52, %v4032_v53 }
 0xba9   : > { %v4979_v10 = vunpack.i.h.bf16 %v7604_v59  ;;  %v4978_v8 = vunpack.i.l.bf16 %v7604_v59  ;;  %v4989_v41 = vunpack.i.h.bf16 %v7606_v54  ;;  %v4988_v16 = vunpack.i.l.bf16 %v7606_v54  ;;  %v7612_v45 = vpop.f32.mrb[32].mxu1 }
 0xbaa   : > { %v7614_v21 = vpop.f32.mrb[33].mxu1  ;;  %4176 = vmatprep.subr.bf16.mxu1 %v4141_v62 }
 0xbab   : > { %v4083_v31 = vsel %vm603_vm1, %v4989_v41, %v4964_v49  ;;  %v4082_v57 = vsel %vm603_vm1, %v4988_v16, %v4963_v35  ;;  %v7624_v55 = vpop.f32.mrb[34].mxu1  ;;  %4177 = vmatpush1.bf16.msra.mxu1 %v4140_v46  ;;  %v4080_v36 = vsel %vm603_vm1, %v4963_v35, %v4978_v8  ;;  %v4081_v58 = vsel %vm603_vm1, %v4964_v49, %v4979_v10 }
 0xbac   : > { %v4148_v5 = vpack.c.bf16 %v4083_v31, %v4082_v57  ;;  %v5055_v60 = vpack.i.bf16 %v7624_v55, %v7612_v45  ;;  %v7636_v25 = vpop.f32.mrb[35].mxu1  ;;  %v4982_v51 = vpop.permute.xlu1 %4981  ;;  %v4136_v37 = vpack.c.bf16 %v7624_v55, %v7612_v45  ;;  %v4149_v40 = vpack.c.bf16 %v4081_v58, %v4080_v36 }
 0xbad   : > { %v5065_v26 = vpack.i.bf16 %v7636_v25, %v7614_v21  ;;  %v7642_v47 = vpop.permute.xlu0 %4991  ;;  %v4984_v42 = vunpack.i.h.bf16 %v4982_v51  ;;  %v4983_v17 = vunpack.i.l.bf16 %v4982_v51  ;;  %v4137_v30 = vpack.c.bf16 %v7636_v25, %v7614_v21 }
 0xbae   : > { %v4994_v43 = vunpack.i.h.bf16 %v7642_v47  ;;  %v4993_v18 = vunpack.i.l.bf16 %v7642_v47  ;;  %5041 = vrot.lane.b32.xlu1 %v5055_v60, %s7847_s24  ;;  %5036 = vrot.lane.b32.xlu0 %v5055_v60, %s5343_s27 }
 0xbaf   : > { %4178 = vmatprep.subr.bf16.mxu1 %v4149_v40 }
 0xbb0   : > { %v7650_v56 = vpop.permute.xlu1 %4996  ;;  %v4128_v61 = vsel %vm538_vm0, %v4983_v17, %v4993_v18  ;;  %v4129_v14 = vsel %vm538_vm0, %v4984_v42, %v4994_v43  ;;  %4179 = vmatpush1.bf16.msra.mxu1 %v4148_v5 }
 0xbb1   : > { %v4999_v9 = vunpack.i.h.bf16 %v7650_v56  ;;  %v4998_v0 = vunpack.i.l.bf16 %v7650_v56  ;;  %v7662_v63 = vpop.permute.xlu0 %5001  ;;  %v4157_v27 = vpack.c.bf16 %v4129_v14, %v4128_v61 }
 0xbb2   : > { %v5004_v3 = vunpack.i.h.bf16 %v7662_v63  ;;  %v5003_v50 = vunpack.i.l.bf16 %v7662_v63  ;;  %5056 = vrot.lane.b32.xlu0 %v5055_v60, %s7848_s29  ;;  %5046 = vrot.lane.b32.xlu1 %v5065_v26, %s5343_s27 }
 0xbb3   : > { %v4130_v22 = vsel %vm538_vm0, %v4998_v0, %v4983_v17  ;;  %v4131_v4 = vsel %vm538_vm0, %v4999_v9, %v4984_v42  ;;  %4180 = vmatprep.subr.bf16.mxu1 %v4157_v27 }
 0xbb4   : > { %v4156_v39 = vpack.c.bf16 %v4131_v4, %v4130_v22  ;;  %v4020_v34 = vsel %vm733_vm3, %v5003_v50, %v4973_v33  ;;  %v4021_v15 = vsel %vm733_vm3, %v5004_v3, %v4974_v7  ;;  %v4165_v7 = vld [vmem:[%s7833_s8] sm:$0x7] }
 0xbb5   : > { %v4147_v2 = vpack.c.bf16 %v4021_v15, %v4020_v34 }
 0xbb6   : > { %5061 = vrot.lane.b32.xlu0 %v5065_v26, %s7847_s24  ;;  %4181 = vmatpush1.bf16.msra.mxu1 %v4156_v39 }
 0xbb7   : > { %5051 = vrot.lane.b32.xlu1 %v7549_v24, %s7847_s24  ;;  %4299 = vmatprep.subr.bf16.mxu0 %v4147_v2 }
 0xbb8   : > { %4215 = vmatprep.subr.bf16.mxu1 %v4135_v11 }
 0xbb9   : > { %4783 = vmatmul.mubr.msk.bf16.vlgmr.msra.gmra.mrb[36].mxu1 %vm2909_vm4, %v7688_v28 }
 0xbba   : > { %5071 = vrot.lane.b32.xlu0 %v7549_v24, %s7848_s29  ;;  %4216 = vmatpush1.bf16.msra.mxu1 %v4134_v19 }
 0xbbb   : > { %5066 = vrot.lane.b32.xlu1 %v5065_v26, %s7848_s29  ;;  %4247 = vmatprep.mubr.bf16.mxu1 %v5347_v6 }
 0xbbf   : > { %4168 = vperm.xlu1 %4849, %v4165_v7  }
 0xbe0   : > { %v5007_v23 = vpop.permute.xlu0 %5006 }
 0xbe1   : > { %v5009_v48 = vunpack.i.h.bf16 %v5007_v23  ;;  %v5008_v11 = vunpack.i.l.bf16 %v5007_v23  ;;  %v5022_v33 = vpop.permute.xlu1 %5021 }
 0xbe2   : > { %v5024_v32 = vunpack.i.h.bf16 %v5022_v33  ;;  %v5023_v44 = vunpack.i.l.bf16 %v5022_v33 }
 0xbe3   : > { %v4031_v24 = vsel %vm733_vm3, %v4969_v38, %v5009_v48  ;;  %v4030_v12 = vsel %vm733_vm3, %v4968_v29, %v5008_v11 }
 0xbe4   : > { %v5012_v1 = vpop.permute.xlu0 %5011  ;;  %v4028_v19 = vsel %vm733_vm3, %v5008_v11, %v5023_v44  ;;  %v4029_v53 = vsel %vm733_vm3, %v5009_v48, %v5024_v32  ;;  %v4142_v62 = vpack.c.bf16 %v4031_v24, %v4030_v12 }
 0xbe5   : > { %v5014_v52 = vunpack.i.h.bf16 %v5012_v1  ;;  %v5013_v49 = vunpack.i.l.bf16 %v5012_v1  ;;  %v5027_v35 = vpop.permute.xlu1 %5026  ;;  %v4143_v46 = vpack.c.bf16 %v4029_v53, %v4028_v19 }
 0xbe6   : > { %v5029_v31 = vunpack.i.h.bf16 %v5027_v35  ;;  %v5028_v57 = vunpack.i.l.bf16 %v5027_v35 }
 0xbe7   : > { %v4079_v20 = vsel %vm603_vm1, %v4979_v10, %v5014_v52  ;;  %v4078_v38 = vsel %vm603_vm1, %v4978_v8, %v5013_v49  ;;  %4217 = vmatprep.subr.bf16.mxu1 %v4143_v46 }
 0xbe8   : > { %v5017_v29 = vpop.permute.xlu0 %5016  ;;  %4218 = vmatpush1.bf16.msra.mxu1 %v4142_v62  ;;  %v4076_v36 = vsel %vm603_vm1, %v5013_v49, %v5028_v57  ;;  %v4077_v58 = vsel %vm603_vm1, %v5014_v52, %v5029_v31  ;;  %v4150_v42 = vpack.c.bf16 %v4079_v20, %v4078_v38 }
 0xbe9   : > { %v5019_v5 = vunpack.i.h.bf16 %v5017_v29  ;;  %v5018_v60 = vunpack.i.l.bf16 %v5017_v29  ;;  %v5032_v51 = vpop.permute.xlu1 %5031  ;;  %v4151_v26 = vpack.c.bf16 %v4077_v58, %v4076_v36 }
 0xbea   : > { %v5034_v10 = vunpack.i.h.bf16 %v5032_v51  ;;  %v5033_v17 = vunpack.i.l.bf16 %v5032_v51 }
 0xbeb   : > { %v4127_v59 = vsel %vm538_vm0, %v4994_v43, %v5019_v5  ;;  %v4126_v8 = vsel %vm538_vm0, %v4993_v18, %v5018_v60  ;;  %4219 = vmatprep.subr.bf16.mxu1 %v4151_v26 }
 0xbec   : > { %4220 = vmatpush1.bf16.msra.mxu1 %v4150_v42  ;;  %v4124_v40 = vsel %vm538_vm0, %v5018_v60, %v5033_v17  ;;  %v4125_v61 = vsel %vm538_vm0, %v5019_v5, %v5034_v10  ;;  %v4158_v27 = vpack.c.bf16 %v4127_v59, %v4126_v8 }
 0xbed   : > { %v4159_v14 = vpack.c.bf16 %v4125_v61, %v4124_v40 }
 0xbef   : > { %4221 = vmatprep.subr.bf16.mxu1 %v4159_v14 }
 0xbf0   : > { %4222 = vmatpush1.bf16.msra.mxu1 %v4158_v27 }
 0xbf1   : > { %4256 = vmatprep.subr.bf16.mxu1 %v4137_v30 }
 0xbf3   : > { %4784 = vmatmul.mubr.msk.bf16.vlgmr.msra.gmra.mrb[40].mxu1 %vm2909_vm4, %v7688_v28 }
 0xbf4   : > { %4257 = vmatpush1.bf16.msra.mxu1 %v4136_v37  ;;  %4288 = vmatprep.mubr.bf16.mxu1 %v5347_v6 }
 0xc20   : > { %v5042_v47 = vpop.permute.xlu1 %5041  ;;  %v5037_v43 = vpop.permute.xlu0 %5036 }
 0xc21   : > { %v5044_v18 = vunpack.i.h.bf16 %v5042_v47  ;;  %v5043_v22 = vunpack.i.l.bf16 %v5042_v47  ;;  %v5039_v4 = vunpack.i.h.bf16 %v5037_v43  ;;  %v5038_v39 = vunpack.i.l.bf16 %v5037_v43 }
 0xc23   : > { %v4075_v34 = vsel %vm603_vm1, %v5029_v31, %v5044_v18  ;;  %v4074_v21 = vsel %vm603_vm1, %v5028_v57, %v5043_v22  ;;  %v4027_v25 = vsel %vm733_vm3, %v5024_v32, %v5039_v4  ;;  %v4026_v45 = vsel %vm733_vm3, %v5023_v44, %v5038_v39 }
 0xc24   : > { %v4152_v55 = vpack.c.bf16 %v4075_v34, %v4074_v21  ;;  %v4144_v6 = vpack.c.bf16 %v4027_v25, %v4026_v45  ;;  %v5057_v37 = vpop.permute.xlu0 %5056  ;;  %v5047_v2 = vpop.permute.xlu1 %5046 }
 0xc25   : > { %v5059_v30 = vunpack.i.h.bf16 %v5057_v37  ;;  %v5058_v15 = vunpack.i.l.bf16 %v5057_v37  ;;  %v5049_v7 = vunpack.i.h.bf16 %v5047_v2  ;;  %v5048_v23 = vunpack.i.l.bf16 %v5047_v2 }
 0xc27   : > { %v4123_v48 = vsel %vm538_vm0, %v5034_v10, %v5059_v30  ;;  %v4122_v11 = vsel %vm538_vm0, %v5033_v17, %v5058_v15  ;;  %v4023_v32 = vsel %vm733_vm3, %v5049_v7, %v5004_v3  ;;  %v4022_v44 = vsel %vm733_vm3, %v5048_v23, %v5003_v50 }
 0xc28   : > { %v4160_v33 = vpack.c.bf16 %v4123_v48, %v4122_v11  ;;  %v5062_v24 = vpop.permute.xlu0 %5061  ;;  %v4024_v12 = vsel %vm733_vm3, %v5038_v39, %v5048_v23  ;;  %v4146_v1 = vpack.c.bf16 %v4023_v32, %v4022_v44  ;;  %v4025_v49 = vsel %vm733_vm3, %v5039_v4, %v5049_v7 }
 0xc29   : > { %v5064_v19 = vunpack.i.h.bf16 %v5062_v24  ;;  %v5063_v53 = vunpack.i.l.bf16 %v5062_v24  ;;  %v5052_v52 = vpop.permute.xlu1 %5051  ;;  %v4145_v62 = vpack.c.bf16 %v4025_v49, %v4024_v12 }
 0xc2a   : > { %v5054_v35 = vunpack.i.h.bf16 %v5052_v52  ;;  %v5053_v46 = vunpack.i.l.bf16 %v5052_v52  ;;  %4300 = vmatpush1.bf16.msra.mxu0 %v4146_v1 }
 0xc2b   : > { %v4072_v63 = vsel %vm603_vm1, %v5043_v22, %v5063_v53  ;;  %v4073_v3 = vsel %vm603_vm1, %v5044_v18, %v5064_v19  ;;  %4258 = vmatprep.subr.bf16.mxu1 %v4145_v62 }
 0xc2c   : > { %v4071_v50 = vsel %vm603_vm1, %v5064_v19, %v5054_v35  ;;  %v4070_v31 = vsel %vm603_vm1, %v5063_v53, %v5053_v46  ;;  %v5072_v57 = vpop.permute.xlu0 %5071  ;;  %v4153_v20 = vpack.c.bf16 %v4073_v3, %v4072_v63  ;;  %v4068_v38 = vsel %vm603_vm1, %v5053_v46, %v4988_v16  ;;  %4259 = vmatpush1.bf16.msra.mxu1 %v4144_v6 }
 0xc2d   : > { %v4154_v29 = vpack.c.bf16 %v4071_v50, %v4070_v31  ;;  %v5074_v36 = vunpack.i.h.bf16 %v5072_v57  ;;  %v5073_v58 = vunpack.i.l.bf16 %v5072_v57  ;;  %v5067_v5 = vpop.permute.xlu1 %5066  ;;  %v4069_v60 = vsel %vm603_vm1, %v5054_v35, %v4989_v41 }
 0xc2e   : > { %v5069_v51 = vunpack.i.h.bf16 %v5067_v5  ;;  %v5068_v26 = vunpack.i.l.bf16 %v5067_v5  ;;  %4260 = vmatprep.subr.bf16.mxu1 %v4153_v20  ;;  %v4155_v42 = vpack.c.bf16 %v4069_v60, %v4068_v38 }
 0xc2f   : > { %v4116_v10 = vsel %vm538_vm0, %v5073_v58, %v4998_v0  ;;  %v4117_v16 = vsel %vm538_vm0, %v5074_v36, %v4999_v9 }
 0xc30   : > { %v4119_v54 = vsel %vm538_vm0, %v5069_v51, %v5074_v36  ;;  %v4118_v41 = vsel %vm538_vm0, %v5068_v26, %v5073_v58  ;;  %4301 = vmatprep.subr.bf16.mxu0 %v4155_v42  ;;  %v4120_v17 = vsel %vm538_vm0, %v5058_v15, %v5068_v26  ;;  %v4121_v59 = vsel %vm538_vm0, %v5059_v30, %v5069_v51 }
 0xc31   : > { %v4162_v8 = vpack.c.bf16 %v4119_v54, %v4118_v41  ;;  %4261 = vmatpush1.bf16.msra.mxu1 %v4152_v55  ;;  %4302 = vmatpush1.bf16.msra.mxu0 %v4154_v29  ;;  %v4161_v56 = vpack.c.bf16 %v4121_v59, %v4120_v17  ;;  %v4163_v0 = vpack.c.bf16 %v4117_v16, %v4116_v10 }
 0xc33   : > { %4262 = vmatprep.subr.bf16.mxu1 %v4161_v56  ;;  %4303 = vmatprep.subr.bf16.mxu0 %v4163_v0 }
 0xc35   : > { %4263 = vmatpush1.bf16.msra.mxu1 %v4160_v33  ;;  %4304 = vmatpush1.bf16.msra.mxu0 %v4162_v8 }
 0xc38   : > { %4785 = vmatmul.mubr.msk.bf16.vlgmr.msra.gmra.mrb[44].mxu1 %vm2909_vm4, %v7688_v28  ;;  %4786 = vmatmul.mubr.msk.bf16.vlgmr.msra.gmra.mrb[16].mxu0 %vm2909_vm4, %v7688_v28 }
 0xc3e   : > { %v4169_v9 = vpop.permute.xlu1 %4168 }
 0xc8c   : > { %v4208_v40 = vpop.f32.mrb[36].mxu1 }
 0xc8d   : > { %v4209_v61 = vadd.f32 %v4208_v40, %v4169_v9  ;;  %v4210_v13 = vpop.f32.mrb[37].mxu1 }
 0xc8e   : > { %v4211_v14 = vadd.f32 %v4210_v13, %v4169_v9  ;;  %v4212_v27 = vpop.f32.mrb[38].mxu1 }
 0xc8f   : > { %v4338_v47 = vsub.f32 0.0, %v4209_v61  ;;  %v4213_v43 = vpop.f32.mrb[39].mxu1 }
 0xc90   : > { %v4339_v18 = vsub.f32 0.0, %v4211_v14 }
 0xc91   : > { %v4346_v22 = vmul.f32 1.442695, %v4338_v47 }
 0xc92   : > { %v4348_v4 = vmul.f32 1.442695, %v4339_v18 }
 0xc93   : > { %5299 = vpow2.f32 %v4346_v22 }
 0xc94   : > { %5301 = vpow2.f32 %v4348_v4 }
 0xc9d   : > { %v5300_v39 = vpop.eup %5299 }
 0xc9e   : > { %v5302_v34 = vpop.eup %5301  ;;  %v4362_v21 = vadd.f32 1.0, %v5300_v39 }
 0xc9f   : > { %v4363_v25 = vadd.f32 1.0, %v5302_v34 }
 0xca0   : > { %5303 = vrcp.f32 %v4362_v21 }
 0xca1   : > { %5305 = vrcp.f32 %v4363_v25 }
 0xcaa   : > { %v5304_v28 = vpop.eup %5303 }
 0xcab   : > { %v5306_v45 = vpop.eup %5305  ;;  %v4378_v55 = vmax.f32 %v5304_v28, 0.0 }
 0xcac   : > { %v4379_v6 = vmax.f32 %v5306_v45, 0.0 }
 0xcad   : > { %v4386_v37 = vmin.f32 %v4378_v55, 1.0 }
 0xcae   : > { %v4387_v30 = vmin.f32 %v4379_v6, 1.0 }
 0xcb0   : > { %v4402_v15 = vcombine.low %v4386_v37, %v4387_v30 }
 0xcb2   : > { %4410 = vst [vmem:[%s7816_s16] sm:$0x77] %v4402_v15 }
 0xcc6   : > { %v4249_v2 = vpop.f32.mrb[40].mxu1 }
 0xcc7   : > { %v4250_v7 = vadd.f32 %v4249_v2, %v4169_v9  ;;  %v4251_v23 = vpop.f32.mrb[41].mxu1 }
 0xcc8   : > { %v4252_v48 = vadd.f32 %v4251_v23, %v4169_v9  ;;  %v4253_v11 = vpop.f32.mrb[42].mxu1 }
 0xcc9   : > { %v4340_v33 = vsub.f32 0.0, %v4250_v7  ;;  %v4254_v32 = vpop.f32.mrb[43].mxu1 }
 0xcca   : > { %v4341_v44 = vsub.f32 0.0, %v4252_v48 }
 0xccb   : > { %v4350_v24 = vmul.f32 1.442695, %v4340_v33 }
 0xccc   : > { %v4352_v12 = vmul.f32 1.442695, %v4341_v44 }
 0xccd   : > { %5307 = vpow2.f32 %v4350_v24 }
 0xcce   : > { %5309 = vpow2.f32 %v4352_v12 }
 0xcd7   : > { %v5308_v1 = vpop.eup %5307 }
 0xcd8   : > { %v5310_v19 = vpop.eup %5309  ;;  %v4364_v53 = vadd.f32 1.0, %v5308_v1 }
 0xcd9   : > { %v4365_v52 = vadd.f32 1.0, %v5310_v19 }
 0xcda   : > { %5311 = vrcp.f32 %v4364_v53 }
 0xcdb   : > { %5313 = vrcp.f32 %v4365_v52 }
 0xce4   : > { %v5312_v49 = vpop.eup %5311 }
 0xce5   : > { %v5314_v35 = vpop.eup %5313  ;;  %v4380_v46 = vmax.f32 %v5312_v49, 0.0 }
 0xce6   : > { %v4381_v62 = vmax.f32 %v5314_v35, 0.0 }
 0xce7   : > { %v4388_v63 = vmin.f32 %v4380_v46, 1.0 }
 0xce8   : > { %v4389_v3 = vmin.f32 %v4381_v62, 1.0 }
 0xcea   : > { %v4403_v50 = vcombine.low %v4388_v63, %v4389_v3 }
 0xcec   : > { %4411 = vst [vmem:[%s7816_s16 + $0x8] sm:$0x77] %v4403_v50 }
 0xd0b   : > { %v4290_v31 = vpop.f32.mrb[44].mxu1  ;;  %v4331_v57 = vpop.f32.mrb[16].mxu0 }
 0xd0c   : > { %v4291_v20 = vadd.f32 %v4290_v31, %v4169_v9  ;;  %v4332_v38 = vadd.f32 %v4331_v57, %v4169_v9  ;;  %v4292_v29 = vpop.f32.mrb[45].mxu1  ;;  %v4333_v36 = vpop.f32.mrb[17].mxu0 }
 0xd0d   : > { %v4293_v58 = vadd.f32 %v4292_v29, %v4169_v9  ;;  %v4334_v5 = vadd.f32 %v4333_v36, %v4169_v9  ;;  %v4294_v60 = vpop.f32.mrb[46].mxu1  ;;  %v4335_v51 = vpop.f32.mrb[18].mxu0 }
 0xd0e   : > { %v4342_v26 = vsub.f32 0.0, %v4291_v20  ;;  %v4344_v42 = vsub.f32 0.0, %v4332_v38  ;;  %v4295_v10 = vpop.f32.mrb[47].mxu1  ;;  %v4336_v16 = vpop.f32.mrb[19].mxu0 }
 0xd0f   : > { %v4343_v54 = vsub.f32 0.0, %v4293_v58  ;;  %v4345_v41 = vsub.f32 0.0, %v4334_v5 }
 0xd10   : > { %v4354_v17 = vmul.f32 1.442695, %v4342_v26  ;;  %v4358_v59 = vmul.f32 1.442695, %v4344_v42 }
 0xd11   : > { %v4356_v8 = vmul.f32 1.442695, %v4343_v54  ;;  %v4360_v56 = vmul.f32 1.442695, %v4345_v41 }
 0xd12   : > { %5315 = vpow2.f32 %v4354_v17 }
 0xd13   : > { %5317 = vpow2.f32 %v4358_v59 }
 0xd14   : > { %5319 = vpow2.f32 %v4356_v8 }
 0xd15   : > { %5321 = vpow2.f32 %v4360_v56 }
 0xd1c   : > { %v5316_v0 = vpop.eup %5315 }
 0xd1d   : > { %v5318_v40 = vpop.eup %5317  ;;  %v4366_v61 = vadd.f32 1.0, %v5316_v0 }
 0xd1e   : > { %v5320_v9 = vpop.eup %5319  ;;  %v4368_v13 = vadd.f32 1.0, %v5318_v40 }
 0xd1f   : > { %v5322_v14 = vpop.eup %5321  ;;  %5323 = vrcp.f32 %v4366_v61  ;;  %v4367_v27 = vadd.f32 1.0, %v5320_v9 }
 0xd20   : > { %5325 = vrcp.f32 %v4368_v13  ;;  %v4369_v47 = vadd.f32 1.0, %v5322_v14 }
 0xd21   : > { %5327 = vrcp.f32 %v4367_v27 }
 0xd22   : > { %5329 = vrcp.f32 %v4369_v47 }
 0xd29   : > { %v5324_v43 = vpop.eup %5323 }
 0xd2a   : > { %v5326_v18 = vpop.eup %5325  ;;  %v4382_v22 = vmax.f32 %v5324_v43, 0.0 }
 0xd2b   : > { %v5328_v4 = vpop.eup %5327  ;;  %v4384_v39 = vmax.f32 %v5326_v18, 0.0 }
 0xd2c   : > { %v5330_v34 = vpop.eup %5329  ;;  %v4390_v21 = vmin.f32 %v4382_v22, 1.0  ;;  %v4383_v25 = vmax.f32 %v5328_v4, 0.0 }
 0xd2d   : > { %v4392_v28 = vmin.f32 %v4384_v39, 1.0  ;;  %v4385_v45 = vmax.f32 %v5330_v34, 0.0 }
 0xd2e   : > { %v4391_v55 = vmin.f32 %v4383_v25, 1.0 }
 0xd2f   : > { %v4393_v6 = vmin.f32 %v4385_v45, 1.0 }
 0xd30   : > { %v4404_v37 = vcombine.low %v4390_v21, %v4391_v55 }
 0xd31   : > { %v4405_v30 = vcombine.low %v4392_v28, %v4393_v6 }
 0xd32   : > { %4412 = vst [vmem:[%s7816_s16 + $0x10] sm:$0x77] %v4404_v37 }
 0xd33   : > { %4413 = vst [vmem:[%s7816_s16 + $0x18] sm:$0x77] %v4405_v30 }
 0xd34 PF: > { %s25_s18 = sadd.s32 1, %s5338_s18  }
 0xd35   : > { %p22_p4 = scmp.ge.s32.totalorder %s25_s18, 4  }
 0xd37   :  { %24 = sbr.rel (!%p22_p4) target bundleno = 1 (0x1), region = 110 }

</bundles_post_ra>
